<compile_context>
chip_gen: v5e
topology: v5e:2x2
jax: 0.10.0
libtpu: 0.0.40
codegen_flags: <defaults>
</compile_context>

<pallas_src>
import functools

import numpy as np
import jax
import jax.numpy as jnp
from jax import lax
from jax.experimental import pallas as pl
from jax.experimental.pallas import tpu as pltpu


def _bilinear_matrix(out_size: int, in_size: int) -> np.ndarray:
    """Row-interpolation matrix matching F.interpolate(bilinear, align_corners=False)."""
    scale = in_size / out_size
    dst = np.arange(out_size, dtype=np.float64)
    src = (dst + 0.5) * scale - 0.5
    src = np.maximum(src, 0.0)
    i0 = np.minimum(np.floor(src).astype(np.int64), in_size - 1)
    i1 = np.minimum(i0 + 1, in_size - 1)
    lam = src - i0
    R = np.zeros((out_size, in_size), dtype=np.float32)
    R[np.arange(out_size), i0] += (1.0 - lam).astype(np.float32)
    R[np.arange(out_size), i1] += lam.astype(np.float32)
    return R


def _decoder_kernel(xflat_ref, w1_ref, bias_ref, w2t_ref, rwb_ref, rhbt_ref,
                    out_ref, vbuf_ref, *, batch, hf, wf, mext, nc8, w):
    wp = wf + 2
    cmid = bias_ref.shape[-1]

    # ---- 3x3 conv (pad=1, BN scale folded into the weights) as 9 accumulating
    #      tap matmuls over shifted windows of the padded, flattened input. -------
    y = jnp.zeros((mext, cmid), jnp.float32)
    for dy in range(3):
        for dx in range(3):
            s = dy * wp + dx                               # static window start
            tap = xflat_ref[s:s + mext, :]                 # [Mext, Cin] bf16
            y = y + jnp.dot(tap, w1_ref[dy * 3 + dx],      # [Cin, Cmid] bf16
                            preferred_element_type=jnp.float32)
    # BatchNorm bias + ReLU6.  Dropout2d(p=0.1, inplace) is identity at inference.
    y = jnp.minimum(jnp.maximum(y + bias_ref[...], 0.0), 6.0)

    # ---- 1x1 conv with classes on the sublane axis: [NC8, Cmid] x [Mext, Cmid]^T.
    zt = lax.dot_general(w2t_ref[...], y, (((1,), (1,)), ((), ())),
                         preferred_element_type=jnp.float32)      # [NC8, Mext] f32

    # ---- bilinear upsample stage 1 (width): ONE matmul with the (b,p)-block-
    #      diagonal Rw^T.  Zero rows of rwb discard the conv "junk" rows. ---------
    vwide = jnp.dot(zt.astype(jnp.bfloat16), rwb_ref[...],
                    preferred_element_type=jnp.float32)           # [NC8, B*Hf*w]

    # Re-tile into (b, p, class)-major rows for the height stage: every slice is
    # 128-lane / 8-sublane aligned -> B*Hf cheap single-vreg copies.
    for k in range(batch * hf):
        vbuf_ref[k * nc8:(k + 1) * nc8, :] = (
            vwide[:, k * w:(k + 1) * w].astype(jnp.bfloat16))

    # ---- stage 2 (height): ONE (b,class)-block-diagonal matmul produces the
    #      NCHW-flat [B*Ncls*h, w] slab directly -> lane-dense unmasked stores. ---
    out_ref[...] = jnp.dot(rhbt_ref[...], vbuf_ref[...],
                           preferred_element_type=jnp.float32)


@functools.partial(jax.jit, static_argnums=(2, 3))
def mobilevit_seg_decoder(feat_nchw, params, h, w):
    """Decoder.forward(x, h, w) on the backbone's last feature map (NCHW in/out)."""
    w1, bn_scale, bn_bias, w2 = params          # w1: [3,3,Cin,Cmid] HWIO, w2: [Cmid,Ncls]
    B, Cin, Hf, Wf = feat_nchw.shape
    Cmid = w1.shape[-1]
    Ncls = w2.shape[-1]
    Hp, Wp = Hf + 2, Wf + 2
    LP = Hp * Wp                                # padded pixels per image
    NC8 = -(-Ncls // 8) * 8                     # classes padded to a sublane tile

    # Extended-row bookkeeping for the in-kernel im2col window trick:
    # extended output row m = b*LP + i*Wp + j (top-left-tap flat index); valid rows
    # have j < Wf, everything else is junk that the width-interp matrix zeroes out.
    m_last = (B - 1) * LP + (Hf - 1) * Wp + (Wf - 1)
    Mext = -(-(m_last + 1) // 8) * 8            # rows the conv actually computes
    max_start = 2 * Wp + 2                      # largest tap window offset
    ML = -(-max(B * LP, max_start + Mext) // 8) * 8

    # ---- glue: channels-last, zero-padded, spatially flattened, bf16 (few small
    #      fused ops under jit; no 9x im2col inflation). -------------------------
    x = jnp.transpose(feat_nchw, (0, 2, 3, 1)).astype(jnp.bfloat16)   # NHWC
    xp = jnp.pad(x, ((0, 0), (1, 1), (1, 1), (0, 0)))                 # [B,Hp,Wp,Cin]
    xflat = jnp.pad(xp.reshape(B * LP, Cin), ((0, ML - B * LP), (0, 0)))

    # ---- glue: fold BN scale into the conv weight; tap-major [9, Cin, Cmid] -----
    w1f = (w1 * bn_scale).reshape(9, Cin, Cmid).astype(jnp.bfloat16)
    bias2 = bn_bias.reshape(1, Cmid).astype(jnp.float32)
    w2t8 = jnp.zeros((NC8, Cmid), jnp.float32).at[:Ncls, :].set(w2.T)  # [NC8, Cmid]

    # ---- glue: PyTorch-exact separable bilinear matrices (numpy -> jit constants).
    # For these sizes the coefficients are exact multiples of 1/64 -> bf16 lossless.
    Rh = _bilinear_matrix(h, Hf)                                      # [h, Hf]
    Rw = _bilinear_matrix(w, Wf)                                      # [w, Wf]
    # (b,p)-block-diagonal Rw^T over the extended conv rows (zero on junk rows):
    #   rwb[b*LP + p*Wp + jf, (b*Hf+p)*w + x] = Rw[x, jf]
    rwb_np = np.zeros((Mext, B * Hf * w), np.float32)
    for b in range(B):
        for p in range(Hf):
            for jf in range(Wf):
                rwb_np[b * LP + p * Wp + jf,
                       (b * Hf + p) * w:(b * Hf + p + 1) * w] = Rw[:, jf]
    # (b,class)-block-diagonal Rh so one matmul emits the whole NCHW-flat output:
    #   rhbt[(b*Ncls+c)*h + i, b*Hf*NC8 + p*NC8 + c] = Rh[i, p]
    rhbt_np = np.zeros((B * Ncls * h, B * Hf * NC8), np.float32)
    for b in range(B):
        for c in range(Ncls):
            for p in range(Hf):
                rhbt_np[(b * Ncls + c) * h:(b * Ncls + c + 1) * h,
                        b * Hf * NC8 + p * NC8 + c] = Rh[:, p]
    rwb = jnp.asarray(rwb_np, dtype=jnp.bfloat16)
    rhbt = jnp.asarray(rhbt_np, dtype=jnp.bfloat16)

    kernel = functools.partial(_decoder_kernel, batch=B, hf=Hf, wf=Wf,
                               mext=Mext, nc8=NC8, w=w)

    out_flat = pl.pallas_call(
        kernel,
        out_shape=jax.ShapeDtypeStruct((B * Ncls * h, w), jnp.float32),
        grid_spec=pltpu.PrefetchScalarGridSpec(
            num_scalar_prefetch=0,
            grid=(1,),
            in_specs=[
                pl.BlockSpec((ML, Cin), lambda i: (0, 0)),            # padded flat feat (bf16)
                pl.BlockSpec((9, Cin, Cmid), lambda i: (0, 0, 0)),    # 3x3 conv weight, tap-major
                pl.BlockSpec((1, Cmid), lambda i: (0, 0)),            # BN bias
                pl.BlockSpec((NC8, Cmid), lambda i: (0, 0)),          # 1x1 conv weight^T (padded)
                pl.BlockSpec((Mext, B * Hf * w), lambda i: (0, 0)),   # block-diag width interp
                pl.BlockSpec((B * Ncls * h, B * Hf * NC8),            # block-diag height interp
                             lambda i: (0, 0)),
            ],
            out_specs=pl.BlockSpec((B * Ncls * h, w), lambda i: (0, 0)),
            scratch_shapes=[pltpu.VMEM((B * Hf * NC8, w), jnp.bfloat16)],
        ),
        compiler_params=pltpu.CompilerParams(dimension_semantics=("arbitrary",)),
    )(xflat, w1f, bias2, w2t8, rwb, rhbt)

    # glue: free reshape to PyTorch NCHW [B, num_classes, h, w] (no transpose).
    return out_flat.reshape(B, Ncls, h, w)


def _reference(feat_nchw, w1, bn_scale, bn_bias, w2, h, w):
    """Pure-JAX f32 reference of the same math (for a numerical self-check)."""
    x = jnp.transpose(feat_nchw, (0, 2, 3, 1))
    y = lax.conv_general_dilated(x, w1, (1, 1), 'SAME',
                                 dimension_numbers=('NHWC', 'HWIO', 'NHWC'))
    y = jnp.clip(y * bn_scale + bn_bias, 0.0, 6.0)
    z = jnp.einsum('bhwc,cn->bhwn', y, w2)
    Rh = jnp.asarray(_bilinear_matrix(h, x.shape[1]))
    Rw = jnp.asarray(_bilinear_matrix(w, x.shape[2]))
    out = jnp.einsum('ip,jq,bpqn->bijn', Rh, Rw, z)
    return jnp.transpose(out, (0, 3, 1, 2))


if __name__ == "__main__":
    # Shapes consistent with the module: Decoder(encoder_channels=640,
    # decode_channels=64, num_classes=6); the backbone downsamples by 32x, so a
    # 128x128 input image gives a 4x4x640 feature map.
    B, Cin, Hf, Wf = 2, 640, 4, 4
    Cmid, Ncls = 64, 6
    h, w = 128, 128

    key = jax.random.PRNGKey(0)
    kx, k1, k2, k3, k4, k5, k6 = jax.random.split(key, 7)

    feat = jax.random.normal(kx, (B, Cin, Hf, Wf), jnp.float32)       # backbone output

    # Deterministic synthetic parameters (shapes from Decoder.__init__).
    w1 = jax.random.normal(k1, (3, 3, Cin, Cmid), jnp.float32) * (2.0 / (9 * Cin)) ** 0.5
    w2 = jax.random.normal(k2, (Cmid, Ncls), jnp.float32) * (2.0 / Cmid) ** 0.5
    gamma = jax.random.uniform(k3, (Cmid,), jnp.float32, 0.5, 1.5)
    beta = jax.random.normal(k4, (Cmid,), jnp.float32) * 0.1
    run_mean = jax.random.normal(k5, (Cmid,), jnp.float32) * 0.1
    run_var = jax.random.uniform(k6, (Cmid,), jnp.float32, 0.5, 1.5)
    eps = 1e-5
    bn_scale = gamma / jnp.sqrt(run_var + eps)
    bn_bias = beta - run_mean * bn_scale

    out = mobilevit_seg_decoder(feat, (w1, bn_scale, bn_bias, w2), h, w)
    out = jax.block_until_ready(out)
    assert out.shape == (B, Ncls, h, w)

    ref = jax.block_until_ready(_reference(feat, w1, bn_scale, bn_bias, w2, h, w))
    # Tolerance widened from 2e-2 -> 3e-2 for the bf16 conv inputs + bf16
    # interpolation path (review #4); all matmuls still accumulate in f32 and the
    # interpolation coefficients themselves are exact in bf16.
    np.testing.assert_allclose(np.asarray(out), np.asarray(ref), rtol=3e-2, atol=3e-2)

    print("KERNEL_OK")
</pallas_src>

<mosaic_0001>
module attributes {stable_mosaic.version = 11 : i64} {
  func.func @_decoder_kernel(%arg0: i32, %arg1: memref<80x640xbf16, #tpu.memory_space<vmem>>, %arg2: memref<9x640x64xbf16, #tpu.memory_space<vmem>>, %arg3: memref<1x64xf32, #tpu.memory_space<vmem>>, %arg4: memref<8x64xf32, #tpu.memory_space<vmem>>, %arg5: memref<64x1024xbf16, #tpu.memory_space<vmem>>, %arg6: memref<1536x64xbf16, #tpu.memory_space<vmem>>, %arg7: memref<1536x128xf32, #tpu.memory_space<vmem>>, %arg8: memref<64x128xbf16, #tpu.memory_space<vmem>>) attributes {dimension_semantics = [#tpu.dimension_semantics<arbitrary>], iteration_bounds = array<i64: 1>, scalar_prefetch = 0 : i64, scratch_operands = 1 : i64, tpu.core_type = #tpu.core_type<tc>, window_params = [{pipeline_mode = #tpu.pipeline_mode<synchronous>, transform_indices = @transform_0, window_bounds = array<i64: 80, 640>}, {pipeline_mode = #tpu.pipeline_mode<synchronous>, transform_indices = @transform_1, window_bounds = array<i64: 9, 640, 64>}, {pipeline_mode = #tpu.pipeline_mode<synchronous>, transform_indices = @transform_2, window_bounds = array<i64: 1, 64>}, {pipeline_mode = #tpu.pipeline_mode<synchronous>, transform_indices = @transform_3, window_bounds = array<i64: 8, 64>}, {pipeline_mode = #tpu.pipeline_mode<synchronous>, transform_indices = @transform_4, window_bounds = array<i64: 64, 1024>}, {pipeline_mode = #tpu.pipeline_mode<synchronous>, transform_indices = @transform_5, window_bounds = array<i64: 1536, 64>}, {pipeline_mode = #tpu.pipeline_mode<synchronous>, transform_indices = @transform_6, window_bounds = array<i64: 1536, 128>}]} {
    %cst = arith.constant 0.000000e+00 : f32
    %0 = vector.broadcast %cst : f32 to vector<64x64xf32>
    %c0 = arith.constant 0 : index
    %c0_0 = arith.constant 0 : index
    %1 = vector.load %arg1[%c0, %c0_0] : memref<80x640xbf16, #tpu.memory_space<vmem>>, vector<64x640xbf16>
    %c0_1 = arith.constant 0 : index
    %c0_2 = arith.constant 0 : index
    %c0_3 = arith.constant 0 : index
    %2 = vector.load %arg2[%c0_1, %c0_2, %c0_3] : memref<9x640x64xbf16, #tpu.memory_space<vmem>>, vector<1x640x64xbf16>
    %3 = vector.shape_cast %2 : vector<1x640x64xbf16> to vector<640x64xbf16>
    %cst_4 = arith.constant dense<0.000000e+00> : vector<64x64xf32>
    %4 = tpu.matmul %1, %3, %cst_4 {dimension_numbers = #tpu.dot_dimension_numbers<[1], [0], [0], [1], [0, 0, 1, 1], [], []>} : vector<64x640xbf16>, vector<640x64xbf16>, vector<64x64xf32> -> vector<64x64xf32>
    %5 = arith.addf %0, %4 : vector<64x64xf32>
    %c1 = arith.constant 1 : index
    %c0_5 = arith.constant 0 : index
    %6 = vector.load %arg1[%c1, %c0_5] : memref<80x640xbf16, #tpu.memory_space<vmem>>, vector<64x640xbf16>
    %c1_6 = arith.constant 1 : index
    %c0_7 = arith.constant 0 : index
    %c0_8 = arith.constant 0 : index
    %7 = vector.load %arg2[%c1_6, %c0_7, %c0_8] : memref<9x640x64xbf16, #tpu.memory_space<vmem>>, vector<1x640x64xbf16>
    %8 = vector.shape_cast %7 : vector<1x640x64xbf16> to vector<640x64xbf16>
    %cst_9 = arith.constant dense<0.000000e+00> : vector<64x64xf32>
    %9 = tpu.matmul %6, %8, %cst_9 {dimension_numbers = #tpu.dot_dimension_numbers<[1], [0], [0], [1], [0, 0, 1, 1], [], []>} : vector<64x640xbf16>, vector<640x64xbf16>, vector<64x64xf32> -> vector<64x64xf32>
    %10 = arith.addf %5, %9 : vector<64x64xf32>
    %c2 = arith.constant 2 : index
    %c0_10 = arith.constant 0 : index
    %11 = vector.load %arg1[%c2, %c0_10] : memref<80x640xbf16, #tpu.memory_space<vmem>>, vector<64x640xbf16>
    %c2_11 = arith.constant 2 : index
    %c0_12 = arith.constant 0 : index
    %c0_13 = arith.constant 0 : index
    %12 = vector.load %arg2[%c2_11, %c0_12, %c0_13] : memref<9x640x64xbf16, #tpu.memory_space<vmem>>, vector<1x640x64xbf16>
    %13 = vector.shape_cast %12 : vector<1x640x64xbf16> to vector<640x64xbf16>
    %cst_14 = arith.constant dense<0.000000e+00> : vector<64x64xf32>
    %14 = tpu.matmul %11, %13, %cst_14 {dimension_numbers = #tpu.dot_dimension_numbers<[1], [0], [0], [1], [0, 0, 1, 1], [], []>} : vector<64x640xbf16>, vector<640x64xbf16>, vector<64x64xf32> -> vector<64x64xf32>
    %15 = arith.addf %10, %14 : vector<64x64xf32>
    %c6 = arith.constant 6 : index
    %c0_15 = arith.constant 0 : index
    %16 = vector.load %arg1[%c6, %c0_15] : memref<80x640xbf16, #tpu.memory_space<vmem>>, vector<64x640xbf16>
    %c3 = arith.constant 3 : index
    %c0_16 = arith.constant 0 : index
    %c0_17 = arith.constant 0 : index
    %17 = vector.load %arg2[%c3, %c0_16, %c0_17] : memref<9x640x64xbf16, #tpu.memory_space<vmem>>, vector<1x640x64xbf16>
    %18 = vector.shape_cast %17 : vector<1x640x64xbf16> to vector<640x64xbf16>
    %cst_18 = arith.constant dense<0.000000e+00> : vector<64x64xf32>
    %19 = tpu.matmul %16, %18, %cst_18 {dimension_numbers = #tpu.dot_dimension_numbers<[1], [0], [0], [1], [0, 0, 1, 1], [], []>} : vector<64x640xbf16>, vector<640x64xbf16>, vector<64x64xf32> -> vector<64x64xf32>
    %20 = arith.addf %15, %19 : vector<64x64xf32>
    %c7 = arith.constant 7 : index
    %c0_19 = arith.constant 0 : index
    %21 = vector.load %arg1[%c7, %c0_19] : memref<80x640xbf16, #tpu.memory_space<vmem>>, vector<64x640xbf16>
    %c4 = arith.constant 4 : index
    %c0_20 = arith.constant 0 : index
    %c0_21 = arith.constant 0 : index
    %22 = vector.load %arg2[%c4, %c0_20, %c0_21] : memref<9x640x64xbf16, #tpu.memory_space<vmem>>, vector<1x640x64xbf16>
    %23 = vector.shape_cast %22 : vector<1x640x64xbf16> to vector<640x64xbf16>
    %cst_22 = arith.constant dense<0.000000e+00> : vector<64x64xf32>
    %24 = tpu.matmul %21, %23, %cst_22 {dimension_numbers = #tpu.dot_dimension_numbers<[1], [0], [0], [1], [0, 0, 1, 1], [], []>} : vector<64x640xbf16>, vector<640x64xbf16>, vector<64x64xf32> -> vector<64x64xf32>
    %25 = arith.addf %20, %24 : vector<64x64xf32>
    %c8 = arith.constant 8 : index
    %c0_23 = arith.constant 0 : index
    %26 = vector.load %arg1[%c8, %c0_23] : memref<80x640xbf16, #tpu.memory_space<vmem>>, vector<64x640xbf16>
    %c5 = arith.constant 5 : index
    %c0_24 = arith.constant 0 : index
    %c0_25 = arith.constant 0 : index
    %27 = vector.load %arg2[%c5, %c0_24, %c0_25] : memref<9x640x64xbf16, #tpu.memory_space<vmem>>, vector<1x640x64xbf16>
    %28 = vector.shape_cast %27 : vector<1x640x64xbf16> to vector<640x64xbf16>
    %cst_26 = arith.constant dense<0.000000e+00> : vector<64x64xf32>
    %29 = tpu.matmul %26, %28, %cst_26 {dimension_numbers = #tpu.dot_dimension_numbers<[1], [0], [0], [1], [0, 0, 1, 1], [], []>} : vector<64x640xbf16>, vector<640x64xbf16>, vector<64x64xf32> -> vector<64x64xf32>
    %30 = arith.addf %25, %29 : vector<64x64xf32>
    %c12 = arith.constant 12 : index
    %c0_27 = arith.constant 0 : index
    %31 = vector.load %arg1[%c12, %c0_27] : memref<80x640xbf16, #tpu.memory_space<vmem>>, vector<64x640xbf16>
    %c6_28 = arith.constant 6 : index
    %c0_29 = arith.constant 0 : index
    %c0_30 = arith.constant 0 : index
    %32 = vector.load %arg2[%c6_28, %c0_29, %c0_30] : memref<9x640x64xbf16, #tpu.memory_space<vmem>>, vector<1x640x64xbf16>
    %33 = vector.shape_cast %32 : vector<1x640x64xbf16> to vector<640x64xbf16>
    %cst_31 = arith.constant dense<0.000000e+00> : vector<64x64xf32>
    %34 = tpu.matmul %31, %33, %cst_31 {dimension_numbers = #tpu.dot_dimension_numbers<[1], [0], [0], [1], [0, 0, 1, 1], [], []>} : vector<64x640xbf16>, vector<640x64xbf16>, vector<64x64xf32> -> vector<64x64xf32>
    %35 = arith.addf %30, %34 : vector<64x64xf32>
    %c13 = arith.constant 13 : index
    %c0_32 = arith.constant 0 : index
    %36 = vector.load %arg1[%c13, %c0_32] : memref<80x640xbf16, #tpu.memory_space<vmem>>, vector<64x640xbf16>
    %c7_33 = arith.constant 7 : index
    %c0_34 = arith.constant 0 : index
    %c0_35 = arith.constant 0 : index
    %37 = vector.load %arg2[%c7_33, %c0_34, %c0_35] : memref<9x640x64xbf16, #tpu.memory_space<vmem>>, vector<1x640x64xbf16>
    %38 = vector.shape_cast %37 : vector<1x640x64xbf16> to vector<640x64xbf16>
    %cst_36 = arith.constant dense<0.000000e+00> : vector<64x64xf32>
    %39 = tpu.matmul %36, %38, %cst_36 {dimension_numbers = #tpu.dot_dimension_numbers<[1], [0], [0], [1], [0, 0, 1, 1], [], []>} : vector<64x640xbf16>, vector<640x64xbf16>, vector<64x64xf32> -> vector<64x64xf32>
    %40 = arith.addf %35, %39 : vector<64x64xf32>
    %c14 = arith.constant 14 : index
    %c0_37 = arith.constant 0 : index
    %41 = vector.load %arg1[%c14, %c0_37] : memref<80x640xbf16, #tpu.memory_space<vmem>>, vector<64x640xbf16>
    %c8_38 = arith.constant 8 : index
    %c0_39 = arith.constant 0 : index
    %c0_40 = arith.constant 0 : index
    %42 = vector.load %arg2[%c8_38, %c0_39, %c0_40] : memref<9x640x64xbf16, #tpu.memory_space<vmem>>, vector<1x640x64xbf16>
    %43 = vector.shape_cast %42 : vector<1x640x64xbf16> to vector<640x64xbf16>
    %cst_41 = arith.constant dense<0.000000e+00> : vector<64x64xf32>
    %44 = tpu.matmul %41, %43, %cst_41 {dimension_numbers = #tpu.dot_dimension_numbers<[1], [0], [0], [1], [0, 0, 1, 1], [], []>} : vector<64x640xbf16>, vector<640x64xbf16>, vector<64x64xf32> -> vector<64x64xf32>
    %45 = arith.addf %40, %44 : vector<64x64xf32>
    %c0_42 = arith.constant 0 : index
    %c0_43 = arith.constant 0 : index
    %46 = vector.load %arg3[%c0_42, %c0_43] : memref<1x64xf32, #tpu.memory_space<vmem>>, vector<1x64xf32>
    %47 = vector.broadcast %46 : vector<1x64xf32> to vector<64x64xf32>
    %48 = arith.addf %45, %47 : vector<64x64xf32>
    %cst_44 = arith.constant 0.000000e+00 : f32
    %49 = vector.broadcast %cst_44 : f32 to vector<64x64xf32>
    %50 = arith.maximumf %48, %49 : vector<64x64xf32>
    %cst_45 = arith.constant 6.000000e+00 : f32
    %51 = vector.broadcast %cst_45 : f32 to vector<64x64xf32>
    %52 = arith.minimumf %50, %51 : vector<64x64xf32>
    %c0_46 = arith.constant 0 : index
    %c0_47 = arith.constant 0 : index
    %53 = vector.load %arg4[%c0_46, %c0_47] : memref<8x64xf32, #tpu.memory_space<vmem>>, vector<8x64xf32>
    %cst_48 = arith.constant dense<0.000000e+00> : vector<8x64xf32>
    %54 = tpu.matmul %53, %52, %cst_48 {dimension_numbers = #tpu.dot_dimension_numbers<[1], [1], [0], [0], [0, 0, 1, 0], [], []>} : vector<8x64xf32>, vector<64x64xf32>, vector<8x64xf32> -> vector<8x64xf32>
    %55 = arith.truncf %54 : vector<8x64xf32> to vector<8x64xbf16>
    %c0_49 = arith.constant 0 : index
    %c0_50 = arith.constant 0 : index
    %56 = vector.load %arg5[%c0_49, %c0_50] : memref<64x1024xbf16, #tpu.memory_space<vmem>>, vector<64x1024xbf16>
    %cst_51 = arith.constant dense<0.000000e+00> : vector<8x1024xf32>
    %57 = tpu.matmul %55, %56, %cst_51 {dimension_numbers = #tpu.dot_dimension_numbers<[1], [0], [0], [1], [0, 0, 1, 1], [], []>} : vector<8x64xbf16>, vector<64x1024xbf16>, vector<8x1024xf32> -> vector<8x1024xf32>
    %58 = vector.extract_strided_slice %57 {offsets = [0, 0], sizes = [8, 128], strides = [1, 1]} : vector<8x1024xf32> to vector<8x128xf32>
    %59 = arith.truncf %58 : vector<8x128xf32> to vector<8x128xbf16>
    %c0_52 = arith.constant 0 : index
    %c0_53 = arith.constant 0 : index
    %60 = vector.load %arg8[%c0_52, %c0_53] : memref<64x128xbf16, #tpu.memory_space<vmem>>, vector<8x128xbf16>
    tpu.vector_store %arg8[%c0_52, %c0_53], %59 {strides = array<i32>} : memref<64x128xbf16, #tpu.memory_space<vmem>>, vector<8x128xbf16>,
    %61 = vector.extract_strided_slice %57 {offsets = [0, 128], sizes = [8, 128], strides = [1, 1]} : vector<8x1024xf32> to vector<8x128xf32>
    %62 = arith.truncf %61 : vector<8x128xf32> to vector<8x128xbf16>
    %c8_54 = arith.constant 8 : index
    %c0_55 = arith.constant 0 : index
    %63 = vector.load %arg8[%c8_54, %c0_55] : memref<64x128xbf16, #tpu.memory_space<vmem>>, vector<8x128xbf16>
    tpu.vector_store %arg8[%c8_54, %c0_55], %62 {strides = array<i32>} : memref<64x128xbf16, #tpu.memory_space<vmem>>, vector<8x128xbf16>,
    %64 = vector.extract_strided_slice %57 {offsets = [0, 256], sizes = [8, 128], strides = [1, 1]} : vector<8x1024xf32> to vector<8x128xf32>
    %65 = arith.truncf %64 : vector<8x128xf32> to vector<8x128xbf16>
    %c16 = arith.constant 16 : index
    %c0_56 = arith.constant 0 : index
    %66 = vector.load %arg8[%c16, %c0_56] : memref<64x128xbf16, #tpu.memory_space<vmem>>, vector<8x128xbf16>
    tpu.vector_store %arg8[%c16, %c0_56], %65 {strides = array<i32>} : memref<64x128xbf16, #tpu.memory_space<vmem>>, vector<8x128xbf16>,
    %67 = vector.extract_strided_slice %57 {offsets = [0, 384], sizes = [8, 128], strides = [1, 1]} : vector<8x1024xf32> to vector<8x128xf32>
    %68 = arith.truncf %67 : vector<8x128xf32> to vector<8x128xbf16>
    %c24 = arith.constant 24 : index
    %c0_57 = arith.constant 0 : index
    %69 = vector.load %arg8[%c24, %c0_57] : memref<64x128xbf16, #tpu.memory_space<vmem>>, vector<8x128xbf16>
    tpu.vector_store %arg8[%c24, %c0_57], %68 {strides = array<i32>} : memref<64x128xbf16, #tpu.memory_space<vmem>>, vector<8x128xbf16>,
    %70 = vector.extract_strided_slice %57 {offsets = [0, 512], sizes = [8, 128], strides = [1, 1]} : vector<8x1024xf32> to vector<8x128xf32>
    %71 = arith.truncf %70 : vector<8x128xf32> to vector<8x128xbf16>
    %c32 = arith.constant 32 : index
    %c0_58 = arith.constant 0 : index
    %72 = vector.load %arg8[%c32, %c0_58] : memref<64x128xbf16, #tpu.memory_space<vmem>>, vector<8x128xbf16>
    tpu.vector_store %arg8[%c32, %c0_58], %71 {strides = array<i32>} : memref<64x128xbf16, #tpu.memory_space<vmem>>, vector<8x128xbf16>,
    %73 = vector.extract_strided_slice %57 {offsets = [0, 640], sizes = [8, 128], strides = [1, 1]} : vector<8x1024xf32> to vector<8x128xf32>
    %74 = arith.truncf %73 : vector<8x128xf32> to vector<8x128xbf16>
    %c40 = arith.constant 40 : index
    %c0_59 = arith.constant 0 : index
    %75 = vector.load %arg8[%c40, %c0_59] : memref<64x128xbf16, #tpu.memory_space<vmem>>, vector<8x128xbf16>
    tpu.vector_store %arg8[%c40, %c0_59], %74 {strides = array<i32>} : memref<64x128xbf16, #tpu.memory_space<vmem>>, vector<8x128xbf16>,
    %76 = vector.extract_strided_slice %57 {offsets = [0, 768], sizes = [8, 128], strides = [1, 1]} : vector<8x1024xf32> to vector<8x128xf32>
    %77 = arith.truncf %76 : vector<8x128xf32> to vector<8x128xbf16>
    %c48 = arith.constant 48 : index
    %c0_60 = arith.constant 0 : index
    %78 = vector.load %arg8[%c48, %c0_60] : memref<64x128xbf16, #tpu.memory_space<vmem>>, vector<8x128xbf16>
    tpu.vector_store %arg8[%c48, %c0_60], %77 {strides = array<i32>} : memref<64x128xbf16, #tpu.memory_space<vmem>>, vector<8x128xbf16>,
    %79 = vector.extract_strided_slice %57 {offsets = [0, 896], sizes = [8, 128], strides = [1, 1]} : vector<8x1024xf32> to vector<8x128xf32>
    %80 = arith.truncf %79 : vector<8x128xf32> to vector<8x128xbf16>
    %c56 = arith.constant 56 : index
    %c0_61 = arith.constant 0 : index
    %81 = vector.load %arg8[%c56, %c0_61] : memref<64x128xbf16, #tpu.memory_space<vmem>>, vector<8x128xbf16>
    tpu.vector_store %arg8[%c56, %c0_61], %80 {strides = array<i32>} : memref<64x128xbf16, #tpu.memory_space<vmem>>, vector<8x128xbf16>,
    %c0_62 = arith.constant 0 : index
    %c0_63 = arith.constant 0 : index
    %82 = vector.load %arg6[%c0_62, %c0_63] : memref<1536x64xbf16, #tpu.memory_space<vmem>>, vector<1536x64xbf16>
    %c0_64 = arith.constant 0 : index
    %c0_65 = arith.constant 0 : index
    %83 = vector.load %arg8[%c0_64, %c0_65] : memref<64x128xbf16, #tpu.memory_space<vmem>>, vector<64x128xbf16>
    %cst_66 = arith.constant dense<0.000000e+00> : vector<1536x128xf32>
    %84 = tpu.matmul %82, %83, %cst_66 {dimension_numbers = #tpu.dot_dimension_numbers<[1], [0], [0], [1], [0, 0, 1, 1], [], []>} : vector<1536x64xbf16>, vector<64x128xbf16>, vector<1536x128xf32> -> vector<1536x128xf32>
    %c0_67 = arith.constant 0 : index
    %c0_68 = arith.constant 0 : index
    %85 = vector.load %arg7[%c0_67, %c0_68] : memref<1536x128xf32, #tpu.memory_space<vmem>>, vector<1536x128xf32>
    tpu.vector_store %arg7[%c0_67, %c0_68], %84 {strides = array<i32>} : memref<1536x128xf32, #tpu.memory_space<vmem>>, vector<1536x128xf32>,
    return
  }
  func.func @transform_0(%arg0: i32) -> (i32, i32) {
    %c0_i32 = arith.constant 0 : i32
    %c0_i32_0 = arith.constant 0 : i32
    %c0_i32_1 = arith.constant 0 : i32
    return %c0_i32, %c0_i32_0 : i32, i32
  }
  func.func @transform_1(%arg0: i32) -> (i32, i32, i32) {
    %c0_i32 = arith.constant 0 : i32
    %c0_i32_0 = arith.constant 0 : i32
    %c0_i32_1 = arith.constant 0 : i32
    %c0_i32_2 = arith.constant 0 : i32
    return %c0_i32, %c0_i32_0, %c0_i32_1 : i32, i32, i32
  }
  func.func @transform_2(%arg0: i32) -> (i32, i32) {
    %c0_i32 = arith.constant 0 : i32
    %c0_i32_0 = arith.constant 0 : i32
    %c0_i32_1 = arith.constant 0 : i32
    return %c0_i32, %c0_i32_0 : i32, i32
  }
  func.func @transform_3(%arg0: i32) -> (i32, i32) {
    %c0_i32 = arith.constant 0 : i32
    %c0_i32_0 = arith.constant 0 : i32
    %c0_i32_1 = arith.constant 0 : i32
    return %c0_i32, %c0_i32_0 : i32, i32
  }
  func.func @transform_4(%arg0: i32) -> (i32, i32) {
    %c0_i32 = arith.constant 0 : i32
    %c0_i32_0 = arith.constant 0 : i32
    %c0_i32_1 = arith.constant 0 : i32
    return %c0_i32, %c0_i32_0 : i32, i32
  }
  func.func @transform_5(%arg0: i32) -> (i32, i32) {
    %c0_i32 = arith.constant 0 : i32
    %c0_i32_0 = arith.constant 0 : i32
    %c0_i32_1 = arith.constant 0 : i32
    return %c0_i32, %c0_i32_0 : i32, i32
  }
  func.func @transform_6(%arg0: i32) -> (i32, i32) {
    %c0_i32 = arith.constant 0 : i32
    %c0_i32_0 = arith.constant 0 : i32
    %c0_i32_1 = arith.constant 0 : i32
    return %c0_i32, %c0_i32_0 : i32, i32
  }
}

</mosaic_0001>

<bundles_post_ra>
// kernel: mobilevit_seg_decoder.1
= control target key start
LH: loop header
LB: loop body
LE: loop exit
PB: predicated region body
PF: predicated region fallthrough
CT: control target
= control target key end

     0   :  { %s14748_s0 = inlined_call_operand.vmem [shape: bf16[80,640], index: 0, kind: input, shape index: {}]   ;;  %s14749_s1 = inlined_call_operand.vmem [shape: bf16[9,640,64], index: 1, kind: input, shape index: {}]   ;;  %s14750_s2 = inlined_call_operand.vmem [shape: f32[1,64], index: 2, kind: input, shape index: {}]   ;;  %s14751_s3 = inlined_call_operand.vmem [shape: f32[8,64], index: 3, kind: input, shape index: {}]   ;;  %s14752_s4 = inlined_call_operand.vmem [shape: bf16[64,1024], index: 4, kind: input, shape index: {}]   ;;  %s14753_s5 = inlined_call_operand.vmem [shape: bf16[1536,64], index: 5, kind: input, shape index: {}]   ;;  %s14754_s6 = inlined_call_operand.hbm [shape: f32[1536,128], index: 6, kind: output, shape index: {}]  }
   0x1   :  { %v10461_v0 = vld [vmem:[%s14749_s1 + $0x178] sm:$0xff]  ;;  %v10460_v3 = vld [vmem:[%s14749_s1 + $0x170] sm:$0xff]  ;;  %v10459_v6 = vld [vmem:[%s14749_s1 + $0x168] sm:$0xff] }
   0x2   :  { %v10477_v1 = vld [vmem:[%s14749_s1 + $0x1f8] sm:$0xff]  ;;  %751 = vmatpush.bf16.msra.mxu0 %v10461_v0  ;;  %v10476_v4 = vld [vmem:[%s14749_s1 + $0x1f0] sm:$0xff]  ;;  %v10475_v7 = vld [vmem:[%s14749_s1 + $0x1e8] sm:$0xff] }
   0x3   :  { %v10485_v2 = vld [vmem:[%s14749_s1 + $0x238] sm:$0xff]  ;;  %809 = vmatpush.bf16.msra.mxu2 %v10477_v1  ;;  %v10484_v5 = vld [vmem:[%s14749_s1 + $0x230] sm:$0xff]  ;;  %v10483_v8 = vld [vmem:[%s14749_s1 + $0x228] sm:$0xff] }
   0x4   :  { %838 = vmatpush.bf16.msra.mxu3 %v10485_v2  ;;  %v10458_v9 = vld [vmem:[%s14749_s1 + $0x160] sm:$0xff]  ;;  %v11070_v11 = vld [vmem:[%s14748_s0 + $0x14] sm:$0xff]  ;;  %v26_v15 = vld [vmem:[%s14748_s0 + $0x8] sm:$0xff] }
   0x5   :  { %v11065_v10 = vld [vmem:[%s14748_s0] sm:$0xff]  ;;  %v11077_v14 = vunpack.c.l.b16 %v11070_v11  ;;  %v11088_v17 = vld [vmem:[%s14748_s0 + $0x28] sm:$0xff]  ;;  %v242_v19 = vunpack.c.l.b16 %v26_v15  ;;  %v11100_v21 = vld [vmem:[%s14749_s1 + $0x1b8] sm:$0xff]  ;;  %v243_v25 = vunpack.c.h.b16 %v26_v15 }
   0x6   :  { %752 = vmatpush.bf16.msra.mxu0 %v10460_v3  ;;  %v10474_v12 = vld [vmem:[%s14749_s1 + $0x1e0] sm:$0xff]  ;;  %v240_v13 = vunpack.c.l.b16 %v11065_v10  ;;  %v11108_v23 = vld [vmem:[%s14748_s0 + $0x30] sm:$0xff]  ;;  %10944 = vmatpush.bf16.msra.mxu1 %v11100_v21  ;;  %v14769_v28 = vunpack.c.l.b16 %v11088_v17  ;;  %v10457_v31 = vld [vmem:[%s14749_s1 + $0x158] sm:$0xff] }
   0x7   :  { %810 = vmatpush.bf16.msra.mxu2 %v10476_v4  ;;  %14864 = vst [vmem:[#allocation6_spill] sm:$0xff] %v11077_v14  ;;  %v29_v16 = vld [vmem:[%s14748_s0 + $0x1c] sm:$0xff]  ;;  %v11113_v24 = vld [vmem:[%s14748_s0 + $0x44] sm:$0xff]  ;;  %v11121_v27 = vld [vmem:[%s14749_s1 + $0x1b0] sm:$0xff]  ;;  %v14770_v33 = vunpack.c.l.b16 %v11108_v23 }
   0x8   :  { %839 = vmatpush.bf16.msra.mxu3 %v10484_v5  ;;  %v11093_v18 = vld [vmem:[%s14748_s0 + $0x3c] sm:$0xff]  ;;  %v11095_v20 = vunpack.c.l.b16 %v29_v16  ;;  %14866 = vst [vmem:[#allocation8_spill] sm:$0xff] %v11113_v24  ;;  %v11115_v26 = vunpack.c.h.b16 %v29_v16  ;;  %v11126_v30 = vpack.c.b16 %v11077_v14, %v240_v13  ;;  %v14767_v34 = vunpack.c.l.b16 %v11113_v24 }
   0x9   :  { %14865 = vst [vmem:[#allocation7_spill] sm:$0xff] %v11093_v18  ;;  %v10482_v22 = vld [vmem:[%s14749_s1 + $0x220] sm:$0xff]  ;;  %v14765_v29 = vunpack.c.l.b16 %v11093_v18  ;;  %v10473_v32 = vld [vmem:[%s14749_s1 + $0x1d8] sm:$0xff] }
   0xa   :  { %753 = vmatpush.bf16.msra.mxu0 %v10459_v6  ;;  %14867 = vst [vmem:[#allocation9_spill] sm:$0xff] %v11115_v26  ;;  %v11137_v35 = vpack.c.b16 %v11095_v20, %v242_v19 }
   0xb   :  { %811 = vmatpush.bf16.msra.mxu2 %v10475_v7 }
   0xc   :  { %840 = vmatpush.bf16.msra.mxu3 %v10483_v8 }
   0xe   :  { %754 = vmatpush.bf16.msra.mxu0 %v10458_v9 }
   0xf   :  { %812 = vmatpush.bf16.msra.mxu2 %v10474_v12 }
  0x10   :  { %11 = vsyncpa [#allocation4], 0  ;;  %841 = vmatpush.bf16.msra.mxu3 %v10482_v22  ;;  %v10481_v36 = vld [vmem:[%s14749_s1 + $0x218] sm:$0xff]  ;;  %v14758_v37 = vunpack.c.h.b16 %v11108_v23  ;;  %v14757_v38 = vunpack.c.h.b16 %v11113_v24  ;;  %v11145_v39 = vpack.c.b16 %v11115_v26, %v243_v25  ;;  %10945 = vmatpush.bf16.msra.mxu1 %v11121_v27  ;;  %v11151_v40 = vld [vmem:[%s14749_s1 + $0x1a8] sm:$0xff]  ;;  %v11157_v41 = vpack.c.b16 %v14765_v29, %v14769_v28  ;;  %s7621_s30 = sshll.u32 %s14754_s6, 4  ;;  %s10995_s7 = smov 128   ;;  %s7622_s30 = int_to_ptr.hbm [resolvable:$true] %s7621_s30 }
  0x11   :  { %v314_v42 = vshll.u32 %v11126_v30, 16  ;;  %v10456_v43 = vld [vmem:[%s14749_s1 + $0x150] sm:$0xff]  ;;  %v11170_v45 = vpack.c.b16 %v14767_v34, %v14770_v33  ;;  %v338_v46 = vshll.u32 %v11137_v35, 16  ;;  %v11187_v50 = vld [vmem:[%s14749_s1 + $0x1a0] sm:$0xff]  ;;  %v312_v51 = vshrl.u32 %v11126_v30, 16  ;;  %v10455_v54 = vld [vmem:[%s14749_s1 + $0x148] sm:$0xff] }
  0x12   :  { %755 = vmatpush.bf16.msra.mxu0 %v10457_v31  ;;  %v10472_v44 = vld [vmem:[%s14749_s1 + $0x1d0] sm:$0xff]  ;;  %v11180_v48 = vpack.c.b16 %v14757_v38, %v14758_v37  ;;  %v350_v49 = vshll.u32 %v11145_v39, 16  ;;  %v14811_v53 = vshll.u32 %v11157_v41, 16  ;;  %v10471_v55 = vld [vmem:[%s14749_s1 + $0x1c8] sm:$0xff]  ;;  %v336_v56 = vshrl.u32 %v11137_v35, 16  ;;  %v11212_v0 = vld [vmem:[%s14748_s0 + $0x78] sm:$0xff] }
  0x13   :  { %813 = vmatpush.bf16.msra.mxu2 %v10473_v32  ;;  %v10480_v47 = vld [vmem:[%s14749_s1 + $0x210] sm:$0xff]  ;;  %v316_v52 = vrot.slane %v314_v42, 1  ;;  %v340_v57 = vrot.slane %v338_v46, 1  ;;  %v14814_v58 = vshll.u32 %v11170_v45, 16  ;;  %v10479_v59 = vld [vmem:[%s14749_s1 + $0x208] sm:$0xff]  ;;  %v348_v60 = vshrl.u32 %v11145_v39, 16 }
  0x14   :  { %842 = vmatpush.bf16.msra.mxu3 %v10481_v36  ;;  %10946 = vmatpush.bf16.msra.mxu1 %v11151_v40  ;;  %v352_v61 = vrot.slane %v350_v49, 1  ;;  %v14810_v62 = vshll.u32 %v11180_v48, 16  ;;  %v11207_v63 = vld [vmem:[%s14748_s0 + $0x50] sm:$0xff]  ;;  %14869 = vst [vmem:[#allocation11_spill] sm:$0xff] %v11212_v0  ;;  %v11218_v1 = vld [vmem:[%s14749_s1 + $0x198] sm:$0xff]  ;;  %v321_v5 = vrot.slane %v14811_v53, 1  ;;  %v14762_v15 = vunpack.c.h.b16 %v11212_v0 }
  0x15   :  { %14868 = vst [vmem:[#allocation10_spill] sm:$0xff] %v11207_v63  ;;  %v11223_v2 = vld [vmem:[%s14748_s0 + $0x8c] sm:$0xff]  ;;  %v14768_v3 = vunpack.c.h.b16 %v11207_v63  ;;  %vm310_vm0 = vsmask.f32 7424  ;;  %v317_v4 = vor.u32 %v316_v52, %v312_v51  ;;  %v11231_v6 = vld [vmem:[%s14748_s0 + $0x64] sm:$0xff]  ;;  %v341_v9 = vor.u32 %v340_v57, %v336_v56  ;;  %v11251_v25 = vld [vmem:[%s14748_s0 + $0x58] sm:$0xff] }
  0x16   :  { %756 = vmatpush.bf16.msra.mxu0 %v10456_v43  ;;  %14870 = vst [vmem:[#allocation12_spill] sm:$0xff] %v11223_v2  ;;  %v10454_v7 = vld [vmem:[%s14749_s1 + $0x140] sm:$0xff]  ;;  %v345_v12 = vrot.slane %v14814_v58, 1  ;;  %v14763_v13 = vunpack.c.h.b16 %v11231_v6  ;;  %v353_v19 = vor.u32 %v352_v61, %v348_v60  ;;  %v357_v22 = vrot.slane %v14810_v62, 1  ;;  %v11256_v31 = vld [vmem:[%s14748_s0 + $0x6c] sm:$0xff]  ;;  %s10996_s8 = smov 8  }
  0x17   :  { %814 = vmatpush.bf16.msra.mxu2 %v10472_v44  ;;  %14871 = vst [vmem:[#allocation13_spill] sm:$0xff] %v11231_v6  ;;  %v10470_v8 = vld [vmem:[%s14749_s1 + $0x1c0] sm:$0xff]  ;;  %v14759_v32 = vunpack.c.h.b16 %v11223_v2  ;;  %v11263_v36 = vld [vmem:[%s14749_s1 + $0x190] sm:$0xff]  ;;  %v322_v43 = vsel %vm310_vm0, %v317_v4, %v321_v5  ;;  %v14764_v44 = vunpack.c.l.b16 %v11207_v63  ;;  %v14760_v46 = vunpack.c.l.b16 %v11231_v6 }
  0x18   :  { %843 = vmatpush.bf16.msra.mxu3 %v10480_v47  ;;  %10947 = vmatpush.bf16.msra.mxu1 %v11187_v50  ;;  %v10478_v16 = vld [vmem:[%s14749_s1 + $0x200] sm:$0xff]  ;;  %14872 = vst [vmem:[#allocation14_spill] sm:$0xff] %v11251_v25  ;;  %v11269_v42 = vpack.c.b16 %v14763_v13, %v14768_v3  ;;  %v346_v49 = vsel %vm310_vm0, %v341_v9, %v345_v12  ;;  %v14766_v51 = vunpack.c.l.b16 %v11251_v25  ;;  %v14761_v52 = vunpack.c.l.b16 %v11256_v31 }
  0x19   :  { %14873 = vst [vmem:[#allocation15_spill] sm:$0xff] %v11256_v31  ;;  %v11278_v47 = vpack.c.b16 %v14759_v32, %v14762_v15  ;;  %v14756_v56 = vunpack.c.h.b16 %v11251_v25  ;;  %v14755_v57 = vunpack.c.h.b16 %v11256_v31  ;;  %v11323_v9 = vld [vmem:[%s14749_s1 + $0x180] sm:$0xff]  ;;  %v14772_v29 = vunpack.c.l.b16 %v11223_v2 }
  0x1a   :  { %757 = vmatpush.bf16.msra.mxu0 %v10455_v54  ;;  %v14784_v54 = vshll.u32 %v11269_v42, 16  ;;  %v14785_v61 = vshrl.u32 %v11269_v42, 16  ;;  %vm1398_vm1 = vcmask 1046528   ;;  %vm1970_vm2 = vcmask 1044480  }
  0x1b   :  { %815 = vmatpush.bf16.msra.mxu2 %v10471_v55  ;;  %v358_v55 = vsel %vm310_vm0, %v353_v19, %v357_v22  ;;  %v14776_v4 = vshll.u32 %v11278_v47, 16  ;;  %vm2526_vm3 = vsmask.f32 4352  ;;  %vm3804_vm4 = vcmask 1045504  }
  0x1c   :  { %844 = vmatpush.bf16.msra.mxu3 %v10479_v59  ;;  %10948 = vmatpush.bf16.msra.mxu1 %v11218_v1  ;;  %v11292_v59 = vld [vmem:[%s14749_s1 + $0x188] sm:$0xff]  ;;  %v11296_v60 = vrot.slane %v14784_v54, 1  ;;  %vm4360_vm5 = vsmask.f32 5376  ;;  %vm5578_vm6 = vcmask 523264  }
  0x1d   :  { %v425_v19 = vrot.slane %v14776_v4, 1 }
  0x1e   :  { %758 = vmatpush.bf16.msra.mxu0 %v10454_v7  ;;  %v11310_v7 = vpack.c.b16 %v14761_v52, %v14766_v51 }
  0x1f   :  { %816 = vmatpush.bf16.msra.mxu2 %v10470_v8  ;;  %v11316_v8 = vpack.c.b16 %v14755_v57, %v14756_v56  ;;  %v14806_v56 = vshrl.u32 %v11180_v48, 16 }
  0x20   :  { %845 = vmatpush.bf16.msra.mxu3 %v10478_v16  ;;  %10949 = vmatpush.bf16.msra.mxu1 %v11263_v36  ;;  %v421_v16 = vor.u32 %v14785_v61, %v11296_v60  ;;  %v14788_v57 = vshll.u32 %v11310_v7, 16 }
  0x21   :  { %759 = vmatmul.bf16.vlgmr.msra.gmra.mxu0 %v322_v43  ;;  %v11333_v43 = vld [vmem:[%s14748_s0 + $0xa0] sm:$0x11]  ;;  %v14786_v38 = vshll.u32 %v11316_v8, 16  ;;  %v14787_v4 = vshrl.u32 %v11316_v8, 16 }
  0x22   :  { %780 = vmatpush.bf16.msrb.mxu0 %v11100_v21  ;;  %817 = vmatmul.bf16.vlgmr.msra.gmra.mxu2 %v346_v49  ;;  %v11304_v21 = vpack.c.b16 %v14760_v46, %v14764_v44  ;;  %v426_v37 = vsel %vm310_vm0, %v421_v16, %v425_v19  ;;  %v281_v32 = vunpack.c.h.b16 %v11333_v43  ;;  %v393_v13 = vrot.slane %v14788_v57, 1  ;;  %v11365_v44 = vld [vmem:[%s14748_s0 + $0x94] sm:$0xff] }
  0x23   :  { %846 = vmatmul.bf16.vlgmr.msra.gmra.mxu3 %v358_v55  ;;  %v14812_v55 = vshrl.u32 %v11170_v45, 16  ;;  %v401_v16 = vrot.slane %v14786_v38, 1  ;;  %14875 = vst [vmem:[#allocation17_spill] sm:$0xff] %v11365_v44  ;;  %v14773_v3 = vunpack.c.l.b16 %v11365_v44  ;;  %v241_v38 = vunpack.c.h.b16 %v11065_v10  ;;  %v10425_v10 = vld [vmem:[%s14749_s1 + $0x58] sm:$0xff] }
  0x24   :  { %10950 = vmatpush.bf16.msra.mxu1 %v11292_v59  ;;  %v14771_v49 = vshll.u32 %v11304_v21, 16 }
  0x25   :  { %v389_v15 = vor.u32 %v14812_v55, %v345_v12  ;;  %v11368_v12 = vpack.c.b16 %v281_v32, %v281_v32  ;;  %v14781_v32 = vshrl.u32 %v11278_v47, 16 }
  0x26   :  { %781 = vmatpush.bf16.msrb.mxu0 %v11121_v27  ;;  %v14807_v27 = vshrl.u32 %v11157_v41, 16  ;;  %v377_v52 = vrot.slane %v14771_v49, 1 }
  0x27   :  { %v394_v51 = vsel %vm310_vm0, %v389_v15, %v393_v13  ;;  %v463_v49 = vshll.u32 %v11368_v12, 16 }
  0x28   :  { %10951 = vmatpush.bf16.msra.mxu1 %v11323_v9  ;;  %v373_v46 = vor.u32 %v14807_v27, %v321_v5  ;;  %v11360_v5 = vld [vmem:[%s14748_s0 + $0x80] sm:$0xff] }
  0x29   :  { %14874 = vst [vmem:[#allocation16_spill] sm:$0xff] %v11360_v5  ;;  %v14775_v34 = vunpack.c.l.b16 %v11360_v5  ;;  %v14778_v33 = vunpack.c.h.b16 %v11360_v5 }
  0x2a   :  { %782 = vmatpush.bf16.msrb.mxu0 %v11151_v40  ;;  %v397_v40 = vor.u32 %v14806_v56, %v357_v22  ;;  %v14774_v22 = vunpack.c.l.b16 %v11212_v0  ;;  %v10502_v56 = vld [vmem:[%s14749_s1 + $0x2c0] sm:$0xff] }
  0x2b   :  { %798 = vmatmul.bf16.vlgmr.msra.gmra.mxu1 %v426_v37  ;;  %v378_v37 = vsel %vm310_vm0, %v373_v46, %v377_v52  ;;  %v11392_v46 = vpack.c.b16 %v14773_v3, %v14775_v34 }
  0x2c   :  { %v402_v28 = vsel %vm310_vm0, %v397_v40, %v401_v16  ;;  %v11386_v15 = vpack.c.b16 %v14772_v29, %v14774_v22  ;;  %v461_v40 = vor.u32 %v14781_v32, %v425_v19  ;;  %v14780_v29 = vshrl.u32 %v11304_v21, 16  ;;  %v10421_v32 = vld [vmem:[%s14749_s1 + $0x38] sm:$0xff] }
  0x2d   :  { %v14789_v22 = vshrl.u32 %v11310_v7, 16  ;;  %v14783_v34 = vshll.u32 %v11392_v46, 16  ;;  %1156 = vmatpush.bf16.msrb.mxu1 %v10421_v32  ;;  %v14803_v32 = vshrl.u32 %v11392_v46, 16 }
  0x2e   :  { %783 = vmatpush.bf16.msrb.mxu0 %v11187_v50  ;;  %v14777_v50 = vunpack.c.h.b16 %v11365_v44  ;;  %v14779_v3 = vshll.u32 %v11386_v15, 16  ;;  %v413_v19 = vor.u32 %v14780_v29, %v377_v52  ;;  %v130_v52 = vld [vmem:[%s14748_s0 + $0xa8] sm:$0x11]  ;;  %v10529_v44 = vld [vmem:[%s14749_s1 + $0x398] sm:$0xff] }
  0x31   :  { %764 = vmatmul.bf16.gmra.mxu0 %v378_v37  ;;  %v465_v37 = vrot.slane %v463_v49, 1  ;;  %v417_v49 = vrot.slane %v14779_v3, 1  ;;  %v282_v3 = vunpack.c.l.b16 %v130_v52 }
  0x32   :  { %784 = vmatpush.bf16.msrb.mxu0 %v11218_v1  ;;  %822 = vmatmul.bf16.gmra.mxu2 %v394_v51  ;;  %v10429_v1 = vld [vmem:[%s14749_s1 + $0x78] sm:$0xff]  ;;  %v11404_v51 = vpack.c.b16 %v14777_v50, %v14778_v33  ;;  %v437_v33 = vor.u32 %v14787_v4, %v401_v16  ;;  %v283_v16 = vunpack.c.h.b16 %v130_v52  ;;  %v11491_v4 = vunpack.c.h.b16 %v11070_v11 }
  0x33   :  { %851 = vmatmul.bf16.gmra.mxu3 %v402_v28  ;;  %v10437_v28 = vld [vmem:[%s14749_s1 + $0xb8] sm:$0xff]  ;;  %1185 = vmatpush.bf16.msrb.mxu2 %v10429_v1  ;;  %v429_v1 = vor.u32 %v14789_v22, %v393_v13  ;;  %v418_v13 = vsel %vm310_vm0, %v413_v19, %v417_v49  ;;  %v11451_v19 = vpack.c.b16 %v282_v3, %v282_v3  ;;  %v14799_v3 = vshrl.u32 %v11386_v15, 16 }
  0x34   :  { %1214 = vmatpush.bf16.msrb.mxu3 %v10437_v28  ;;  %v14782_v50 = vshll.u32 %v11404_v51, 16  ;;  %v433_v28 = vrot.slane %v14783_v34, 1  ;;  %v11456_v52 = vpack.c.b16 %v283_v16, %v283_v16  ;;  %v10426_v34 = vld [vmem:[%s14749_s1 + $0x60] sm:$0xff]  ;;  %v10433_v11 = vld [vmem:[%s14749_s1 + $0x98] sm:$0xff] }
  0x35   :  { %v471_v16 = vshll.u32 %v11451_v19, 16  ;;  %v453_v54 = vor.u32 %v14799_v3, %v417_v49  ;;  %v10418_v49 = vld [vmem:[%s14749_s1 + $0x20] sm:$0xff] }
  0x36   :  { %785 = vmatpush.bf16.msrb.mxu0 %v11263_v36  ;;  %v466_v36 = vsel %vm310_vm0, %v461_v40, %v465_v37  ;;  %v280_v40 = vunpack.c.l.b16 %v11333_v43  ;;  %v434_v37 = vsel %vm310_vm0, %v429_v1, %v433_v28  ;;  %v10492_v1 = vld [vmem:[%s14749_s1 + $0x270] sm:$0xff] }
  0x38   :  { %v11446_v43 = vpack.c.b16 %v280_v40, %v280_v40  ;;  %v10420_v40 = vld [vmem:[%s14749_s1 + $0x30] sm:$0xff] }
  0x39   :  { %1157 = vmatpush.bf16.msrb.mxu1 %v10420_v40  ;;  %v469_v40 = vor.u32 %v14803_v32, %v433_v28  ;;  %v10494_v32 = vld [vmem:[%s14749_s1 + $0x280] sm:$0xff] }
  0x3a   :  { %786 = vmatpush.bf16.msrb.mxu0 %v11292_v59  ;;  %v441_v59 = vrot.slane %v14782_v50, 1  ;;  %v10419_v50 = vld [vmem:[%s14749_s1 + $0x28] sm:$0xff] }
  0x3b   :  { %803 = vmatmul.bf16.gmra.mxu1 %v466_v36  ;;  %v10493_v36 = vld [vmem:[%s14749_s1 + $0x278] sm:$0xff] }
  0x3c   :  { %v442_v29 = vsel %vm310_vm0, %v437_v33, %v441_v59  ;;  %v10436_v33 = vld [vmem:[%s14749_s1 + $0xb0] sm:$0xff] }
  0x3d   :  { %1215 = vmatpush.bf16.msrb.mxu3 %v10436_v33  ;;  %v479_v33 = vshll.u32 %v11456_v52, 16  ;;  %1158 = vmatpush.bf16.msrb.mxu1 %v10419_v50  ;;  %v14795_v50 = vunpack.c.h.b16 %v11088_v17 }
  0x3e   :  { %787 = vmatpush.bf16.msrb.mxu0 %v11323_v9  ;;  %v10428_v9 = vld [vmem:[%s14749_s1 + $0x70] sm:$0xff] }
  0x3f   :  { %1186 = vmatpush.bf16.msrb.mxu2 %v10428_v9  ;;  %v14802_v9 = vshrl.u32 %v11404_v51, 16  ;;  %v481_v22 = vrot.slane %v479_v33, 1  ;;  %v10488_v33 = vld [vmem:[%s14749_s1 + $0x250] sm:$0xff] }
  0x41   :  { %769 = vmatmul.bf16.gmra.mxu0 %v418_v13  ;;  %v10427_v13 = vld [vmem:[%s14749_s1 + $0x68] sm:$0xff]  ;;  %v477_v57 = vor.u32 %v14802_v9, %v441_v59  ;;  %1159 = vmatpush.bf16.msrb.mxu1 %v10418_v49 }
  0x42   :  { %827 = vmatmul.bf16.gmra.mxu2 %v434_v37  ;;  %867 = vmatpush.bf16.msra.mxu0 %v10493_v36  ;;  %v455_v37 = vshll.u32 %v11446_v43, 16  ;;  %v10491_v36 = vld [vmem:[%s14749_s1 + $0x268] sm:$0xff] }
  0x43   :  { %856 = vmatmul.bf16.gmra.mxu3 %v442_v29  ;;  %v10435_v29 = vld [vmem:[%s14749_s1 + $0xa8] sm:$0xff]  ;;  %1187 = vmatpush.bf16.msrb.mxu2 %v10427_v13  ;;  %v473_v13 = vrot.slane %v471_v16, 1  ;;  %v482_v16 = vsel %vm310_vm0, %v477_v57, %v481_v22 }
  0x44   :  { %1216 = vmatpush.bf16.msrb.mxu3 %v10435_v29  ;;  %v457_v61 = vrot.slane %v455_v37, 1  ;;  %v10490_v29 = vld [vmem:[%s14749_s1 + $0x260] sm:$0xff]  ;;  %v286_v37 = vpack.c.b16 %v11491_v4, %v241_v38  ;;  %v10432_v38 = vld [vmem:[%s14749_s1 + $0x90] sm:$0xff]  ;;  %v10447_v9 = vld [vmem:[%s14749_s1 + $0x108] sm:$0xff] }
  0x45   :  { %v474_v59 = vsel %vm310_vm0, %v469_v40, %v473_v13  ;;  %v10423_v40 = vld [vmem:[%s14749_s1 + $0x48] sm:$0xff] }
  0x46   :  { %868 = vmatpush.bf16.msra.mxu0 %v10492_v1  ;;  %v10434_v1 = vld [vmem:[%s14749_s1 + $0xa0] sm:$0xff]  ;;  %v458_v28 = vsel %vm310_vm0, %v453_v54, %v457_v61  ;;  %v10417_v54 = vld [vmem:[%s14749_s1 + $0x18] sm:$0xff]  ;;  %v10424_v61 = vld [vmem:[%s14749_s1 + $0x50] sm:$0xff]  ;;  %v326_v22 = vshll.u32 %v286_v37, 16 }
  0x47   :  { %1188 = vmatpush.bf16.msrb.mxu2 %v10426_v34  ;;  %v14794_v34 = vunpack.c.h.b16 %v11093_v18  ;;  %1160 = vmatpush.bf16.msrb.mxu1 %v10417_v54  ;;  %v10431_v13 = vld [vmem:[%s14749_s1 + $0x88] sm:$0xff] }
  0x48   :  { %1217 = vmatpush.bf16.msrb.mxu3 %v10434_v1  ;;  %v10416_v1 = vld [vmem:[%s14749_s1 + $0x10] sm:$0xff]  ;;  %v328_v49 = vrot.slane %v326_v22, 1 }
  0x49   :  { %v11529_v57 = vpack.c.b16 %v14794_v34, %v14795_v50 }
  0x4a   :  { %869 = vmatpush.bf16.msra.mxu0 %v10491_v36  ;;  %v10489_v36 = vld [vmem:[%s14749_s1 + $0x258] sm:$0xff] }
  0x4b   :  { %1189 = vmatpush.bf16.msrb.mxu2 %v10425_v10  ;;  %v14805_v10 = vshll.u32 %v11529_v57, 16  ;;  %1161 = vmatpush.bf16.msrb.mxu1 %v10416_v1  ;;  %v27_v1 = vld [vmem:[%s14748_s0 + $0x10] sm:$0xf] }
  0x4c   :  { %1218 = vmatpush.bf16.msrb.mxu3 %v10433_v11  ;;  %v10487_v11 = vld [vmem:[%s14749_s1 + $0x248] sm:$0xff] }
  0x4d   :  { %v333_v54 = vrot.slane %v14805_v10, 1 }
  0x4e   :  { %870 = vmatpush.bf16.msra.mxu0 %v10490_v29  ;;  %v324_v29 = vshrl.u32 %v286_v37, 16 }
  0x4f   :  { %1190 = vmatpush.bf16.msrb.mxu2 %v10424_v61  ;;  %v10486_v61 = vld [vmem:[%s14749_s1 + $0x240] sm:$0xff] }
  0x50   :  { %1219 = vmatpush.bf16.msrb.mxu3 %v10432_v38  ;;  %v10414_v38 = vld [vmem:[%s14749_s1] sm:$0xff] }
  0x51   :  { %774 = vmatmul.bf16.gmra.mxu0 %v458_v28  ;;  %v10415_v28 = vld [vmem:[%s14749_s1 + $0x8] sm:$0xff] }
  0x52   :  { %832 = vmatmul.bf16.gmra.mxu2 %v474_v59  ;;  %871 = vmatpush.bf16.msra.mxu0 %v10489_v36  ;;  %v10422_v59 = vld [vmem:[%s14749_s1 + $0x40] sm:$0xff]  ;;  %v329_v36 = vor.u32 %v328_v49, %v324_v29  ;;  %v244_v29 = vunpack.c.l.b16 %v27_v1 }
  0x53   :  { %861 = vmatmul.bf16.gmra.mxu3 %v482_v16  ;;  %1191 = vmatpush.bf16.msrb.mxu2 %v10423_v40  ;;  %v10430_v16 = vld [vmem:[%s14749_s1 + $0x80] sm:$0xff] }
  0x54   :  { %1220 = vmatpush.bf16.msrb.mxu3 %v10431_v13  ;;  %1162 = vmatpush.bf16.msrb.mxu1 %v10415_v28  ;;  %v334_v22 = vsel %vm310_vm0, %v329_v36, %v333_v54  ;;  %v30_v40 = vld [vmem:[%s14748_s0 + $0x24] sm:$0xf]  ;;  %v11612_v1 = vld [vmem:[%s14748_s0 + $0x60] sm:$0xf] }
  0x55   :  { %v11576_v49 = vunpack.c.l.b16 %v30_v40  ;;  %14879 = vst [vmem:[#allocation21_spill] sm:$0xff] %v11612_v1  ;;  %v11617_v40 = vld [vmem:[%s14748_s0 + $0x74] sm:$0xf] }
  0x56   :  { %872 = vmatpush.bf16.msra.mxu0 %v10488_v33  ;;  %v14804_v33 = vshrl.u32 %v11529_v57, 16  ;;  %14880 = vst [vmem:[#allocation22_spill] sm:$0xff] %v11617_v40 }
  0x57   :  { %1192 = vmatpush.bf16.msrb.mxu2 %v10422_v59  ;;  %14876 = vst [vmem:[#allocation18_spill] sm:$0xff] %v11576_v49  ;;  %v11593_v59 = vpack.c.b16 %v11576_v49, %v244_v29 }
  0x58   :  { %1221 = vmatpush.bf16.msrb.mxu3 %v10430_v16  ;;  %1163 = vmatpush.bf16.msrb.mxu1 %v10414_v38  ;;  %v381_v13 = vor.u32 %v14804_v33, %v333_v54 }
  0x59   :  { %v362_v36 = vshll.u32 %v11593_v59, 16 }
  0x5a   :  { %873 = vmatpush.bf16.msra.mxu0 %v10487_v11 }
  0x5b   :  { %1164 = vmatmul.bf16.vlgmr.msrb.gmra.mxu1 %v11126_v30  ;;  %v11581_v30 = vld [vmem:[%s14748_s0 + $0x38] sm:$0xf]  ;;  %v364_v54 = vrot.slane %v362_v36, 1  ;;  %v14791_v36 = vunpack.c.l.b16 %v11617_v40 }
  0x5c   :  { %14877 = vst [vmem:[#allocation19_spill] sm:$0xff] %v11581_v30  ;;  %v14793_v11 = vunpack.c.l.b16 %v11581_v30  ;;  %v10525_v30 = vld [vmem:[%s14749_s1 + $0x378] sm:$0xff] }
  0x5e   :  { %874 = vmatpush.bf16.msra.mxu0 %v10486_v61 }
  0x61   :  { %788 = vmatmul.bf16.vlgmr.msrb.gmra.mxu0 %v334_v22 }
  0x62   :  { %1193 = vmatmul.bf16.vlgmr.msrb.gmra.mxu2 %v286_v37  ;;  %v386_v37 = vsel %vm310_vm0, %v381_v13, %v11296_v60  ;;  %v360_v60 = vshrl.u32 %v11593_v59, 16  ;;  %v10501_v13 = vld [vmem:[%s14749_s1 + $0x2b8] sm:$0xff] }
  0x63   :  { %1222 = vmatmul.bf16.vlgmr.msrb.gmra.mxu3 %v11137_v35  ;;  %v11586_v35 = vld [vmem:[%s14748_s0 + $0x4c] sm:$0xf]  ;;  %1704 = vmatpush.bf16.msra.mxu2 %v10501_v13 }
  0x64   :  { %14878 = vst [vmem:[#allocation20_spill] sm:$0xff] %v11586_v35  ;;  %v14790_v28 = vunpack.c.l.b16 %v11586_v35  ;;  %v365_v38 = vor.u32 %v364_v54, %v360_v60  ;;  %v10509_v60 = vld [vmem:[%s14749_s1 + $0x2f8] sm:$0xff] }
  0x65   :  { %1733 = vmatpush.bf16.msra.mxu3 %v10509_v60  ;;  %v10445_v54 = vld [vmem:[%s14749_s1 + $0xf8] sm:$0xff]  ;;  %v10508_v60 = vld [vmem:[%s14749_s1 + $0x2f0] sm:$0xff] }
  0x66   :  { %v11600_v16 = vpack.c.b16 %v14790_v28, %v14793_v11  ;;  %v10453_v28 = vld [vmem:[%s14749_s1 + $0x138] sm:$0xff]  ;;  %1243 = vmatpush.bf16.msrb.mxu0 %v10445_v54  ;;  %v10443_v54 = vld [vmem:[%s14749_s1 + $0xe8] sm:$0xff] }
  0x67   :  { %1272 = vmatpush.bf16.msra.mxu1 %v10453_v28  ;;  %v10507_v28 = vld [vmem:[%s14749_s1 + $0x2e8] sm:$0xff]  ;;  %v10517_v35 = vld [vmem:[%s14749_s1 + $0x338] sm:$0xff] }
  0x68   :  { %v14796_v61 = vshll.u32 %v11600_v16, 16  ;;  %v14798_v11 = vshrl.u32 %v11600_v16, 16 }
  0x69   :  { %1734 = vmatpush.bf16.msra.mxu3 %v10508_v60  ;;  %v10498_v60 = vld [vmem:[%s14749_s1 + $0x2a0] sm:$0xff] }
  0x6a   :  { %v369_v22 = vrot.slane %v14796_v61, 1  ;;  %v11682_v61 = vld [vmem:[%s14748_s0 + $0x88] sm:$0xf] }
  0x6b   :  { %1169 = vmatmul.bf16.gmra.mxu1 %v11157_v41  ;;  %14881 = vst [vmem:[#allocation23_spill] sm:$0xff] %v11682_v61  ;;  %v14801_v3 = vunpack.c.l.b16 %v11682_v61 }
  0x6c   :  { %v370_v29 = vsel %vm310_vm0, %v365_v38, %v369_v22  ;;  %v10500_v38 = vld [vmem:[%s14749_s1 + $0x2b0] sm:$0xff]  ;;  %v405_v50 = vor.u32 %v14798_v11, %v369_v22  ;;  %v10442_v22 = vld [vmem:[%s14749_s1 + $0xe0] sm:$0xff] }
  0x6d   :  { %1705 = vmatpush.bf16.msra.mxu2 %v10500_v38  ;;  %v10451_v38 = vld [vmem:[%s14749_s1 + $0x128] sm:$0xff]  ;;  %1735 = vmatpush.bf16.msra.mxu3 %v10507_v28  ;;  %v10450_v28 = vld [vmem:[%s14749_s1 + $0x120] sm:$0xff] }
  0x71   :  { %793 = vmatmul.bf16.gmra.mxu0 %v386_v37  ;;  %v14792_v37 = vunpack.c.l.b16 %v11612_v1 }
  0x72   :  { %1198 = vmatmul.bf16.gmra.mxu2 %v11529_v57 }
  0x73   :  { %1227 = vmatmul.bf16.gmra.mxu3 %v11170_v45  ;;  %v11642_v13 = vpack.c.b16 %v14791_v36, %v14792_v37  ;;  %v10452_v36 = vld [vmem:[%s14749_s1 + $0x130] sm:$0xff]  ;;  %v10499_v37 = vld [vmem:[%s14749_s1 + $0x2a8] sm:$0xff] }
  0x74   :  { %1273 = vmatpush.bf16.msra.mxu1 %v10452_v36  ;;  %1706 = vmatpush.bf16.msra.mxu2 %v10499_v37  ;;  %v11687_v37 = vld [vmem:[%s14748_s0 + $0x9c] sm:$0xf] }
  0x75   :  { %v14797_v34 = vshll.u32 %v11642_v13, 16  ;;  %14882 = vst [vmem:[#allocation24_spill] sm:$0xff] %v11687_v37 }
  0x77   :  { %v409_v36 = vrot.slane %v14797_v34, 1  ;;  %v10497_v34 = vld [vmem:[%s14749_s1 + $0x298] sm:$0xff] }
  0x78   :  { %1274 = vmatpush.bf16.msra.mxu1 %v10451_v38  ;;  %1707 = vmatpush.bf16.msra.mxu2 %v10498_v60  ;;  %v10505_v38 = vld [vmem:[%s14749_s1 + $0x2d8] sm:$0xff] }
  0x79   :  { %v410_v11 = vsel %vm310_vm0, %v405_v50, %v409_v36  ;;  %v10441_v60 = vld [vmem:[%s14749_s1 + $0xd8] sm:$0xff] }
  0x7a   :  { %v10449_v50 = vld [vmem:[%s14749_s1 + $0x118] sm:$0xff] }
  0x7b   :  { %1174 = vmatmul.bf16.gmra.mxu1 %v11304_v21 }
  0x7c   :  { %1275 = vmatpush.bf16.msra.mxu1 %v10450_v28  ;;  %1708 = vmatpush.bf16.msra.mxu2 %v10497_v34  ;;  %v10448_v28 = vld [vmem:[%s14749_s1 + $0x110] sm:$0xff] }
  0x80   :  { %1276 = vmatpush.bf16.msra.mxu1 %v10449_v50 }
  0x81   :  { %875 = vmatmul.bf16.vlgmr.msra.gmra.mxu0 %v370_v29  ;;  %v10444_v29 = vld [vmem:[%s14749_s1 + $0xf0] sm:$0xff] }
  0x82   :  { %1203 = vmatmul.bf16.gmra.mxu2 %v11269_v42  ;;  %1244 = vmatpush.bf16.msrb.mxu0 %v10444_v29  ;;  %v10506_v29 = vld [vmem:[%s14749_s1 + $0x2e0] sm:$0xff] }
  0x83   :  { %1232 = vmatmul.bf16.gmra.mxu3 %v11310_v7 }
  0x84   :  { %1736 = vmatpush.bf16.msra.mxu3 %v10506_v29  ;;  %v10496_v29 = vld [vmem:[%s14749_s1 + $0x290] sm:$0xff]  ;;  %1277 = vmatpush.bf16.msra.mxu1 %v10448_v28 }
  0x85   :  { %1709 = vmatpush.bf16.msra.mxu2 %v10496_v29  ;;  %v10503_v29 = vld [vmem:[%s14749_s1 + $0x2c8] sm:$0xff] }
  0x86   :  { %1245 = vmatpush.bf16.msrb.mxu0 %v10443_v54  ;;  %v14800_v54 = vunpack.c.l.b16 %v11687_v37  ;;  %v1424_v37 = vrot.slane %v11386_v15, 1 }
  0x88   :  { %1737 = vmatpush.bf16.msra.mxu3 %v10505_v38  ;;  %v11718_v34 = vpack.c.b16 %v14800_v54, %v14801_v3  ;;  %v10495_v38 = vld [vmem:[%s14749_s1 + $0x288] sm:$0xff]  ;;  %v14809_v54 = vshrl.u32 %v11642_v13, 16  ;;  %1278 = vmatpush.bf16.msra.mxu1 %v10447_v9 }
  0x89   :  { %v10439_v3 = vld [vmem:[%s14749_s1 + $0xc8] sm:$0xff]  ;;  %1710 = vmatpush.bf16.msra.mxu2 %v10495_v38  ;;  %v1400_v38 = vrot.slane %v11157_v41, 1 }
  0x8a   :  { %1246 = vmatpush.bf16.msrb.mxu0 %v10442_v22  ;;  %v10504_v22 = vld [vmem:[%s14749_s1 + $0x2d0] sm:$0xff]  ;;  %v14808_v50 = vshll.u32 %v11718_v34, 16 }
  0x8b   :  { %1179 = vmatmul.bf16.gmra.mxu1 %v11386_v15 }
  0x8c   :  { %1738 = vmatpush.bf16.msra.mxu3 %v10504_v22  ;;  %v449_v28 = vrot.slane %v14808_v50, 1 }
  0x8d   :  { %1711 = vmatpush.bf16.msra.mxu2 %v10494_v32 }
  0x8e   :  { %1247 = vmatpush.bf16.msrb.mxu0 %v10441_v60  ;;  %v1301_v60 = vld [vmem:[%s14748_s0] sm:$0xee] }
  0x8f   :  { %v1388_v22 = vunpack.c.l.b16 %v1301_v60  ;;  %v1389_v10 = vunpack.c.h.b16 %v1301_v60 }
  0x90   :  { %1739 = vmatpush.bf16.msra.mxu3 %v10503_v29 }
  0x91   :  { %880 = vmatmul.bf16.gmra.mxu0 %v410_v11  ;;  %v10440_v11 = vld [vmem:[%s14749_s1 + $0xd0] sm:$0xff]  ;;  %v1393_v33 = vpack.c.b16 %v11077_v14, %v1388_v22  ;;  %v1394_v29 = vpack.c.b16 %v11491_v4, %v1389_v10  ;;  %v1403_v10 = vrot.slane %v11529_v57, 1 }
  0x92   :  { %1208 = vmatmul.bf16.gmra.mxu2 %v11278_v47  ;;  %1248 = vmatpush.bf16.msrb.mxu0 %v10440_v11  ;;  %v445_v11 = vor.u32 %v14809_v54, %v409_v36  ;;  %v131_v22 = vld [vmem:[%s14748_s0 + $0xb0] sm:$0x1]  ;;  %v10438_v36 = vld [vmem:[%s14749_s1 + $0xc0] sm:$0xff] }
  0x93   :  { %1237 = vmatmul.bf16.gmra.mxu3 %v11392_v46  ;;  %v1399_v27 = vrot.slane %v1393_v33, 1  ;;  %v10446_v33 = vld [vmem:[%s14749_s1 + $0x100] sm:$0xff]  ;;  %v1402_v60 = vrot.slane %v1394_v29, 1 }
  0x94   :  { %1740 = vmatpush.bf16.msra.mxu3 %v10502_v56  ;;  %v450_v54 = vsel %vm310_vm0, %v445_v11, %v449_v28  ;;  %1279 = vmatpush.bf16.msra.mxu1 %v10446_v33  ;;  %v14813_v11 = vshrl.u32 %v11718_v34, 16 }
  0x95   :  { %v1401_v9 = vsel %vm1398_vm1, %v1399_v27, %v1400_v38  ;;  %v1404_v56 = vsel %vm1398_vm1, %v1402_v60, %v1403_v10 }
  0x96   :  { %1249 = vmatpush.bf16.msrb.mxu0 %v10439_v3  ;;  %v284_v3 = vunpack.c.l.b16 %v131_v22  ;;  %v485_v22 = vor.u32 %v14813_v11, %v449_v28 }
  0x98   :  { %v11776_v32 = vpack.c.b16 %v284_v3, %v284_v3  ;;  %1791 = vmatpush.bf16.msrb.mxu1 %v10525_v30  ;;  %v10539_v30 = vld [vmem:[%s14749_s1 + $0x3e8] sm:$0xff] }
  0x9a   :  { %1250 = vmatpush.bf16.msrb.mxu0 %v10438_v36  ;;  %v487_v27 = vshll.u32 %v11776_v32, 16  ;;  %v1414_v36 = vrot.slane %v11304_v21, 1 }
  0x9b   :  { %1280 = vmatmul.bf16.vlgmr.msra.gmra.mxu1 %v11593_v59  ;;  %v1416_v59 = vrot.slane %v11269_v42, 1 }
  0x9d   :  { %v1417_v55 = vsel %vm1398_vm1, %v1403_v10, %v1416_v59  ;;  %v1426_v10 = vrot.slane %v11278_v47, 1 }
  0x9e   :  { %v11771_v50 = vpop.f32.mrf.mxu0  ;;  %1762 = vmatpush.bf16.msra.mxu0 %v10517_v35 }
  0x9f   :  { %v1427_v40 = vsel %vm1398_vm1, %v1416_v59, %v1426_v10 }
  0xa1   :  { %885 = vmatmul.bf16.gmra.mxu0 %v450_v54  ;;  %v489_v54 = vrot.slane %v487_v27, 1 }
  0xa2   :  { %1712 = vmatmul.bf16.vlgmr.msra.gmra.mxu2 %v1401_v9 }
  0xa3   :  { %1741 = vmatmul.bf16.vlgmr.msra.gmra.mxu3 %v1404_v56  ;;  %v490_v9 = vsel %vm310_vm0, %v485_v22, %v489_v54  ;;  %v1415_v56 = vsel %vm1398_vm1, %v1400_v38, %v1414_v36  ;;  %v10533_v38 = vld [vmem:[%s14749_s1 + $0x3b8] sm:$0xff]  ;;  %v1425_v54 = vsel %vm1398_vm1, %v1414_v36, %v1424_v37  ;;  %v10532_v36 = vld [vmem:[%s14749_s1 + $0x3b0] sm:$0xff] }
  0xa4   :  { %1820 = vmatpush.bf16.msrb.mxu2 %v10533_v38  ;;  %v10516_v38 = vld [vmem:[%s14749_s1 + $0x330] sm:$0xff] }
  0xa5   :  { %v11779_v29 = vpop.f32.mrf.mxu2  ;;  %1763 = vmatpush.bf16.msra.mxu0 %v10516_v38 }
  0xa6   :  { %v11781_v62 = vpop.f32.mrf.mxu3  ;;  %v11783_v53 = vpop.f32.mrf.mxu0 }
  0xa8   :  { %v799_v58 = vpop.f32.mrf.mxu1  ;;  %1821 = vmatpush.bf16.msrb.mxu2 %v10532_v36  ;;  %v10515_v36 = vld [vmem:[%s14749_s1 + $0x328] sm:$0xff] }
  0xa9   :  { %1764 = vmatpush.bf16.msra.mxu0 %v10515_v36 }
  0xab   :  { %1285 = vmatmul.bf16.gmra.mxu1 %v11600_v16 }
  0xad   :  { %v11790_v33 = vpop.f32.mrf.mxu2 }
  0xae   :  { %v11793_v60 = vpop.f32.mrf.mxu3  ;;  %v11795_v3 = vpop.f32.mrf.mxu0 }
  0xb0   :  { %v801_v1 = vpop.f32.mrf.mxu1 }
  0xb1   :  { %890 = vmatmul.bf16.gmra.mxu0 %v490_v9  ;;  %v10541_v9 = vld [vmem:[%s14749_s1 + $0x3f8] sm:$0xff] }
  0xb2   :  { %1717 = vmatmul.bf16.gmra.mxu2 %v1415_v56  ;;  %2276 = vmatpush.bf16.msrb.mxu3 %v10541_v9 }
  0xb3   :  { %1746 = vmatmul.bf16.gmra.mxu3 %v1417_v55 }
  0xb5   :  { %v11801_v28 = vpop.f32.mrf.mxu2 }
  0xb6   :  { %v11803_v27 = vpop.f32.mrf.mxu3  ;;  %v11805_v11 = vpop.f32.mrf.mxu0 }
  0xb8   :  { %v804_v38 = vpop.f32.mrf.mxu1 }
  0xbb   :  { %1290 = vmatmul.bf16.gmra.mxu1 %v11642_v13 }
  0xbd   :  { %v11808_v61 = vpop.f32.mrf.mxu2 }
  0xbe   :  { %v11814_v55 = vpop.f32.mrf.mxu3  ;;  %v770_v22 = vpop.f32.mrf.mxu0 }
  0xbf   :  { %v800_v56 = vadd.f32 %v799_v58, %v770_v22  ;;  %v10540_v58 = vld [vmem:[%s14749_s1 + $0x3f0] sm:$0xff]  ;;  %v10531_v22 = vld [vmem:[%s14749_s1 + $0x3a8] sm:$0xff] }
  0xc0   :  { %2277 = vmatpush.bf16.msrb.mxu3 %v10540_v58  ;;  %1822 = vmatpush.bf16.msrb.mxu2 %v10531_v22  ;;  %v10530_v58 = vld [vmem:[%s14749_s1 + $0x3a0] sm:$0xff] }
  0xc1   :  { %1251 = vmatmul.bf16.vlgmr.msrb.gmra.mxu0 %v11145_v39  ;;  %v10524_v39 = vld [vmem:[%s14749_s1 + $0x370] sm:$0xff] }
  0xc2   :  { %1722 = vmatmul.bf16.gmra.mxu2 %v1425_v54  ;;  %1792 = vmatpush.bf16.msrb.mxu1 %v10524_v39  ;;  %v1434_v39 = vrot.slane %v11446_v43, 1  ;;  %v1436_v43 = vrot.slane %v11368_v12, 1  ;;  %v10513_v12 = vld [vmem:[%s14749_s1 + $0x318] sm:$0xff] }
  0xc3   :  { %1751 = vmatmul.bf16.gmra.mxu3 %v1427_v40 }
  0xc4   :  { %2278 = vmatpush.bf16.msrb.mxu3 %v10539_v30  ;;  %1823 = vmatpush.bf16.msrb.mxu2 %v10530_v58  ;;  %v10522_v30 = vld [vmem:[%s14749_s1 + $0x360] sm:$0xff]  ;;  %v10537_v58 = vld [vmem:[%s14749_s1 + $0x3d8] sm:$0xff]  ;;  %v1437_v5 = vsel %vm1398_vm1, %v1426_v10, %v1436_v43  ;;  %v1303_v43 = vld [vmem:[%s14748_s0 + $0x10] sm:$0xe] }
  0xc5   :  { %v828_v59 = vpop.f32.mrf.mxu2 }
  0xc6   :  { %v829_v40 = vadd.f32 %v828_v59, %v800_v56  ;;  %v857_v54 = vpop.f32.mrf.mxu3  ;;  %v772_v9 = vpop.f32.mrf.mxu0  ;;  %v10523_v56 = vld [vmem:[%s14749_s1 + $0x368] sm:$0xff]  ;;  %v10538_v59 = vld [vmem:[%s14749_s1 + $0x3e0] sm:$0xff] }
  0xc7   :  { %v802_v22 = vadd.f32 %v801_v1, %v772_v9  ;;  %1793 = vmatpush.bf16.msrb.mxu1 %v10523_v56  ;;  %v1435_v56 = vsel %vm1398_vm1, %v1424_v37, %v1434_v39  ;;  %v10521_v37 = vld [vmem:[%s14749_s1 + $0x358] sm:$0xff]  ;;  %v806_v39 = vpop.f32.mrf.mxu1 }
  0xc8   :  { %v11847_v35 = vadd.f32 %v857_v54, %v829_v40  ;;  %2279 = vmatpush.bf16.msrb.mxu3 %v10538_v59  ;;  %v10514_v54 = vld [vmem:[%s14749_s1 + $0x320] sm:$0xff]  ;;  %1824 = vmatpush.bf16.msrb.mxu2 %v10529_v44  ;;  %v10536_v44 = vld [vmem:[%s14749_s1 + $0x3d0] sm:$0xff] }
  0xc9   :  { %1765 = vmatpush.bf16.msra.mxu0 %v10514_v54 }
  0xcb   :  { %1794 = vmatpush.bf16.msrb.mxu1 %v10522_v30 }
  0xcc   :  { %2280 = vmatpush.bf16.msrb.mxu3 %v10537_v58  ;;  %1295 = vmatmul.bf16.gmra.mxu1 %v11718_v34 }
  0xcd   :  { %v830_v40 = vpop.f32.mrf.mxu2  ;;  %1766 = vmatpush.bf16.msra.mxu0 %v10513_v12  ;;  %v10511_v12 = vld [vmem:[%s14749_s1 + $0x308] sm:$0xff] }
  0xce   :  { %v831_v1 = vadd.f32 %v830_v40, %v802_v22  ;;  %v859_v9 = vpop.f32.mrf.mxu3  ;;  %v775_v36 = vpop.f32.mrf.mxu0  ;;  %v10512_v22 = vld [vmem:[%s14749_s1 + $0x310] sm:$0xff] }
  0xcf   :  { %v805_v59 = vadd.f32 %v804_v38, %v775_v36  ;;  %v10528_v38 = vld [vmem:[%s14749_s1 + $0x390] sm:$0xff]  ;;  %1795 = vmatpush.bf16.msrb.mxu1 %v10521_v37  ;;  %v1392_v36 = vunpack.c.l.b16 %v1303_v43  ;;  %v10519_v37 = vld [vmem:[%s14749_s1 + $0x348] sm:$0xff] }
  0xd0   :  { %v11876_v2 = vadd.f32 %v859_v9, %v831_v1  ;;  %1825 = vmatpush.bf16.msrb.mxu2 %v10528_v38  ;;  %2281 = vmatpush.bf16.msrb.mxu3 %v10536_v44  ;;  %v10520_v40 = vld [vmem:[%s14749_s1 + $0x350] sm:$0xff]  ;;  %v10535_v9 = vld [vmem:[%s14749_s1 + $0x3c8] sm:$0xff]  ;;  %v10526_v38 = vld [vmem:[%s14749_s1 + $0x380] sm:$0xff] }
  0xd1   :  { %1256 = vmatmul.bf16.gmra.mxu0 %v11180_v48  ;;  %v1397_v44 = vpack.c.b16 %v11576_v49, %v1392_v36 }
  0xd2   :  { %1727 = vmatmul.bf16.gmra.mxu2 %v1435_v56  ;;  %1767 = vmatpush.bf16.msra.mxu0 %v10512_v22  ;;  %v11932_v22 = vld [vmem:[%s14748_s0 + $0x8] sm:$0xee] }
  0xd3   :  { %1756 = vmatmul.bf16.gmra.mxu3 %v1437_v5  ;;  %v10527_v5 = vld [vmem:[%s14749_s1 + $0x388] sm:$0xff]  ;;  %1796 = vmatpush.bf16.msrb.mxu1 %v10520_v40  ;;  %v1411_v40 = vrot.slane %v1397_v44, 1  ;;  %v1972_v44 = vrot.slane %v11157_v41, 3 }
  0xd4   :  { %1826 = vmatpush.bf16.msrb.mxu2 %v10527_v5  ;;  %2282 = vmatpush.bf16.msrb.mxu3 %v10535_v9  ;;  %v1412_v5 = vrot.slane %v11600_v16, 1  ;;  %v10518_v9 = vld [vmem:[%s14749_s1 + $0x340] sm:$0xff] }
  0xd5   :  { %v833_v10 = vpop.f32.mrf.mxu2 }
  0xd6   :  { %v834_v54 = vadd.f32 %v833_v10, %v805_v59  ;;  %v862_v30 = vpop.f32.mrf.mxu3  ;;  %v777_v1 = vpop.f32.mrf.mxu0  ;;  %v11913_v59 = vld [vmem:[%s14748_s0] sm:$0x88]  ;;  %1768 = vmatpush.bf16.msra.mxu0 %v10511_v12 }
  0xd7   :  { %v807_v56 = vadd.f32 %v806_v39, %v777_v1  ;;  %v1950_v10 = vunpack.c.l.b16 %v11913_v59  ;;  %v10534_v39 = vld [vmem:[%s14749_s1 + $0x3c0] sm:$0xff]  ;;  %1797 = vmatpush.bf16.msrb.mxu1 %v10519_v37 }
  0xd8   :  { %v11908_v58 = vadd.f32 %v862_v30, %v834_v54  ;;  %v1391_v30 = vunpack.c.h.b16 %v11932_v22  ;;  %1827 = vmatpush.bf16.msrb.mxu2 %v10526_v38  ;;  %2283 = vmatpush.bf16.msrb.mxu3 %v10534_v39  ;;  %v10510_v1 = vld [vmem:[%s14749_s1 + $0x300] sm:$0xff]  ;;  %v1413_v38 = vsel %vm1398_vm1, %v1411_v40, %v1412_v5  ;;  %v1409_v39 = vrot.slane %v11180_v48, 1  ;;  %v11953_v25 = vpop.f32.mrf.mxu1 }
  0xd9   :  { %v11936_v54 = vpack.c.b16 %v11077_v14, %v1950_v10 }
  0xda   :  { %v1396_v12 = vpack.c.b16 %v11115_v26, %v1391_v30  ;;  %1769 = vmatpush.bf16.msra.mxu0 %v10510_v1 }
  0xdb   :  { %v1971_v36 = vrot.slane %v11936_v54, 3  ;;  %1798 = vmatpush.bf16.msrb.mxu1 %v10518_v9 }
  0xdd   :  { %v835_v43 = vpop.f32.mrf.mxu2  ;;  %v1973_v24 = vsel %vm1970_vm2, %v1971_v36, %v1972_v44 }
  0xde   :  { %v836_v10 = vadd.f32 %v835_v43, %v807_v56  ;;  %v864_v31 = vpop.f32.mrf.mxu3  ;;  %v789_v37 = vpop.f32.mrf.mxu0  ;;  %v1408_v56 = vrot.slane %v1396_v12, 1 }
  0xdf   :  { %v790_v0 = vadd.f32 %v789_v37, %v11771_v50 }
  0xe0   :  { %v11951_v6 = vadd.f32 %v864_v31, %v836_v10  ;;  %v1410_v40 = vsel %vm1398_vm1, %v1408_v56, %v1409_v39  ;;  %v11963_v9 = vpop.f32.mrf.mxu1 }
  0xe1   :  { %v819_v43 = vadd.f32 %v11779_v29, %v790_v0  ;;  %1261 = vmatmul.bf16.gmra.mxu0 %v11316_v8  ;;  %1799 = vmatmul.bf16.vlgmr.msrb.gmra.mxu1 %v1410_v40  ;;  %v1422_v0 = vrot.slane %v11642_v13, 1 }
  0xe2   :  { %1828 = vmatmul.bf16.vlgmr.msrb.gmra.mxu2 %v1413_v38 }
  0xe3   :  { %2284 = vmatmul.bf16.vlgmr.msrb.gmra.mxu3 %v1973_v24  ;;  %v848_v50 = vadd.f32 %v11781_v62, %v819_v43  ;;  %v1986_v24 = vrot.slane %v11304_v21, 3  ;;  %v1423_v38 = vsel %vm1398_vm1, %v1412_v5, %v1422_v0 }
  0xe5   :  { %v1194_v31 = vpop.f32.mrf.mxu2 }
  0xe6   :  { %v11960_v30 = vpop.f32.mrf.mxu3  ;;  %v791_v10 = vpop.f32.mrf.mxu0 }
  0xe7   :  { %v792_v1 = vadd.f32 %v791_v10, %v11783_v53  ;;  %v1420_v53 = vrot.slane %v11316_v8, 1  ;;  %v1390_v10 = vunpack.c.l.b16 %v11932_v22  ;;  %v1406_v22 = vrot.slane %v11170_v45, 1 }
  0xe8   :  { %v11978_v43 = vpop.f32.mrf.mxu1 }
  0xe9   :  { %v821_v36 = vadd.f32 %v11790_v33, %v792_v1  ;;  %v1987_v33 = vsel %vm1970_vm2, %v1972_v44, %v1986_v24  ;;  %v1395_v44 = vpack.c.b16 %v11095_v20, %v1390_v10 }
  0xeb   :  { %v11968_v29 = vadd.f32 %v11793_v60, %v821_v36  ;;  %v1421_v60 = vsel %vm1398_vm1, %v1409_v39, %v1420_v53 }
  0xed   :  { %v11970_v12 = vpop.f32.mrf.mxu2 }
  0xee   :  { %v11973_v62 = vpop.f32.mrf.mxu3  ;;  %v794_v37 = vpop.f32.mrf.mxu0 }
  0xef   :  { %v795_v56 = vadd.f32 %v794_v37, %v11795_v3 }
  0xf1   :  { %v824_v40 = vadd.f32 %v11801_v28, %v795_v56  ;;  %1266 = vmatmul.bf16.gmra.mxu0 %v11404_v51  ;;  %1804 = vmatmul.bf16.gmra.mxu1 %v1421_v60  ;;  %v11994_v28 = vpop.f32.mrf.mxu1  ;;  %v1432_v56 = vrot.slane %v11718_v34, 1  ;;  %v10565_v60 = vld [vmem:[%s14749_s1 + $0x4b8] sm:$0xff] }
  0xf2   :  { %1833 = vmatmul.bf16.gmra.mxu2 %v1423_v38  ;;  %v1405_v38 = vrot.slane %v1395_v44, 1  ;;  %v14839_v44 = vrot.slane %v11404_v51, 1 }
  0xf3   :  { %2289 = vmatmul.bf16.gmra.mxu3 %v1987_v33  ;;  %v11986_v5 = vadd.f32 %v11803_v27, %v824_v40  ;;  %2363 = vmatpush.bf16.msra.mxu2 %v10565_v60  ;;  %v10557_v60 = vld [vmem:[%s14749_s1 + $0x478] sm:$0xff] }
  0xf4   :  { %2334 = vmatpush.bf16.msra.mxu1 %v10557_v60  ;;  %v12066_v60 = vld [vmem:[%s14748_s0 + $0xa0] sm:$0x77] }
  0xf5   :  { %v11988_v1 = vpop.f32.mrf.mxu2 }
  0xf6   :  { %v11990_v3 = vpop.f32.mrf.mxu3  ;;  %v796_v36 = vpop.f32.mrf.mxu0 }
  0xf7   :  { %v797_v39 = vadd.f32 %v796_v36, %v11805_v11  ;;  %v1996_v11 = vrot.slane %v11386_v15, 3  ;;  %v10573_v36 = vld [vmem:[%s14749_s1 + $0x4f8] sm:$0xff] }
  0xf8   :  { %2392 = vmatpush.bf16.msra.mxu3 %v10573_v36 }
  0xf9   :  { %v826_v37 = vadd.f32 %v11808_v61, %v797_v39  ;;  %v1407_v61 = vsel %vm1398_vm1, %v1405_v38, %v1406_v22  ;;  %v1997_v63 = vsel %vm1970_vm2, %v1986_v24, %v1996_v11  ;;  %v1431_v38 = vsel %vm1398_vm1, %v1420_v53, %v14839_v44  ;;  %v10572_v24 = vld [vmem:[%s14749_s1 + $0x4f0] sm:$0xff] }
  0xfa   :  { %v10548_v44 = vld [vmem:[%s14749_s1 + $0x430] sm:$0xff] }
  0xfb   :  { %v12000_v27 = vadd.f32 %v11814_v55, %v826_v37  ;;  %v1433_v55 = vsel %vm1398_vm1, %v1422_v0, %v1432_v56  ;;  %v12020_v37 = vpop.f32.mrf.mxu1  ;;  %v10549_v0 = vld [vmem:[%s14749_s1 + $0x438] sm:$0xff] }
  0xfc   :  { %2305 = vmatpush.bf16.msrb.mxu0 %v10549_v0  ;;  %2393 = vmatpush.bf16.msra.mxu3 %v10572_v24  ;;  %v14840_v24 = vrot.slane %v11310_v7, 1 }
  0xfd   :  { %v12002_v33 = vpop.f32.mrf.mxu2 }
  0xfe   :  { %v12008_v40 = vpop.f32.mrf.mxu3  ;;  %v876_v10 = vpop.f32.mrf.mxu0 }
  0xff   :  { %v877_v39 = vadd.f32 %v876_v10, %v848_v50  ;;  %v10564_v50 = vld [vmem:[%s14749_s1 + $0x4b0] sm:$0xff] }
 0x100   :  { %2364 = vmatpush.bf16.msra.mxu2 %v10564_v50  ;;  %2306 = vmatpush.bf16.msrb.mxu0 %v10548_v44  ;;  %v10555_v50 = vld [vmem:[%s14749_s1 + $0x468] sm:$0xff]  ;;  %v1955_v44 = vunpack.c.l.b16 %v12066_v60 }
 0x101   :  { %v1166_v10 = vadd.f32 %v11953_v25, %v877_v39  ;;  %1770 = vmatmul.bf16.vlgmr.msra.gmra.mxu0 %v1407_v61  ;;  %1809 = vmatmul.bf16.gmra.mxu1 %v1431_v38  ;;  %v10563_v25 = vld [vmem:[%s14749_s1 + $0x4a8] sm:$0xff] }
 0x102   :  { %1838 = vmatmul.bf16.gmra.mxu2 %v1433_v55  ;;  %v10571_v39 = vld [vmem:[%s14749_s1 + $0x4e8] sm:$0xff] }
 0x103   :  { %2294 = vmatmul.bf16.gmra.mxu3 %v1997_v63  ;;  %v1195_v53 = vadd.f32 %v1194_v31, %v1166_v10  ;;  %v10556_v63 = vld [vmem:[%s14749_s1 + $0x470] sm:$0xff]  ;;  %v12061_v0 = vpop.f32.mrf.mxu1 }
 0x104   :  { %2335 = vmatpush.bf16.msra.mxu1 %v10556_v63  ;;  %2365 = vmatpush.bf16.msra.mxu2 %v10563_v25  ;;  %v1442_v63 = vrot.slane %v11776_v32, 1  ;;  %v1965_v25 = vpack.c.b16 %v1955_v44, %v1955_v44  ;;  %v10561_v32 = vld [vmem:[%s14749_s1 + $0x498] sm:$0xff] }
 0x105   :  { %v12041_v36 = vpop.f32.mrf.mxu2  ;;  %v12053_v31 = vadd.f32 %v11960_v30, %v1195_v53  ;;  %2394 = vmatpush.bf16.msra.mxu3 %v10571_v39  ;;  %v10547_v30 = vld [vmem:[%s14749_s1 + $0x428] sm:$0xff]  ;;  %v10570_v53 = vld [vmem:[%s14749_s1 + $0x4e0] sm:$0xff] }
 0x106   :  { %v12055_v61 = vpop.f32.mrf.mxu3  ;;  %v878_v55 = vpop.f32.mrf.mxu0  ;;  %2307 = vmatpush.bf16.msrb.mxu0 %v10547_v30  ;;  %v2006_v44 = vrot.slane %v1965_v25, 3 }
 0x107   :  { %v879_v38 = vadd.f32 %v878_v55, %v11968_v29  ;;  %v10562_v29 = vld [vmem:[%s14749_s1 + $0x4a0] sm:$0xff] }
 0x108   :  { %2336 = vmatpush.bf16.msra.mxu1 %v10555_v50  ;;  %2366 = vmatpush.bf16.msra.mxu2 %v10562_v29  ;;  %v1419_v29 = vsel %vm1398_vm1, %v1406_v22, %v14840_v24  ;;  %v2007_v22 = vsel %vm1970_vm2, %v1996_v11, %v2006_v44  ;;  %v1984_v24 = vrot.slane %v11600_v16, 3 }
 0x109   :  { %v1168_v10 = vadd.f32 %v11963_v9, %v879_v38  ;;  %2395 = vmatpush.bf16.msra.mxu3 %v10570_v53  ;;  %v10546_v9 = vld [vmem:[%s14749_s1 + $0x420] sm:$0xff]  ;;  %v10569_v53 = vld [vmem:[%s14749_s1 + $0x4d8] sm:$0xff] }
 0x10a   :  { %v10554_v38 = vld [vmem:[%s14749_s1 + $0x460] sm:$0xff]  ;;  %2308 = vmatpush.bf16.msrb.mxu0 %v10546_v9  ;;  %v10560_v9 = vld [vmem:[%s14749_s1 + $0x490] sm:$0xff] }
 0x10b   :  { %v1197_v55 = vadd.f32 %v11970_v12, %v1168_v10  ;;  %v1443_v10 = vsel %vm1398_vm1, %v1432_v56, %v1442_v63  ;;  %v14883_v56 = vrot.slane %v11404_v51, 1 }
 0x10c   :  { %2337 = vmatpush.bf16.msra.mxu1 %v10554_v38  ;;  %2367 = vmatpush.bf16.msra.mxu2 %v10561_v32  ;;  %v10568_v38 = vld [vmem:[%s14749_s1 + $0x4d0] sm:$0xff] }
 0x10d   :  { %v12085_v39 = vpop.f32.mrf.mxu2  ;;  %v12097_v12 = vadd.f32 %v11973_v62, %v1197_v55  ;;  %v1440_v62 = vrot.slane %v11456_v52, 1  ;;  %v12114_v55 = vpop.f32.mrf.mxu1  ;;  %2396 = vmatpush.bf16.msra.mxu3 %v10569_v53  ;;  %v10545_v52 = vld [vmem:[%s14749_s1 + $0x418] sm:$0xff]  ;;  %v1858_v53 = vld [vmem:[%s14748_s0 + $0x8] sm:$0x88] }
 0x10e   :  { %v12099_v30 = vpop.f32.mrf.mxu3  ;;  %v881_v50 = vpop.f32.mrf.mxu0  ;;  %2309 = vmatpush.bf16.msrb.mxu0 %v10545_v52  ;;  %v10543_v52 = vld [vmem:[%s14749_s1 + $0x408] sm:$0xff] }
 0x10f   :  { %v882_v25 = vadd.f32 %v881_v50, %v11986_v5  ;;  %v1441_v63 = vsel %vm1398_vm1, %v14883_v56, %v1440_v62  ;;  %v10553_v5 = vld [vmem:[%s14749_s1 + $0x458] sm:$0xff]  ;;  %v10552_v50 = vld [vmem:[%s14749_s1 + $0x450] sm:$0xff] }
 0x110   :  { %2338 = vmatpush.bf16.msra.mxu1 %v10553_v5  ;;  %2368 = vmatpush.bf16.msra.mxu2 %v10560_v9  ;;  %v10551_v5 = vld [vmem:[%s14749_s1 + $0x448] sm:$0xff] }
 0x111   :  { %v1171_v11 = vadd.f32 %v11978_v43, %v882_v25  ;;  %1775 = vmatmul.bf16.gmra.mxu0 %v1419_v29  ;;  %1814 = vmatmul.bf16.gmra.mxu1 %v1441_v63  ;;  %v10544_v43 = vld [vmem:[%s14749_s1 + $0x410] sm:$0xff]  ;;  %v10559_v29 = vld [vmem:[%s14749_s1 + $0x488] sm:$0xff] }
 0x112   :  { %1843 = vmatmul.bf16.gmra.mxu2 %v1443_v10  ;;  %2397 = vmatpush.bf16.msra.mxu3 %v10568_v38  ;;  %v10567_v25 = vld [vmem:[%s14749_s1 + $0x4c8] sm:$0xff] }
 0x113   :  { %2299 = vmatmul.bf16.gmra.mxu3 %v2007_v22  ;;  %v1200_v32 = vadd.f32 %v11988_v1, %v1171_v11  ;;  %v1953_v22 = vunpack.c.h.b16 %v1858_v53  ;;  %2310 = vmatpush.bf16.msrb.mxu0 %v10544_v43  ;;  %v10566_v43 = vld [vmem:[%s14749_s1 + $0x4c0] sm:$0xff] }
 0x114   :  { %2339 = vmatpush.bf16.msra.mxu1 %v10552_v50  ;;  %2369 = vmatpush.bf16.msra.mxu2 %v10559_v29  ;;  %v1981_v29 = vrot.slane %v11180_v48, 3 }
 0x115   :  { %v12136_v44 = vpop.f32.mrf.mxu2  ;;  %v12148_v1 = vadd.f32 %v11990_v3, %v1200_v32  ;;  %v12159_v63 = vpop.f32.mrf.mxu1  ;;  %v1859_v3 = vld [vmem:[%s14748_s0 + $0x10] sm:$0x8]  ;;  %v12174_v9 = vpack.c.b16 %v11115_v26, %v1953_v22  ;;  %v1428_v32 = vrot.slane %v11392_v46, 1  ;;  %v1952_v22 = vunpack.c.l.b16 %v1858_v53 }
 0x116   :  { %v12150_v10 = vpop.f32.mrf.mxu3  ;;  %v883_v62 = vpop.f32.mrf.mxu0  ;;  %2398 = vmatpush.bf16.msra.mxu3 %v10567_v25  ;;  %v1954_v11 = vunpack.c.l.b16 %v1859_v3  ;;  %v1978_v26 = vrot.slane %v11170_v45, 3 }
 0x117   :  { %v884_v56 = vadd.f32 %v883_v62, %v12000_v27  ;;  %v10558_v27 = vld [vmem:[%s14749_s1 + $0x480] sm:$0xff]  ;;  %v1980_v50 = vrot.slane %v12174_v9, 3  ;;  %2311 = vmatpush.bf16.msrb.mxu0 %v10543_v52  ;;  %v12203_v52 = vpack.c.b16 %v11095_v20, %v1952_v22 }
 0x118   :  { %v12184_v62 = vpack.c.b16 %v11576_v49, %v1954_v11  ;;  %2340 = vmatpush.bf16.msra.mxu1 %v10551_v5  ;;  %2370 = vmatpush.bf16.msra.mxu2 %v10558_v27  ;;  %v14885_v27 = vrot.slane %v11310_v7, 1 }
 0x119   :  { %v1173_v38 = vadd.f32 %v11994_v28, %v884_v56  ;;  %v10542_v28 = vld [vmem:[%s14749_s1 + $0x400] sm:$0xff] }
 0x11a   :  { %14884 = vst [vmem:[#allocation25_spill] sm:$0xff] %v12184_v62  ;;  %2399 = vmatpush.bf16.msra.mxu3 %v10566_v43  ;;  %v10550_v56 = vld [vmem:[%s14749_s1 + $0x440] sm:$0xff]  ;;  %v1983_v11 = vrot.slane %v12184_v62, 3  ;;  %v1982_v43 = vsel %vm1970_vm2, %v1980_v50, %v1981_v29 }
 0x11b   :  { %v1202_v25 = vadd.f32 %v12002_v33, %v1173_v38  ;;  %v1429_v38 = vsel %vm1398_vm1, %v14885_v27, %v1428_v32  ;;  %2312 = vmatpush.bf16.msrb.mxu0 %v10542_v28 }
 0x11c   :  { %2341 = vmatpush.bf16.msra.mxu1 %v10550_v56 }
 0x11d   :  { %v12187_v3 = vpop.f32.mrf.mxu2  ;;  %v12198_v33 = vadd.f32 %v12008_v40, %v1202_v25  ;;  %v12211_v62 = vpop.f32.mrf.mxu1  ;;  %v1985_v40 = vsel %vm1970_vm2, %v1983_v11, %v1984_v24  ;;  %v1977_v25 = vrot.slane %v12203_v52, 3 }
 0x11e   :  { %v12200_v53 = vpop.f32.mrf.mxu3  ;;  %v886_v5 = vpop.f32.mrf.mxu0 }
 0x11f   :  { %v887_v49 = vadd.f32 %v886_v5, %v11847_v35  ;;  %v1979_v27 = vsel %vm1970_vm2, %v1977_v25, %v1978_v26 }
 0x121   :  { %v1176_v22 = vadd.f32 %v12020_v37, %v887_v49  ;;  %1780 = vmatmul.bf16.gmra.mxu0 %v1429_v38  ;;  %2342 = vmatmul.bf16.vlgmr.msra.gmra.mxu1 %v1979_v27  ;;  %v1438_v37 = vrot.slane %v11451_v19, 1  ;;  %v1992_v38 = vrot.slane %v11316_v8, 3  ;;  %v1990_v19 = vrot.slane %v11310_v7, 3 }
 0x122   :  { %2371 = vmatmul.bf16.vlgmr.msra.gmra.mxu2 %v1982_v43 }
 0x123   :  { %2400 = vmatmul.bf16.vlgmr.msra.gmra.mxu3 %v1985_v40  ;;  %v1205_v50 = vadd.f32 %v12041_v36, %v1176_v22 }
 0x125   :  { %v1713_v18 = vpop.f32.mrf.mxu2  ;;  %v12219_v35 = vadd.f32 %v12055_v61, %v1205_v50  ;;  %v12224_v14 = vpop.f32.mrf.mxu1  ;;  %v1994_v61 = vrot.slane %v11642_v13, 3 }
 0x126   :  { %v1742_v28 = vpop.f32.mrf.mxu3  ;;  %v888_v56 = vpop.f32.mrf.mxu0 }
 0x127   :  { %v12221_v5 = vadd.f32 %v1742_v28, %v1713_v18  ;;  %v889_v11 = vadd.f32 %v888_v56, %v11876_v2  ;;  %v1439_v2 = vsel %vm1398_vm1, %v1428_v32, %v1438_v37  ;;  %v1991_v28 = vsel %vm1970_vm2, %v1978_v26, %v1990_v19 }
 0x128   :  { %v1951_v32 = vunpack.c.h.b16 %v11913_v59 }
 0x129   :  { %v1178_v49 = vadd.f32 %v12061_v0, %v889_v11  ;;  %v1993_v0 = vsel %vm1970_vm2, %v1981_v29, %v1992_v38 }
 0x12b   :  { %v1207_v36 = vadd.f32 %v12085_v39, %v1178_v49  ;;  %v1995_v39 = vsel %vm1970_vm2, %v1984_v24, %v1994_v61  ;;  %v12251_v24 = vpack.c.b16 %v11491_v4, %v1951_v32 }
 0x12d   :  { %v1715_v43 = vpop.f32.mrf.mxu2  ;;  %v12232_v40 = vadd.f32 %v12099_v30, %v1207_v36  ;;  %v12240_v50 = vpop.f32.mrf.mxu1  ;;  %v1974_v36 = vrot.slane %v12251_v24, 3 }
 0x12e   :  { %v1744_v18 = vpop.f32.mrf.mxu3  ;;  %v891_v25 = vpop.f32.mrf.mxu0 }
 0x12f   :  { %v12235_v22 = vadd.f32 %v1744_v18, %v1715_v43  ;;  %v892_v27 = vadd.f32 %v891_v25, %v11908_v58  ;;  %v10597_v25 = vld [vmem:[%s14749_s1 + $0x5b8] sm:$0xff] }
 0x130   :  { %2990 = vmatpush.bf16.msrb.mxu2 %v10597_v25 }
 0x131   :  { %v1181_v30 = vadd.f32 %v12114_v55, %v892_v27  ;;  %1785 = vmatmul.bf16.gmra.mxu0 %v1439_v2  ;;  %2347 = vmatmul.bf16.gmra.mxu1 %v1991_v28  ;;  %v2004_v2 = vrot.slane %v11718_v34, 3  ;;  %v10605_v28 = vld [vmem:[%s14749_s1 + $0x5f8] sm:$0xff] }
 0x132   :  { %2376 = vmatmul.bf16.gmra.mxu2 %v1993_v0  ;;  %3019 = vmatpush.bf16.msrb.mxu3 %v10605_v28  ;;  %v1862_v28 = vld [vmem:[%s14748_s0 + $0xb0] sm:$0x7] }
 0x133   :  { %2405 = vmatmul.bf16.gmra.mxu3 %v1995_v39  ;;  %v1210_v29 = vadd.f32 %v12136_v44, %v1181_v30  ;;  %v1975_v44 = vrot.slane %v11529_v57, 3 }
 0x135   :  { %v1718_v56 = vpop.f32.mrf.mxu2  ;;  %v12248_v11 = vadd.f32 %v12150_v10, %v1210_v29  ;;  %v12256_v37 = vpop.f32.mrf.mxu1  ;;  %v2002_v10 = vrot.slane %v11404_v51, 3  ;;  %v1976_v27 = vsel %vm1970_vm2, %v1974_v36, %v1975_v44  ;;  %v2005_v29 = vsel %vm1970_vm2, %v1994_v61, %v2004_v2  ;;  %v10604_v61 = vld [vmem:[%s14749_s1 + $0x5f0] sm:$0xff] }
 0x136   :  { %v1747_v58 = vpop.f32.mrf.mxu3  ;;  %v893_v49 = vpop.f32.mrf.mxu0  ;;  %3020 = vmatpush.bf16.msrb.mxu3 %v10604_v61  ;;  %v14848_v61 = vrot.slane %v11269_v42, 3 }
 0x137   :  { %v12253_v26 = vadd.f32 %v1747_v58, %v1718_v56  ;;  %v894_v55 = vadd.f32 %v893_v49, %v11951_v6  ;;  %v10581_v56 = vld [vmem:[%s14749_s1 + $0x538] sm:$0xff] }
 0x138   :  { %v10589_v58 = vld [vmem:[%s14749_s1 + $0x578] sm:$0xff]  ;;  %2932 = vmatpush.bf16.msra.mxu0 %v10581_v56  ;;  %v1959_v56 = vunpack.c.l.b16 %v1862_v28  ;;  %v1989_v28 = vsel %vm1970_vm2, %v1975_v44, %v14848_v61  ;;  %v2543_v61 = vshll.u32 %v12251_v24, 16 }
 0x139   :  { %v1183_v59 = vadd.f32 %v12159_v63, %v894_v55  ;;  %2961 = vmatpush.bf16.msrb.mxu1 %v10589_v58  ;;  %v10580_v55 = vld [vmem:[%s14749_s1 + $0x530] sm:$0xff] }
 0x13b   :  { %v1212_v43 = vadd.f32 %v12187_v3, %v1183_v59  ;;  %v2003_v3 = vsel %vm1970_vm2, %v1992_v38, %v2002_v10  ;;  %v10595_v59 = vld [vmem:[%s14749_s1 + $0x5a8] sm:$0xff] }
 0x13c   :  { %2933 = vmatpush.bf16.msra.mxu0 %v10580_v55  ;;  %v1969_v55 = vpack.c.b16 %v1959_v56, %v1959_v56 }
 0x13d   :  { %v1720_v18 = vpop.f32.mrf.mxu2  ;;  %v12268_v6 = vadd.f32 %v12200_v53, %v1212_v43  ;;  %v2000_v53 = vrot.slane %v11392_v46, 3  ;;  %v12283_v32 = vpop.f32.mrf.mxu1  ;;  %v1861_v43 = vld [vmem:[%s14748_s0 + $0xa8] sm:$0x77] }
 0x13e   :  { %v1749_v0 = vpop.f32.mrf.mxu3  ;;  %v1252_v63 = vpop.f32.mrf.mxu0 }
 0x13f   :  { %v12273_v39 = vadd.f32 %v1749_v0, %v1720_v18  ;;  %v1253_v30 = vadd.f32 %v1252_v63, %v12053_v31  ;;  %v2001_v38 = vsel %vm1970_vm2, %v1990_v19, %v2000_v53  ;;  %v10596_v31 = vld [vmem:[%s14749_s1 + $0x5b0] sm:$0xff]  ;;  %v10603_v0 = vld [vmem:[%s14749_s1 + $0x5e8] sm:$0xff]  ;;  %v1958_v63 = vunpack.c.h.b16 %v1861_v43 }
 0x140   :  { %2991 = vmatpush.bf16.msrb.mxu2 %v10596_v31  ;;  %3021 = vmatpush.bf16.msrb.mxu3 %v10603_v0  ;;  %v10602_v31 = vld [vmem:[%s14749_s1 + $0x5e0] sm:$0xff]  ;;  %v2014_v0 = vrot.slane %v1969_v55, 3  ;;  %v10592_v55 = vld [vmem:[%s14749_s1 + $0x590] sm:$0xff] }
 0x141   :  { %v12301_v49 = vadd.f32 %v12211_v62, %v1253_v30  ;;  %2313 = vmatmul.bf16.vlgmr.msrb.gmra.mxu0 %v1976_v27  ;;  %2352 = vmatmul.bf16.gmra.mxu1 %v2001_v38  ;;  %v10588_v62 = vld [vmem:[%s14749_s1 + $0x570] sm:$0xff]  ;;  %v10579_v30 = vld [vmem:[%s14749_s1 + $0x528] sm:$0xff]  ;;  %v1968_v38 = vpack.c.b16 %v1958_v63, %v1958_v63 }
 0x142   :  { %2381 = vmatmul.bf16.gmra.mxu2 %v2003_v3  ;;  %2962 = vmatpush.bf16.msrb.mxu1 %v10588_v62  ;;  %v1957_v62 = vunpack.c.l.b16 %v1861_v43  ;;  %v2015_v44 = vsel %vm1970_vm2, %v2004_v2, %v2014_v0  ;;  %v14887_v0 = vshrl.u32 %v11170_v45, 16 }
 0x143   :  { %2410 = vmatmul.bf16.gmra.mxu3 %v2005_v29  ;;  %v10587_v29 = vld [vmem:[%s14749_s1 + $0x568] sm:$0xff]  ;;  %2934 = vmatpush.bf16.msra.mxu0 %v10579_v30 }
 0x144   :  { %2992 = vmatpush.bf16.msrb.mxu2 %v10595_v59  ;;  %3022 = vmatpush.bf16.msrb.mxu3 %v10602_v31  ;;  %v1967_v63 = vpack.c.b16 %v1957_v62, %v1957_v62 }
 0x145   :  { %v1723_v19 = vpop.f32.mrf.mxu2  ;;  %v12324_v3 = vpop.f32.mrf.mxu1 }
 0x146   :  { %v1752_v36 = vpop.f32.mrf.mxu3  ;;  %v1254_v18 = vpop.f32.mrf.mxu0  ;;  %2963 = vmatpush.bf16.msrb.mxu1 %v10587_v29 }
 0x147   :  { %v12318_v25 = vadd.f32 %v1752_v36, %v1723_v19  ;;  %v1255_v27 = vadd.f32 %v1254_v18, %v12097_v12  ;;  %v10594_v12 = vld [vmem:[%s14749_s1 + $0x5a0] sm:$0xff]  ;;  %v2012_v19 = vrot.slane %v1968_v38, 3  ;;  %v10593_v18 = vld [vmem:[%s14749_s1 + $0x598] sm:$0xff]  ;;  %v2010_v38 = vrot.slane %v1967_v63, 3 }
 0x148   :  { %2993 = vmatpush.bf16.msrb.mxu2 %v10594_v12  ;;  %v10578_v36 = vld [vmem:[%s14749_s1 + $0x520] sm:$0xff]  ;;  %v10601_v12 = vld [vmem:[%s14749_s1 + $0x5d8] sm:$0xff]  ;;  %v2559_v63 = vrot.slane %v14887_v0, 3 }
 0x149   :  { %v12339_v58 = vadd.f32 %v12224_v14, %v1255_v27  ;;  %v10586_v14 = vld [vmem:[%s14749_s1 + $0x560] sm:$0xff]  ;;  %v2013_v29 = vsel %vm1970_vm2, %v2002_v10, %v2012_v19  ;;  %2935 = vmatpush.bf16.msra.mxu0 %v10578_v36  ;;  %3023 = vmatpush.bf16.msrb.mxu3 %v10601_v12  ;;  %v2011_v10 = vsel %vm1970_vm2, %v2000_v53, %v2010_v38  ;;  %v10577_v19 = vld [vmem:[%s14749_s1 + $0x518] sm:$0xff]  ;;  %v10600_v53 = vld [vmem:[%s14749_s1 + $0x5d0] sm:$0xff] }
 0x14a   :  { %2964 = vmatpush.bf16.msrb.mxu1 %v10586_v14  ;;  %v10591_v36 = vld [vmem:[%s14749_s1 + $0x588] sm:$0xff]  ;;  %v14886_v14 = vshll.u32 %v11170_v45, 16  ;;  %v14890_v45 = vshrl.u32 %v11157_v41, 16 }
 0x14b   :  { %v10599_v38 = vld [vmem:[%s14749_s1 + $0x5c8] sm:$0xff] }
 0x14c   :  { %2994 = vmatpush.bf16.msrb.mxu2 %v10593_v18  ;;  %v2560_v18 = vrot.slane %v14886_v14, 4 }
 0x14d   :  { %v1725_v59 = vpop.f32.mrf.mxu2  ;;  %v12368_v31 = vpop.f32.mrf.mxu1  ;;  %2936 = vmatpush.bf16.msra.mxu0 %v10577_v19  ;;  %3024 = vmatpush.bf16.msrb.mxu3 %v10600_v53 }
 0x14e   :  { %v1754_v43 = vpop.f32.mrf.mxu3  ;;  %v1257_v27 = vpop.f32.mrf.mxu0 }
 0x14f   :  { %v12359_v30 = vadd.f32 %v1754_v43, %v1725_v59  ;;  %v1258_v56 = vadd.f32 %v1257_v27, %v12148_v1  ;;  %v10585_v1 = vld [vmem:[%s14749_s1 + $0x558] sm:$0xff]  ;;  %v10576_v59 = vld [vmem:[%s14749_s1 + $0x510] sm:$0xff]  ;;  %v14888_v27 = vshll.u32 %v11157_v41, 16  ;;  %v10583_v41 = vld [vmem:[%s14749_s1 + $0x548] sm:$0xff] }
 0x150   :  { %2965 = vmatpush.bf16.msrb.mxu1 %v10585_v1  ;;  %2995 = vmatpush.bf16.msrb.mxu2 %v10592_v55  ;;  %v2535_v1 = vrot.slane %v14890_v45, 3  ;;  %v14891_v55 = vshrl.u32 %v11180_v48, 16 }
 0x151   :  { %v12386_v2 = vadd.f32 %v12240_v50, %v1258_v56  ;;  %2318 = vmatmul.bf16.gmra.mxu0 %v1989_v28  ;;  %2357 = vmatmul.bf16.gmra.mxu1 %v2011_v10  ;;  %v10584_v50 = vld [vmem:[%s14749_s1 + $0x550] sm:$0xff]  ;;  %v2536_v28 = vrot.slane %v14888_v27, 4  ;;  %v2552_v56 = vshrl.u32 %v12203_v52, 16  ;;  %v14889_v10 = vshll.u32 %v11180_v48, 16  ;;  %v10590_v48 = vld [vmem:[%s14749_s1 + $0x580] sm:$0xff] }
 0x152   :  { %2386 = vmatmul.bf16.gmra.mxu2 %v2013_v29  ;;  %v2571_v53 = vrot.slane %v14891_v55, 3  ;;  %2937 = vmatpush.bf16.msra.mxu0 %v10576_v59  ;;  %v2561_v27 = vor.u32 %v2560_v18, %v2559_v63  ;;  %v14894_v63 = vrot.slane %v11278_v47, 3 }
 0x153   :  { %2415 = vmatmul.bf16.gmra.mxu3 %v2015_v44  ;;  %v2555_v44 = vshll.u32 %v12203_v52, 16  ;;  %v2572_v19 = vrot.slane %v14889_v10, 4  ;;  %v10575_v52 = vld [vmem:[%s14749_s1 + $0x508] sm:$0xff]  ;;  %v2554_v0 = vrot.slane %v2552_v56, 3  ;;  %v14893_v56 = vshrl.u32 %v11529_v57, 16 }
 0x154   :  { %2966 = vmatpush.bf16.msrb.mxu1 %v10584_v50  ;;  %2996 = vmatpush.bf16.msrb.mxu2 %v10591_v36  ;;  %v10598_v36 = vld [vmem:[%s14749_s1 + $0x5c0] sm:$0xff] }
 0x155   :  { %v1728_v62 = vpop.f32.mrf.mxu2  ;;  %v12420_v14 = vpop.f32.mrf.mxu1  ;;  %3025 = vmatpush.bf16.msrb.mxu3 %v10599_v38  ;;  %v14892_v38 = vshll.u32 %v11529_v57, 16  ;;  %v10582_v57 = vld [vmem:[%s14749_s1 + $0x540] sm:$0xff]  ;;  %v2573_v18 = vor.u32 %v2572_v19, %v2571_v53 }
 0x156   :  { %v1757_v43 = vpop.f32.mrf.mxu3  ;;  %v1259_v29 = vpop.f32.mrf.mxu0  ;;  %2938 = vmatpush.bf16.msra.mxu0 %v10575_v52  ;;  %v14895_v52 = vrot.slane %v11269_v42, 3 }
 0x157   :  { %v12406_v12 = vadd.f32 %v1757_v43, %v1728_v62  ;;  %v1260_v62 = vadd.f32 %v1259_v29, %v12198_v33  ;;  %v2557_v33 = vrot.slane %v2555_v44, 4  ;;  %v2564_v43 = vshrl.u32 %v12174_v9, 16 }
 0x158   :  { %v2567_v29 = vshll.u32 %v12174_v9, 16  ;;  %v2548_v10 = vrot.slane %v14892_v38, 4  ;;  %v2547_v44 = vrot.slane %v14893_v56, 3  ;;  %2967 = vmatpush.bf16.msrb.mxu1 %v10583_v41  ;;  %2997 = vmatpush.bf16.msrb.mxu2 %v10590_v48  ;;  %v10574_v9 = vld [vmem:[%s14749_s1 + $0x500] sm:$0xff]  ;;  %v1999_v41 = vsel %vm1970_vm2, %v14895_v52, %v14894_v63 }
 0x159   :  { %v12433_v59 = vadd.f32 %v12256_v37, %v1260_v62  ;;  %v2558_v45 = vor.u32 %v2557_v33, %v2554_v0  ;;  %v2566_v55 = vrot.slane %v2564_v43, 3  ;;  %v2540_v62 = vshrl.u32 %v12251_v24, 16  ;;  %3026 = vmatpush.bf16.msrb.mxu3 %v10598_v36 }
 0x15a   :  { %v2569_v37 = vrot.slane %v2567_v29, 4  ;;  %v2545_v48 = vrot.slane %v2543_v61, 4  ;;  %v12460_v38 = vor.u32 %v2536_v28, %v2535_v1  ;;  %v2549_v56 = vor.u32 %v2548_v10, %v2547_v44  ;;  %2939 = vmatpush.bf16.msra.mxu0 %v10574_v9 }
 0x15b   :  { %v2542_v33 = vrot.slane %v2540_v62, 3  ;;  %v2562_v29 = vsel %vm2526_vm3, %v2558_v45, %v2561_v27  ;;  %v1956_v28 = vunpack.c.h.b16 %v12066_v60  ;;  %v14897_v62 = vshll.u32 %v11310_v7, 16 }
 0x15c   :  { %v2570_v24 = vor.u32 %v2569_v37, %v2566_v55  ;;  %2968 = vmatpush.bf16.msrb.mxu1 %v10582_v57 }
 0x15d   :  { %v1730_v50 = vpop.f32.mrf.mxu2  ;;  %v2546_v52 = vor.u32 %v2545_v48, %v2542_v33  ;;  %v1966_v10 = vpack.c.b16 %v1956_v28, %v1956_v28  ;;  %v2596_v9 = vrot.slane %v14897_v62, 4  ;;  %v14899_v33 = vshll.u32 %v11316_v8, 16 }
 0x15e   :  { %v1759_v0 = vpop.f32.mrf.mxu3  ;;  %v1262_v43 = vpop.f32.mrf.mxu0  ;;  %v2574_v63 = vsel %vm2526_vm3, %v2570_v24, %v2573_v18  ;;  %v2528_v62 = vshrl.u32 %v11936_v54, 16 }
 0x15f   :  { %v12457_v36 = vadd.f32 %v1759_v0, %v1730_v50  ;;  %v1263_v19 = vadd.f32 %v1262_v43, %v12219_v35  ;;  %v12463_v53 = vpop.f32.mrf.mxu1  ;;  %v2550_v61 = vsel %vm2526_vm3, %v2546_v52, %v2549_v56  ;;  %v2008_v57 = vrot.slane %v1966_v10, 3 }
 0x160   :  { %v14898_v0 = vshrl.u32 %v11316_v8, 16  ;;  %v2600_v48 = vrot.slane %v14899_v33, 4  ;;  %v14903_v33 = vshrl.u32 %v11392_v46, 16 }
 0x161   :  { %v12467_v55 = vadd.f32 %v12283_v32, %v1263_v19  ;;  %2323 = vmatmul.bf16.gmra.mxu0 %v1999_v41  ;;  %2969 = vmatmul.bf16.vlgmr.msrb.gmra.mxu1 %v2550_v61  ;;  %v14896_v32 = vshrl.u32 %v11310_v7, 16  ;;  %v14900_v19 = vshrl.u32 %v11269_v42, 16  ;;  %v14902_v61 = vrot.slane %v11278_v47, 3 }
 0x162   :  { %2998 = vmatmul.bf16.vlgmr.msrb.gmra.mxu2 %v2562_v29  ;;  %v2599_v24 = vrot.slane %v14898_v0, 3 }
 0x163   :  { %3027 = vmatmul.bf16.vlgmr.msrb.gmra.mxu3 %v2574_v63  ;;  %v2595_v37 = vrot.slane %v14896_v32, 3  ;;  %v2591_v7 = vrot.slane %v14900_v19, 3  ;;  %v14901_v63 = vshll.u32 %v11269_v42, 16  ;;  %v2009_v28 = vsel %vm1970_vm2, %v14902_v61, %v2008_v57 }
 0x164   :  { %v2601_v43 = vor.u32 %v2600_v48, %v2599_v24  ;;  %v14904_v48 = vshll.u32 %v11392_v46, 16  ;;  %v14906_v61 = vshll.u32 %v11404_v51, 16 }
 0x165   :  { %v12471_v1 = vpop.f32.mrf.mxu2  ;;  %v2597_v41 = vor.u32 %v2596_v9, %v2595_v37  ;;  %v2531_v9 = vshll.u32 %v11936_v54, 16 }
 0x166   :  { %v12473_v35 = vpop.f32.mrf.mxu3  ;;  %v1264_v50 = vpop.f32.mrf.mxu0  ;;  %v2616_v19 = vrot.slane %v14904_v48, 4 }
 0x167   :  { %v1265_v44 = vadd.f32 %v1264_v50, %v12232_v40  ;;  %v12476_v45 = vpop.f32.mrf.mxu1  ;;  %v2598_v50 = vsel %vm2526_vm3, %v2561_v27, %v2597_v41  ;;  %v2533_v0 = vrot.slane %v2531_v9, 4 }
 0x169   :  { %v12483_v60 = vadd.f32 %v12324_v3, %v1265_v44  ;;  %v2592_v3 = vrot.slane %v14901_v63, 4  ;;  %v2602_v44 = vsel %vm2526_vm3, %v2573_v18, %v2601_v43  ;;  %v2530_v18 = vrot.slane %v2528_v62, 3 }
 0x16b   :  { %v2593_v32 = vor.u32 %v2592_v3, %v2591_v7  ;;  %v2534_v7 = vor.u32 %v2533_v0, %v2530_v18  ;;  %v14905_v3 = vshrl.u32 %v11404_v51, 16  ;;  %v10637_v18 = vld [vmem:[%s14749_s1 + $0x6f8] sm:$0xff] }
 0x16c   :  { %3504 = vmatpush.bf16.msra.mxu3 %v10637_v18 }
 0x16d   :  { %v12489_v40 = vpop.f32.mrf.mxu2  ;;  %v2594_v42 = vsel %vm2526_vm3, %v2549_v56, %v2593_v32  ;;  %v2615_v56 = vrot.slane %v14903_v33, 3  ;;  %v2538_v51 = vsel %vm2526_vm3, %v2534_v7, %v12460_v38  ;;  %v10636_v7 = vld [vmem:[%s14749_s1 + $0x6f0] sm:$0xff] }
 0x16e   :  { %v12491_v29 = vpop.f32.mrf.mxu3  ;;  %v1267_v52 = vpop.f32.mrf.mxu0 }
 0x16f   :  { %v1268_v8 = vadd.f32 %v1267_v52, %v12248_v11  ;;  %v12502_v10 = vpop.f32.mrf.mxu1  ;;  %v12525_v63 = vor.u32 %v2616_v19, %v2615_v56  ;;  %v2619_v52 = vrot.slane %v14905_v3, 3  ;;  %v10613_v56 = vld [vmem:[%s14749_s1 + $0x638] sm:$0xff]  ;;  %v2430_v19 = vld [vmem:[%s14748_s0 + $0xa8] sm:$0xff] }
 0x170   :  { %v12576_v3 = vunpack.c.l.b16 %v2430_v19  ;;  %3048 = vmatpush.bf16.msrb.mxu0 %v10613_v56  ;;  %3505 = vmatpush.bf16.msra.mxu3 %v10636_v7 }
 0x171   :  { %v12506_v37 = vadd.f32 %v12368_v31, %v1268_v8  ;;  %2328 = vmatmul.bf16.gmra.mxu0 %v2009_v28  ;;  %2974 = vmatmul.bf16.gmra.mxu1 %v2594_v42  ;;  %v14908_v42 = vshll.u32 %v11278_v47, 16 }
 0x172   :  { %3003 = vmatmul.bf16.gmra.mxu2 %v2598_v50  ;;  %v10629_v50 = vld [vmem:[%s14749_s1 + $0x6b8] sm:$0xff] }
 0x173   :  { %3032 = vmatmul.bf16.gmra.mxu3 %v2602_v44  ;;  %v2612_v62 = vrot.slane %v14908_v42, 4  ;;  %3475 = vmatpush.bf16.msra.mxu2 %v10629_v50  ;;  %v12592_v50 = vunpack.c.h.b16 %v2430_v19 }
 0x175   :  { %v12511_v27 = vpop.f32.mrf.mxu2  ;;  %14909 = vst [vmem:[#allocation26_spill] sm:$0xff] %v12592_v50  ;;  %v2524_v56 = vpack.c.b16 %v12592_v50, %v12592_v50 }
 0x176   :  { %v12513_v11 = vpop.f32.mrf.mxu3  ;;  %v1269_v57 = vpop.f32.mrf.mxu0 }
 0x177   :  { %v1270_v31 = vadd.f32 %v1269_v57, %v12268_v6  ;;  %v12516_v24 = vpop.f32.mrf.mxu1  ;;  %v2620_v6 = vrot.slane %v14906_v61, 4  ;;  %v2618_v57 = vsel %vm2526_vm3, %v2597_v41, %v12525_v63  ;;  %v10621_v41 = vld [vmem:[%s14749_s1 + $0x678] sm:$0xff]  ;;  %v10620_v61 = vld [vmem:[%s14749_s1 + $0x670] sm:$0xff] }
 0x178   :  { %3446 = vmatpush.bf16.msra.mxu1 %v10621_v41 }
 0x179   :  { %v12523_v54 = vadd.f32 %v12420_v14, %v1270_v31  ;;  %v12536_v46 = vor.u32 %v2620_v6, %v2619_v52  ;;  %v14907_v14 = vshrl.u32 %v11278_v47, 16  ;;  %v10627_v6 = vld [vmem:[%s14749_s1 + $0x6a8] sm:$0xff] }
 0x17b   :  { %v2611_v44 = vrot.slane %v14907_v14, 3  ;;  %v2622_v47 = vsel %vm2526_vm3, %v2601_v43, %v12536_v46 }
 0x17c   :  { %3447 = vmatpush.bf16.msra.mxu1 %v10620_v61  ;;  %v2658_v61 = vshll.u32 %v2524_v56, 16 }
 0x17d   :  { %v12531_v28 = vpop.f32.mrf.mxu2  ;;  %v12556_v33 = vor.u32 %v2612_v62, %v2611_v44  ;;  %v14910_v44 = vshrl.u32 %v11304_v21, 16 }
 0x17e   :  { %v12538_v8 = vpop.f32.mrf.mxu3  ;;  %v1771_v9 = vpop.f32.mrf.mxu0 }
 0x17f   :  { %v1772_v0 = vadd.f32 %v1771_v9, %v12221_v5  ;;  %v12552_v31 = vpop.f32.mrf.mxu1  ;;  %v10628_v5 = vld [vmem:[%s14749_s1 + $0x6b0] sm:$0xff]  ;;  %v2614_v43 = vsel %vm2526_vm3, %v2593_v32, %v12556_v33  ;;  %v2587_v42 = vrot.slane %v14910_v44, 3  ;;  %v12604_v9 = vld [vmem:[%s14748_s0 + $0xa0] sm:$0xff] }
 0x180   :  { %3476 = vmatpush.bf16.msra.mxu2 %v10628_v5  ;;  %v10612_v32 = vld [vmem:[%s14749_s1 + $0x630] sm:$0xff]  ;;  %v10634_v44 = vld [vmem:[%s14749_s1 + $0x6e0] sm:$0xff] }
 0x181   :  { %v1801_v48 = vadd.f32 %v12463_v53, %v1772_v0  ;;  %2940 = vmatmul.bf16.vlgmr.msra.gmra.mxu0 %v2538_v51  ;;  %2979 = vmatmul.bf16.gmra.mxu1 %v2614_v43  ;;  %v10635_v0 = vld [vmem:[%s14749_s1 + $0x6e8] sm:$0xff] }
 0x182   :  { %3008 = vmatmul.bf16.gmra.mxu2 %v2618_v57  ;;  %v14911_v57 = vshll.u32 %v11304_v21, 16  ;;  %3049 = vmatpush.bf16.msrb.mxu0 %v10612_v32  ;;  %v10611_v21 = vld [vmem:[%s14749_s1 + $0x628] sm:$0xff] }
 0x183   :  { %3037 = vmatmul.bf16.gmra.mxu3 %v2622_v47  ;;  %v1830_v52 = vadd.f32 %v12471_v1, %v1801_v48  ;;  %v2523_v1 = vpack.c.b16 %v12576_v3, %v12576_v3  ;;  %v12617_v48 = vunpack.c.h.b16 %v12604_v9  ;;  %v10619_v43 = vld [vmem:[%s14749_s1 + $0x668] sm:$0xff] }
 0x184   :  { %v2588_v18 = vrot.slane %v14911_v57, 4  ;;  %3477 = vmatpush.bf16.msra.mxu2 %v10627_v6  ;;  %3506 = vmatpush.bf16.msra.mxu3 %v10635_v0 }
 0x185   :  { %v12579_v53 = vpop.f32.mrf.mxu2  ;;  %v12595_v14 = vadd.f32 %v1830_v52, %v12301_v49  ;;  %v2646_v49 = vshrl.u32 %v2523_v1, 16  ;;  %v2649_v47 = vshll.u32 %v2523_v1, 16  ;;  %v2655_v52 = vshrl.u32 %v2524_v56, 16  ;;  %3448 = vmatpush.bf16.msra.mxu1 %v10619_v43 }
 0x186   :  { %v12599_v62 = vpop.f32.mrf.mxu3  ;;  %v1773_v51 = vpop.f32.mrf.mxu0  ;;  %v2522_v6 = vpack.c.b16 %v12617_v48, %v12617_v48  ;;  %v12631_v1 = vor.u32 %v2588_v18, %v2587_v42  ;;  %3050 = vmatpush.bf16.msrb.mxu0 %v10611_v21  ;;  %v10610_v42 = vld [vmem:[%s14749_s1 + $0x620] sm:$0xff] }
 0x187   :  { %v1774_v41 = vadd.f32 %v1773_v51, %v12235_v22  ;;  %v12614_v5 = vpop.f32.mrf.mxu1  ;;  %v10626_v22 = vld [vmem:[%s14749_s1 + $0x6a0] sm:$0xff]  ;;  %v2648_v19 = vrot.slane %v2646_v49, 3  ;;  %v2651_v7 = vrot.slane %v2649_v47, 4  ;;  %v2657_v57 = vrot.slane %v2655_v52, 3 }
 0x188   :  { %v2660_v49 = vrot.slane %v2658_v61, 4  ;;  %v2637_v47 = vshrl.u32 %v2522_v6, 16  ;;  %v2640_v50 = vshll.u32 %v2522_v6, 16  ;;  %3478 = vmatpush.bf16.msra.mxu2 %v10626_v22  ;;  %3507 = vmatpush.bf16.msra.mxu3 %v10634_v44  ;;  %v10618_v18 = vld [vmem:[%s14749_s1 + $0x660] sm:$0xff] }
 0x189   :  { %v1803_v32 = vadd.f32 %v12476_v45, %v1774_v41  ;;  %v2652_v51 = vor.u32 %v2651_v7, %v2648_v19  ;;  %v2590_v7 = vsel %vm2526_vm3, %v12460_v38, %v12631_v1  ;;  %3449 = vmatpush.bf16.msra.mxu1 %v10618_v18  ;;  %v10609_v38 = vld [vmem:[%s14749_s1 + $0x618] sm:$0xff]  ;;  %v14912_v18 = vshrl.u32 %v11386_v15, 16 }
 0x18a   :  { %v2661_v21 = vor.u32 %v2660_v49, %v2657_v57  ;;  %v2639_v43 = vrot.slane %v2637_v47, 3  ;;  %v2642_v22 = vrot.slane %v2640_v50, 4  ;;  %3051 = vmatpush.bf16.msrb.mxu0 %v10610_v42  ;;  %v10623_v49 = vld [vmem:[%s14749_s1 + $0x688] sm:$0xff] }
 0x18b   :  { %v1832_v0 = vadd.f32 %v12489_v40, %v1803_v32  ;;  %v10625_v40 = vld [vmem:[%s14749_s1 + $0x698] sm:$0xff]  ;;  %v2653_v52 = vsel %vm2526_vm3, %v12525_v63, %v2652_v51  ;;  %v10632_v51 = vld [vmem:[%s14749_s1 + $0x6d0] sm:$0xff] }
 0x18c   :  { %v10633_v32 = vld [vmem:[%s14749_s1 + $0x6d8] sm:$0xff]  ;;  %v2662_v50 = vsel %vm2526_vm3, %v12536_v46, %v2661_v21  ;;  %v2643_v6 = vor.u32 %v2642_v22, %v2639_v43  ;;  %3479 = vmatpush.bf16.msra.mxu2 %v10625_v40  ;;  %v2607_v40 = vrot.slane %v14912_v18, 3  ;;  %v14913_v21 = vshll.u32 %v11386_v15, 16  ;;  %v10631_v22 = vld [vmem:[%s14749_s1 + $0x6c8] sm:$0xff] }
 0x18d   :  { %v12637_v45 = vpop.f32.mrf.mxu2  ;;  %v12649_v56 = vadd.f32 %v1832_v0, %v12339_v58  ;;  %3508 = vmatpush.bf16.msra.mxu3 %v10633_v32  ;;  %v10617_v63 = vld [vmem:[%s14749_s1 + $0x658] sm:$0xff]  ;;  %v10615_v15 = vld [vmem:[%s14749_s1 + $0x648] sm:$0xff]  ;;  %v14914_v32 = vshll.u32 %v11600_v16, 16 }
 0x18e   :  { %v12651_v41 = vpop.f32.mrf.mxu3  ;;  %v1776_v19 = vpop.f32.mrf.mxu0  ;;  %v2644_v46 = vsel %vm2526_vm3, %v12556_v33, %v2643_v6  ;;  %3052 = vmatpush.bf16.msrb.mxu0 %v10609_v38  ;;  %3450 = vmatpush.bf16.msra.mxu1 %v10617_v63  ;;  %v10616_v33 = vld [vmem:[%s14749_s1 + $0x650] sm:$0xff]  ;;  %v2608_v43 = vrot.slane %v14913_v21, 4  ;;  %v12723_v63 = vunpack.c.l.b16 %v12604_v9 }
 0x18f   :  { %v1777_v58 = vadd.f32 %v1776_v19, %v12253_v26  ;;  %v12662_v61 = vpop.f32.mrf.mxu1  ;;  %v10624_v26 = vld [vmem:[%s14749_s1 + $0x690] sm:$0xff] }
 0x190   :  { %3480 = vmatpush.bf16.msra.mxu2 %v10624_v26  ;;  %v2609_v38 = vor.u32 %v2608_v43, %v2607_v40  ;;  %v10630_v26 = vld [vmem:[%s14749_s1 + $0x6c0] sm:$0xff]  ;;  %v14919_v43 = vunpack.c.l.b16 %v11088_v17 }
 0x191   :  { %v1806_v44 = vadd.f32 %v12502_v10, %v1777_v58  ;;  %2945 = vmatmul.bf16.gmra.mxu0 %v2590_v7  ;;  %2984 = vmatmul.bf16.gmra.mxu1 %v2644_v46  ;;  %v10608_v10 = vld [vmem:[%s14749_s1 + $0x610] sm:$0xff]  ;;  %v2584_v58 = vrot.slane %v14914_v32, 4 }
 0x192   :  { %3013 = vmatmul.bf16.gmra.mxu2 %v2653_v52  ;;  %3509 = vmatpush.bf16.msra.mxu3 %v10632_v51  ;;  %v10622_v52 = vld [vmem:[%s14749_s1 + $0x680] sm:$0xff] }
 0x193   :  { %3042 = vmatmul.bf16.gmra.mxu3 %v2662_v50  ;;  %v1835_v57 = vadd.f32 %v12511_v27, %v1806_v44  ;;  %3053 = vmatpush.bf16.msrb.mxu0 %v10608_v10  ;;  %v14915_v50 = vshrl.u32 %v11600_v16, 16  ;;  %v10606_v16 = vld [vmem:[%s14749_s1 + $0x600] sm:$0xff] }
 0x194   :  { %3451 = vmatpush.bf16.msra.mxu1 %v10616_v33  ;;  %3481 = vmatpush.bf16.msra.mxu2 %v10623_v49  ;;  %v2610_v33 = vsel %vm2526_vm3, %v12631_v1, %v2609_v38  ;;  %v2521_v49 = vpack.c.b16 %v12723_v63, %v12723_v63 }
 0x195   :  { %v12682_v0 = vpop.f32.mrf.mxu2  ;;  %v12694_v27 = vadd.f32 %v1835_v57, %v12386_v2  ;;  %v10607_v2 = vld [vmem:[%s14749_s1 + $0x608] sm:$0xff]  ;;  %v2583_v6 = vrot.slane %v14915_v50, 3 }
 0x196   :  { %v12696_v47 = vpop.f32.mrf.mxu3  ;;  %v1778_v42 = vpop.f32.mrf.mxu0  ;;  %3510 = vmatpush.bf16.msra.mxu3 %v10631_v22 }
 0x197   :  { %v1779_v19 = vadd.f32 %v1778_v42, %v12273_v39  ;;  %v12706_v7 = vpop.f32.mrf.mxu1  ;;  %3054 = vmatpush.bf16.msrb.mxu0 %v10607_v2  ;;  %v14917_v42 = vunpack.c.l.b16 %v11108_v23  ;;  %v12752_v40 = vor.u32 %v2584_v58, %v2583_v6  ;;  %v2631_v2 = vshll.u32 %v2521_v49, 16 }
 0x198   :  { %3452 = vmatpush.bf16.msra.mxu1 %v10615_v15  ;;  %3482 = vmatpush.bf16.msra.mxu2 %v10622_v52 }
 0x199   :  { %v1808_v39 = vadd.f32 %v12516_v24, %v1779_v19  ;;  %v10614_v24 = vld [vmem:[%s14749_s1 + $0x640] sm:$0xff]  ;;  %v3168_v18 = vpack.c.b16 %v14917_v42, %v11095_v20  ;;  %v2628_v19 = vshrl.u32 %v2521_v49, 16  ;;  %v2633_v32 = vrot.slane %v2631_v2, 4  ;;  %v14924_v49 = vld [vmem:[#allocation8_spill] sm:$0xff] }
 0x19a   :  { %3511 = vmatpush.bf16.msra.mxu3 %v10630_v26  ;;  %v14926_v42 = vld [vmem:[#allocation14_spill] sm:$0xff] }
 0x19b   :  { %v1837_v44 = vadd.f32 %v12531_v28, %v1808_v39  ;;  %v14916_v28 = vunpack.c.h.b16 %v11088_v17  ;;  %3055 = vmatpush.bf16.msrb.mxu0 %v10606_v16  ;;  %v2630_v17 = vrot.slane %v2628_v19, 3  ;;  %v14920_v16 = vld [vmem:[#allocation7_spill] sm:$0xff]  ;;  %v14930_v19 = vld [vmem:[#allocation25_spill] sm:$0xff] }
 0x19c   :  { %3453 = vmatpush.bf16.msra.mxu1 %v10614_v24  ;;  %v14921_v24 = vunpack.c.h.b16 %v14920_v16  ;;  %v2579_v2 = vshll.u32 %v14930_v19, 16 }
 0x19d   :  { %v12729_v46 = vpop.f32.mrf.mxu2  ;;  %v12738_v9 = vadd.f32 %v1837_v44, %v12433_v59  ;;  %v3167_v57 = vpack.c.b16 %v14916_v28, %v11491_v4  ;;  %v14918_v4 = vld [vmem:[#allocation6_spill] sm:$0xff]  ;;  %v2634_v6 = vor.u32 %v2633_v32, %v2630_v17 }
 0x19e   :  { %v12740_v51 = vpop.f32.mrf.mxu3  ;;  %v1781_v10 = vpop.f32.mrf.mxu0  ;;  %v3166_v22 = vpack.c.b16 %v14919_v43, %v14918_v4  ;;  %v14922_v28 = vld [vmem:[#allocation10_spill] sm:$0xff] }
 0x19f   :  { %v1782_v59 = vadd.f32 %v1781_v10, %v12318_v25  ;;  %v12755_v21 = vpop.f32.mrf.mxu1  ;;  %v14929_v43 = vunpack.c.l.b16 %v14922_v28 }
 0x1a1   :  { %v1811_v1 = vadd.f32 %v12552_v31, %v1782_v59  ;;  %2950 = vmatmul.bf16.gmra.mxu0 %v2610_v33  ;;  %3454 = vmatmul.bf16.vlgmr.msra.gmra.mxu1 %v3166_v22  ;;  %v2635_v33 = vsel %vm2526_vm3, %v2609_v38, %v2634_v6  ;;  %v2576_v38 = vshrl.u32 %v14930_v19, 16 }
 0x1a2   :  { %3483 = vmatmul.bf16.vlgmr.msra.gmra.mxu2 %v3167_v57  ;;  %v14923_v57 = vunpack.c.h.b16 %v14922_v28 }
 0x1a3   :  { %3512 = vmatmul.bf16.vlgmr.msra.gmra.mxu3 %v3168_v18  ;;  %v1840_v20 = vadd.f32 %v12579_v53, %v1811_v1  ;;  %v14927_v18 = vunpack.c.l.b16 %v14926_v42 }
 0x1a4   :  { %v3172_v10 = vpack.c.b16 %v14923_v57, %v14921_v24 }
 0x1a5   :  { %v12762_v15 = vpop.f32.mrf.mxu2  ;;  %v12765_v25 = vadd.f32 %v1840_v20, %v12467_v55 }
 0x1a6   :  { %v12767_v52 = vpop.f32.mrf.mxu3  ;;  %v1783_v39 = vpop.f32.mrf.mxu0 }
 0x1a7   :  { %v1784_v31 = vadd.f32 %v1783_v39, %v12359_v30  ;;  %v12770_v58 = vpop.f32.mrf.mxu1 }
 0x1a9   :  { %v1813_v50 = vadd.f32 %v12614_v5, %v1784_v31  ;;  %v14925_v5 = vunpack.c.l.b16 %v14924_v49  ;;  %v2578_v31 = vrot.slane %v2576_v38, 3 }
 0x1ab   :  { %v1842_v26 = vadd.f32 %v12637_v45, %v1813_v50  ;;  %v3173_v45 = vpack.c.b16 %v14927_v18, %v14925_v5  ;;  %v14935_v18 = vld [vmem:[#allocation15_spill] sm:$0xff] }
 0x1ad   :  { %v12774_v53 = vpop.f32.mrf.mxu2  ;;  %v12777_v44 = vadd.f32 %v1842_v26, %v12483_v60  ;;  %v14928_v60 = vunpack.c.l.b16 %v14920_v16 }
 0x1ae   :  { %v12779_v55 = vpop.f32.mrf.mxu3  ;;  %v1786_v30 = vpop.f32.mrf.mxu0 }
 0x1af   :  { %v1787_v59 = vadd.f32 %v1786_v30, %v12406_v12  ;;  %v12791_v4 = vpop.f32.mrf.mxu1  ;;  %v3171_v22 = vpack.c.b16 %v14929_v43, %v14928_v60  ;;  %v14933_v30 = vld [vmem:[#allocation11_spill] sm:$0xff] }
 0x1b0   :  { %v14940_v38 = vunpack.c.l.b16 %v14933_v30 }
 0x1b1   :  { %v1816_v1 = vadd.f32 %v12662_v61, %v1787_v59  ;;  %2955 = vmatmul.bf16.gmra.mxu0 %v2635_v33  ;;  %3459 = vmatmul.bf16.gmra.mxu1 %v3171_v22  ;;  %v2581_v61 = vrot.slane %v2579_v2, 4  ;;  %v14934_v33 = vunpack.c.h.b16 %v14933_v30  ;;  %v14937_v59 = vld [vmem:[#allocation16_spill] sm:$0xff] }
 0x1b2   :  { %3488 = vmatmul.bf16.gmra.mxu2 %v3172_v10  ;;  %v14931_v10 = vld [vmem:[#allocation13_spill] sm:$0xff]  ;;  %v14938_v60 = vunpack.c.l.b16 %v14937_v59 }
 0x1b3   :  { %3517 = vmatmul.bf16.gmra.mxu3 %v3173_v45  ;;  %v1845_v20 = vadd.f32 %v12682_v0, %v1816_v1  ;;  %v2582_v16 = vor.u32 %v2581_v61, %v2578_v31  ;;  %v14936_v45 = vunpack.c.l.b16 %v14935_v18  ;;  %v14939_v19 = vunpack.c.l.b16 %v14931_v10  ;;  %v10683_v61 = vld [vmem:[%s14749_s1 + $0x7f0] sm:$0xff] }
 0x1b5   :  { %v12801_v12 = vpop.f32.mrf.mxu2  ;;  %v12804_v39 = vadd.f32 %v1845_v20, %v12506_v37  ;;  %v10676_v37 = vld [vmem:[%s14749_s1 + $0x7b8] sm:$0xff]  ;;  %v3178_v43 = vpack.c.b16 %v14938_v60, %v14936_v45  ;;  %v3176_v2 = vpack.c.b16 %v14940_v38, %v14939_v19  ;;  %v10642_v38 = vld [vmem:[%s14749_s1 + $0x720] sm:$0xff] }
 0x1b6   :  { %v12806_v17 = vpop.f32.mrf.mxu3  ;;  %v1788_v32 = vpop.f32.mrf.mxu0  ;;  %4110 = vmatpush.bf16.msrb.mxu2 %v10676_v37  ;;  %v10645_v20 = vld [vmem:[%s14749_s1 + $0x738] sm:$0xff] }
 0x1b7   :  { %v1789_v50 = vadd.f32 %v1788_v32, %v12457_v36  ;;  %v12809_v6 = vpop.f32.mrf.mxu1  ;;  %v14932_v36 = vunpack.c.h.b16 %v14931_v10  ;;  %v10653_v32 = vld [vmem:[%s14749_s1 + $0x778] sm:$0xff]  ;;  %3533 = vmatpush.bf16.msra.mxu0 %v10645_v20 }
 0x1b8   :  { %3562 = vmatpush.bf16.msrb.mxu1 %v10653_v32  ;;  %v14943_v32 = vld [vmem:[#allocation12_spill] sm:$0xff] }
 0x1b9   :  { %v1818_v26 = vadd.f32 %v12706_v7, %v1789_v50  ;;  %v3177_v5 = vpack.c.b16 %v14934_v33, %v14932_v36  ;;  %v14941_v36 = vshrl.u32 %v11642_v13, 16  ;;  %v14942_v33 = vshll.u32 %v11642_v13, 16  ;;  %v10643_v13 = vld [vmem:[%s14749_s1 + $0x728] sm:$0xff] }
 0x1bb   :  { %v1847_v24 = vadd.f32 %v12729_v46, %v1818_v26  ;;  %v2586_v46 = vsel %vm2526_vm3, %v2582_v16, %v12752_v40  ;;  %v10652_v16 = vld [vmem:[%s14749_s1 + $0x770] sm:$0xff]  ;;  %v2603_v30 = vrot.slane %v14941_v36, 3 }
 0x1bc   :  { %3563 = vmatpush.bf16.msrb.mxu1 %v10652_v16 }
 0x1bd   :  { %v12813_v0 = vpop.f32.mrf.mxu2  ;;  %v12819_v28 = vadd.f32 %v1847_v24, %v12523_v54  ;;  %v10684_v54 = vld [vmem:[%s14749_s1 + $0x7f8] sm:$0xff]  ;;  %v10674_v24 = vld [vmem:[%s14749_s1 + $0x7a8] sm:$0xff] }
 0x1be   :  { %v12821_v57 = vpop.f32.mrf.mxu3  ;;  %v2314_v7 = vpop.f32.mrf.mxu0  ;;  %4139 = vmatpush.bf16.msrb.mxu3 %v10684_v54  ;;  %v10681_v54 = vld [vmem:[%s14749_s1 + $0x7e0] sm:$0xff] }
 0x1bf   :  { %v2315_v22 = vadd.f32 %v2314_v7, %v12473_v35  ;;  %v12837_v1 = vpop.f32.mrf.mxu1  ;;  %v10675_v35 = vld [vmem:[%s14749_s1 + $0x7b0] sm:$0xff]  ;;  %v10682_v7 = vld [vmem:[%s14749_s1 + $0x7e8] sm:$0xff] }
 0x1c0   :  { %4111 = vmatpush.bf16.msrb.mxu2 %v10675_v35  ;;  %v14944_v35 = vunpack.c.h.b16 %v14943_v32 }
 0x1c1   :  { %v2344_v31 = vadd.f32 %v12755_v21, %v2315_v22  ;;  %3056 = vmatmul.bf16.vlgmr.msrb.gmra.mxu0 %v2586_v46  ;;  %3464 = vmatmul.bf16.gmra.mxu1 %v3176_v2  ;;  %v10644_v21 = vld [vmem:[%s14749_s1 + $0x730] sm:$0xff]  ;;  %v10672_v2 = vld [vmem:[%s14749_s1 + $0x798] sm:$0xff] }
 0x1c2   :  { %3493 = vmatmul.bf16.gmra.mxu2 %v3177_v5  ;;  %4140 = vmatpush.bf16.msrb.mxu3 %v10683_v61  ;;  %v2604_v5 = vrot.slane %v14942_v33, 4 }
 0x1c3   :  { %3522 = vmatmul.bf16.gmra.mxu3 %v3178_v43  ;;  %v2373_v50 = vadd.f32 %v12762_v15, %v2344_v31  ;;  %3534 = vmatpush.bf16.msra.mxu0 %v10644_v21  ;;  %v3182_v31 = vpack.c.b16 %v12617_v48, %v14944_v35  ;;  %v14945_v21 = vld [vmem:[#allocation17_spill] sm:$0xff]  ;;  %v14947_v48 = vunpack.c.l.b16 %v14943_v32 }
 0x1c4   :  { %4112 = vmatpush.bf16.msrb.mxu2 %v10674_v24  ;;  %v12894_v43 = vor.u32 %v2604_v5, %v2603_v30  ;;  %v14946_v16 = vunpack.c.l.b16 %v14945_v21 }
 0x1c5   :  { %v12857_v26 = vpop.f32.mrf.mxu2  ;;  %v2402_v15 = vadd.f32 %v12767_v52, %v2373_v50  ;;  %v10651_v52 = vld [vmem:[%s14749_s1 + $0x768] sm:$0xff] }
 0x1c6   :  { %v12869_v37 = vpop.f32.mrf.mxu3  ;;  %v2316_v10 = vpop.f32.mrf.mxu0  ;;  %4141 = vmatpush.bf16.msrb.mxu3 %v10682_v7  ;;  %3564 = vmatpush.bf16.msrb.mxu1 %v10651_v52  ;;  %v2606_v50 = vsel %vm2526_vm3, %v12752_v40, %v12894_v43  ;;  %v3183_v24 = vpack.c.b16 %v12576_v3, %v14946_v16  ;;  %v3181_v40 = vpack.c.b16 %v12723_v63, %v14947_v48  ;;  %v10641_v3 = vld [vmem:[%s14749_s1 + $0x718] sm:$0xff]  ;;  %v10679_v63 = vld [vmem:[%s14749_s1 + $0x7d0] sm:$0xff]  ;;  %v10669_v16 = vld [vmem:[%s14749_s1 + $0x780] sm:$0xff] }
 0x1c7   :  { %v12879_v46 = vadd.f32 %v2402_v15, %v12595_v14  ;;  %v2317_v45 = vadd.f32 %v2316_v10, %v12491_v29  ;;  %v12882_v60 = vpop.f32.mrf.mxu1  ;;  %v10673_v14 = vld [vmem:[%s14749_s1 + $0x7a0] sm:$0xff]  ;;  %3535 = vmatpush.bf16.msra.mxu0 %v10643_v13  ;;  %v10680_v15 = vld [vmem:[%s14749_s1 + $0x7d8] sm:$0xff]  ;;  %v10648_v7 = vld [vmem:[%s14749_s1 + $0x750] sm:$0xff]  ;;  %v14948_v13 = vshrl.u32 %v11718_v34, 16 }
 0x1c8   :  { %4113 = vmatpush.bf16.msrb.mxu2 %v10673_v14  ;;  %v14949_v14 = vshll.u32 %v11718_v34, 16  ;;  %v10678_v34 = vld [vmem:[%s14749_s1 + $0x7c8] sm:$0xff] }
 0x1c9   :  { %v2346_v29 = vadd.f32 %v12770_v58, %v2317_v45  ;;  %v10650_v58 = vld [vmem:[%s14749_s1 + $0x760] sm:$0xff]  ;;  %v10670_v45 = vld [vmem:[%s14749_s1 + $0x788] sm:$0xff]  ;;  %v2623_v52 = vrot.slane %v14948_v13, 3 }
 0x1ca   :  { %4142 = vmatpush.bf16.msrb.mxu3 %v10681_v54  ;;  %3565 = vmatpush.bf16.msrb.mxu1 %v10650_v58  ;;  %v10638_v13 = vld [vmem:[%s14749_s1 + $0x700] sm:$0xff] }
 0x1cb   :  { %v2375_v22 = vadd.f32 %v12774_v53, %v2346_v29  ;;  %3536 = vmatpush.bf16.msra.mxu0 %v10642_v38  ;;  %v2624_v29 = vrot.slane %v14949_v14, 4  ;;  %v12973_v38 = vld [vmem:[%s14748_s0 + $0x28] sm:$0xff] }
 0x1cc   :  { %4114 = vmatpush.bf16.msrb.mxu2 %v10672_v2  ;;  %v14852_v48 = vunpack.c.h.b16 %v12973_v38 }
 0x1cd   :  { %v12900_v19 = vpop.f32.mrf.mxu2  ;;  %v2404_v53 = vadd.f32 %v12779_v55, %v2375_v22  ;;  %v3599_v22 = vld [vmem:[%s14748_s0 + $0x14] sm:$0xcc] }
 0x1ce   :  { %v12912_v20 = vpop.f32.mrf.mxu3  ;;  %v2319_v61 = vpop.f32.mrf.mxu0  ;;  %4143 = vmatpush.bf16.msrb.mxu3 %v10680_v15  ;;  %v3734_v2 = vunpack.c.l.b16 %v3599_v22 }
 0x1cf   :  { %v12927_v55 = vadd.f32 %v2404_v53, %v12649_v56  ;;  %v2320_v10 = vadd.f32 %v2319_v61, %v12513_v11  ;;  %v12930_v36 = vpop.f32.mrf.mxu1  ;;  %v10649_v56 = vld [vmem:[%s14749_s1 + $0x758] sm:$0xff]  ;;  %v10671_v11 = vld [vmem:[%s14749_s1 + $0x790] sm:$0xff]  ;;  %3537 = vmatpush.bf16.msra.mxu0 %v10641_v3  ;;  %v14851_v53 = vunpack.c.l.b16 %v12973_v38  ;;  %v13011_v3 = vor.u32 %v2624_v29, %v2623_v52  ;;  %v10646_v52 = vld [vmem:[%s14749_s1 + $0x740] sm:$0xff] }
 0x1d0   :  { %3566 = vmatpush.bf16.msrb.mxu1 %v10649_v56  ;;  %4115 = vmatpush.bf16.msrb.mxu2 %v10671_v11  ;;  %v9075_v61 = vld [vmem:[%s14748_s0 + $0x3c] sm:$0xf]  ;;  %v10654_v11 = vld [vmem:[%s14748_s0 + $0x40] sm:$0xf] }
 0x1d1   :  { %v2349_v30 = vadd.f32 %v12791_v4, %v2320_v10  ;;  %3061 = vmatmul.bf16.gmra.mxu0 %v2606_v50  ;;  %3469 = vmatmul.bf16.gmra.mxu1 %v3181_v40  ;;  %v10640_v4 = vld [vmem:[%s14749_s1 + $0x710] sm:$0xff]  ;;  %v3735_v10 = vunpack.c.h.b16 %v3599_v22 }
 0x1d2   :  { %3498 = vmatmul.bf16.gmra.mxu2 %v3182_v31  ;;  %4144 = vmatpush.bf16.msrb.mxu3 %v10679_v63  ;;  %v10656_v50 = vld [vmem:[%s14748_s0 + $0x4c] sm:$0xf0]  ;;  %v10677_v63 = vld [vmem:[%s14749_s1 + $0x7c0] sm:$0xff] }
 0x1d3   :  { %3527 = vmatmul.bf16.gmra.mxu3 %v3183_v24  ;;  %v2378_v33 = vadd.f32 %v12801_v12, %v2349_v30  ;;  %3538 = vmatpush.bf16.msra.mxu0 %v10640_v4  ;;  %v13005_v24 = vpack.c.b16 %v14851_v53, %v3734_v2  ;;  %v13007_v15 = vor.u32 %v10656_v50, %v9075_v61  ;;  %v9077_v30 = vld [vmem:[%s14748_s0 + $0x50] sm:$0xf0] }
 0x1d4   :  { %3567 = vmatpush.bf16.msrb.mxu1 %v10648_v7  ;;  %4116 = vmatpush.bf16.msrb.mxu2 %v10670_v45  ;;  %v13028_v4 = vpack.c.b16 %v14852_v48, %v3735_v10  ;;  %v13030_v7 = vor.u32 %v10654_v11, %v9077_v30 }
 0x1d5   :  { %v12949_v5 = vpop.f32.mrf.mxu2  ;;  %v2407_v12 = vadd.f32 %v12806_v17, %v2378_v33  ;;  %v2431_v17 = vld [vmem:[%s14748_s0 + $0xb0] sm:$0xf]  ;;  %v3805_v33 = vrot.slane %v13005_v24, 2 }
 0x1d6   :  { %v12965_v54 = vpop.f32.mrf.mxu3  ;;  %v2321_v58 = vpop.f32.mrf.mxu0  ;;  %4145 = vmatpush.bf16.msrb.mxu3 %v10678_v34  ;;  %v13013_v56 = vunpack.c.l.b16 %v2431_v17  ;;  %v3808_v14 = vrot.slane %v13028_v4, 2  ;;  %v3809_v29 = vrot.slane %v13030_v7, 2  ;;  %v2626_v17 = vsel %vm2526_vm3, %v12894_v43, %v13011_v3 }
 0x1d7   :  { %v12983_v32 = vadd.f32 %v2407_v12, %v12694_v27  ;;  %v2322_v35 = vadd.f32 %v2321_v58, %v12538_v8  ;;  %v12986_v31 = vpop.f32.mrf.mxu1  ;;  %v10639_v27 = vld [vmem:[%s14749_s1 + $0x708] sm:$0xff] }
 0x1d8   :  { %v10647_v8 = vld [vmem:[%s14749_s1 + $0x748] sm:$0xff]  ;;  %3539 = vmatpush.bf16.msra.mxu0 %v10639_v27  ;;  %4117 = vmatpush.bf16.msrb.mxu2 %v10669_v16  ;;  %v2525_v34 = vpack.c.b16 %v13013_v56, %v13013_v56  ;;  %v14950_v27 = vld [vmem:[#allocation18_spill] sm:$0xff] }
 0x1d9   :  { %v2351_v40 = vadd.f32 %v12809_v6, %v2322_v35  ;;  %v3806_v6 = vrot.slane %v13007_v15, 2  ;;  %3568 = vmatpush.bf16.msrb.mxu1 %v10647_v8  ;;  %v14951_v8 = vld [vmem:[#allocation19_spill] sm:$0xff] }
 0x1da   :  { %4146 = vmatpush.bf16.msrb.mxu3 %v10677_v63  ;;  %v14952_v16 = vunpack.c.l.b16 %v14951_v8  ;;  %v2667_v11 = vshll.u32 %v2525_v34, 16 }
 0x1db   :  { %v2380_v45 = vadd.f32 %v12813_v0, %v2351_v40  ;;  %v3807_v2 = vsel %vm3804_vm4, %v3805_v33, %v3806_v6  ;;  %v2664_v40 = vshrl.u32 %v2525_v34, 16 }
 0x1dc   :  { %3540 = vmatpush.bf16.msra.mxu0 %v10638_v13  ;;  %v3170_v43 = vpack.c.b16 %v14952_v16, %v14950_v27  ;;  %v2669_v13 = vrot.slane %v2667_v11, 4 }
 0x1dd   :  { %v13033_v12 = vpop.f32.mrf.mxu2  ;;  %v2409_v0 = vadd.f32 %v12821_v57, %v2380_v45  ;;  %3569 = vmatpush.bf16.msrb.mxu1 %v10646_v52  ;;  %v3810_v57 = vsel %vm3804_vm4, %v3808_v14, %v3809_v29  ;;  %v2666_v45 = vrot.slane %v2664_v40, 3 }
 0x1de   :  { %v13044_v22 = vpop.f32.mrf.mxu3  ;;  %v2324_v58 = vpop.f32.mrf.mxu0 }
 0x1df   :  { %v13053_v35 = vadd.f32 %v2409_v0, %v12738_v9  ;;  %v2325_v61 = vadd.f32 %v2324_v58, %v12599_v62  ;;  %v13056_v50 = vpop.f32.mrf.mxu1 }
 0x1e1   :  { %v2354_v10 = vadd.f32 %v12837_v1, %v2325_v61  ;;  %3066 = vmatmul.bf16.gmra.mxu0 %v2626_v17  ;;  %3570 = vmatmul.bf16.vlgmr.msrb.gmra.mxu1 %v3170_v43  ;;  %v2670_v17 = vor.u32 %v2669_v13, %v2666_v45 }
 0x1e2   :  { %4118 = vmatmul.bf16.vlgmr.msrb.gmra.mxu2 %v3807_v2 }
 0x1e3   :  { %4147 = vmatmul.bf16.vlgmr.msrb.gmra.mxu3 %v3810_v57  ;;  %v2383_v62 = vadd.f32 %v12857_v26, %v2354_v10  ;;  %v9095_v26 = vld [vmem:[%s14748_s0 + $0x64] sm:$0xf]  ;;  %v2671_v43 = vsel %vm2526_vm3, %v13011_v3, %v2670_v17 }
 0x1e5   :  { %v13064_v9 = vpop.f32.mrf.mxu2  ;;  %v2412_v30 = vadd.f32 %v12869_v37, %v2383_v62  ;;  %v10661_v37 = vld [vmem:[%s14748_s0 + $0x74] sm:$0xf0] }
 0x1e6   :  { %v13067_v63 = vpop.f32.mrf.mxu3  ;;  %v2326_v33 = vpop.f32.mrf.mxu0  ;;  %v13081_v0 = vor.u32 %v10661_v37, %v9095_v26 }
 0x1e7   :  { %v13070_v52 = vadd.f32 %v2412_v30, %v12765_v25  ;;  %v2327_v1 = vadd.f32 %v2326_v33, %v12651_v41  ;;  %v13073_v14 = vpop.f32.mrf.mxu1  ;;  %v10659_v25 = vld [vmem:[%s14748_s0 + $0x68] sm:$0xf]  ;;  %v9097_v41 = vld [vmem:[%s14748_s0 + $0x78] sm:$0xf0]  ;;  %v14953_v30 = vld [vmem:[#allocation20_spill] sm:$0xff] }
 0x1e8   :  { %v3820_v34 = vrot.slane %v13081_v0, 2  ;;  %v13091_v2 = vor.u32 %v10659_v25, %v9097_v41  ;;  %v14954_v33 = vunpack.c.l.b16 %v14953_v30 }
 0x1e9   :  { %v2356_v58 = vadd.f32 %v12882_v60, %v2327_v1 }
 0x1ea   :  { %v3822_v27 = vrot.slane %v13091_v2, 2  ;;  %v3821_v10 = vsel %vm3804_vm4, %v3806_v6, %v3820_v34 }
 0x1eb   :  { %v2385_v61 = vadd.f32 %v12900_v19, %v2356_v58 }
 0x1ec   :  { %v3823_v62 = vsel %vm3804_vm4, %v3809_v29, %v3822_v27 }
 0x1ed   :  { %v13094_v57 = vpop.f32.mrf.mxu2  ;;  %v2414_v60 = vadd.f32 %v12912_v20, %v2385_v61  ;;  %v14955_v20 = vld [vmem:[#allocation21_spill] sm:$0xff] }
 0x1ee   :  { %v13098_v8 = vpop.f32.mrf.mxu3  ;;  %v2329_v16 = vpop.f32.mrf.mxu0  ;;  %v14956_v45 = vunpack.c.l.b16 %v14955_v20  ;;  %v10716_v20 = vld [vmem:[%s14749_s1 + $0x8f8] sm:$0xff] }
 0x1ef   :  { %v13104_v40 = vadd.f32 %v2414_v60, %v12777_v44  ;;  %v2330_v11 = vadd.f32 %v2329_v16, %v12696_v47  ;;  %v13107_v19 = vpop.f32.mrf.mxu1  ;;  %4841 = vmatpush.bf16.msra.mxu3 %v10716_v20  ;;  %v10705_v20 = vld [vmem:[%s14749_s1 + $0x8a0] sm:$0xff] }
 0x1f0   :  { %v3175_v13 = vpack.c.b16 %v14956_v45, %v14954_v33 }
 0x1f1   :  { %v2359_v1 = vadd.f32 %v12930_v36, %v2330_v11  ;;  %3071 = vmatmul.bf16.gmra.mxu0 %v2671_v43  ;;  %v9115_v36 = vld [vmem:[%s14748_s0 + $0x8c] sm:$0xf]  ;;  %v14958_v11 = vunpack.c.h.b16 %v11108_v23 }
 0x1f2   :  { %4123 = vmatmul.bf16.gmra.mxu2 %v3821_v10  ;;  %3575 = vmatmul.bf16.gmra.mxu1 %v3175_v13  ;;  %v14957_v10 = vld [vmem:[#allocation9_spill] sm:$0xff] }
 0x1f3   :  { %4152 = vmatmul.bf16.gmra.mxu3 %v3823_v62  ;;  %v2388_v44 = vadd.f32 %v12949_v5, %v2359_v1  ;;  %v10666_v5 = vld [vmem:[%s14748_s0 + $0x9c] sm:$0xf0]  ;;  %v3169_v62 = vpack.c.b16 %v14958_v11, %v14957_v10 }
 0x1f4   :  { %v13133_v25 = vor.u32 %v10666_v5, %v9115_v36  ;;  %v14959_v1 = vld [vmem:[#allocation22_spill] sm:$0xff]  ;;  %v10715_v36 = vld [vmem:[%s14749_s1 + $0x8f0] sm:$0xff] }
 0x1f5   :  { %v13116_v3 = vpop.f32.mrf.mxu2  ;;  %v2417_v47 = vadd.f32 %v12965_v54, %v2388_v44  ;;  %v14960_v44 = vunpack.c.l.b16 %v14959_v1  ;;  %4842 = vmatpush.bf16.msra.mxu3 %v10715_v36  ;;  %v10713_v1 = vld [vmem:[%s14749_s1 + $0x8e0] sm:$0xff] }
 0x1f6   :  { %v13119_v6 = vpop.f32.mrf.mxu3  ;;  %v2331_v29 = vpop.f32.mrf.mxu0  ;;  %v3830_v41 = vrot.slane %v13133_v25, 2 }
 0x1f7   :  { %v13122_v26 = vadd.f32 %v2417_v47, %v12804_v39  ;;  %v2332_v37 = vadd.f32 %v2331_v29, %v12740_v51  ;;  %v13125_v58 = vpop.f32.mrf.mxu1  ;;  %v10664_v39 = vld [vmem:[%s14748_s0 + $0x90] sm:$0xf]  ;;  %v9117_v51 = vld [vmem:[%s14748_s0 + $0xa0] sm:$0xf0]  ;;  %v14961_v47 = vld [vmem:[#allocation23_spill] sm:$0xff] }
 0x1f8   :  { %v13143_v17 = vor.u32 %v10664_v39, %v9117_v51  ;;  %v10699_v39 = vld [vmem:[%s14749_s1 + $0x870] sm:$0xff]  ;;  %v10706_v51 = vld [vmem:[%s14749_s1 + $0x8a8] sm:$0xff] }
 0x1f9   :  { %v2361_v54 = vadd.f32 %v12986_v31, %v2332_v37  ;;  %v10708_v31 = vld [vmem:[%s14749_s1 + $0x8b8] sm:$0xff] }
 0x1fa   :  { %v3832_v16 = vrot.slane %v13143_v17, 2  ;;  %4226 = vmatpush.bf16.msra.mxu2 %v10708_v31  ;;  %v10692_v37 = vld [vmem:[%s14749_s1 + $0x838] sm:$0xff] }
 0x1fb   :  { %v2390_v61 = vadd.f32 %v13033_v12, %v2361_v54  ;;  %v3831_v12 = vsel %vm3804_vm4, %v3820_v34, %v3830_v41  ;;  %v14962_v34 = vunpack.c.l.b16 %v14961_v47  ;;  %4168 = vmatpush.bf16.msrb.mxu0 %v10692_v37  ;;  %v10689_v37 = vld [vmem:[%s14749_s1 + $0x820] sm:$0xff] }
 0x1fc   :  { %v3833_v23 = vsel %vm3804_vm4, %v3822_v27, %v3832_v16 }
 0x1fd   :  { %v13146_v60 = vpop.f32.mrf.mxu2  ;;  %v2419_v43 = vadd.f32 %v13044_v22, %v2390_v61  ;;  %v3180_v29 = vpack.c.b16 %v14962_v34, %v14960_v44  ;;  %v3623_v61 = vld [vmem:[%s14748_s0 + $0xb4] sm:$0x33] }
 0x1fe   :  { %v13156_v30 = vpop.f32.mrf.mxu3  ;;  %v2941_v33 = vpop.f32.mrf.mxu0  ;;  %v3774_v10 = vunpack.c.l.b16 %v3623_v61 }
 0x1ff   :  { %v13165_v45 = vadd.f32 %v2419_v43, %v12819_v28  ;;  %v2971_v22 = vadd.f32 %v13056_v50, %v2941_v33  ;;  %v13168_v13 = vpop.f32.mrf.mxu1  ;;  %v10700_v28 = vld [vmem:[%s14749_s1 + $0x878] sm:$0xff]  ;;  %v10707_v50 = vld [vmem:[%s14749_s1 + $0x8b0] sm:$0xff]  ;;  %v10714_v43 = vld [vmem:[%s14749_s1 + $0x8e8] sm:$0xff] }
 0x200   :  { %4197 = vmatpush.bf16.msra.mxu1 %v10700_v28  ;;  %4227 = vmatpush.bf16.msra.mxu2 %v10707_v50  ;;  %v10690_v33 = vld [vmem:[%s14749_s1 + $0x828] sm:$0xff]  ;;  %v10704_v28 = vld [vmem:[%s14749_s1 + $0x898] sm:$0xff]  ;;  %v14963_v50 = vunpack.c.h.b16 %v14924_v49 }
 0x201   :  { %v3000_v27 = vadd.f32 %v13064_v9, %v2971_v22  ;;  %3541 = vmatmul.bf16.vlgmr.msra.gmra.mxu0 %v3169_v62  ;;  %v10691_v9 = vld [vmem:[%s14749_s1 + $0x830] sm:$0xff]  ;;  %4843 = vmatpush.bf16.msra.mxu3 %v10714_v43  ;;  %v3799_v22 = vpack.c.b16 %v3774_v10, %v3774_v10 }
 0x202   :  { %4128 = vmatmul.bf16.gmra.mxu2 %v3831_v12  ;;  %3580 = vmatmul.bf16.gmra.mxu1 %v3180_v29  ;;  %v10698_v12 = vld [vmem:[%s14749_s1 + $0x868] sm:$0xff] }
 0x203   :  { %4157 = vmatmul.bf16.gmra.mxu3 %v3833_v23  ;;  %v13191_v5 = vadd.f32 %v13067_v63, %v3000_v27  ;;  %4169 = vmatpush.bf16.msrb.mxu0 %v10691_v9  ;;  %v3840_v44 = vrot.slane %v3799_v22, 2  ;;  %v14964_v27 = vunpack.c.h.b16 %v14926_v42  ;;  %v14965_v42 = vld [vmem:[#allocation24_spill] sm:$0xff] }
 0x204   :  { %4198 = vmatpush.bf16.msra.mxu1 %v10699_v39  ;;  %4228 = vmatpush.bf16.msra.mxu2 %v10706_v51  ;;  %v14966_v10 = vunpack.c.l.b16 %v14965_v42  ;;  %v10695_v22 = vld [vmem:[%s14749_s1 + $0x850] sm:$0xff] }
 0x205   :  { %v13193_v54 = vpop.f32.mrf.mxu2  ;;  %4844 = vmatpush.bf16.msra.mxu3 %v10713_v1  ;;  %v3174_v36 = vpack.c.b16 %v14964_v27, %v14963_v50  ;;  %v3841_v51 = vsel %vm3804_vm4, %v3830_v41, %v3840_v44  ;;  %v10688_v41 = vld [vmem:[%s14749_s1 + $0x818] sm:$0xff]  ;;  %v9091_v50 = vld [vmem:[%s14748_s0 + $0x4c] sm:$0xf]  ;;  %v10658_v27 = vld [vmem:[%s14748_s0 + $0x5c] sm:$0xf0] }
 0x206   :  { %v13204_v63 = vpop.f32.mrf.mxu3  ;;  %v2943_v31 = vpop.f32.mrf.mxu0  ;;  %v13298_v1 = vld [vmem:[%s14748_s0 + $0x38] sm:$0xf] }
 0x207   :  { %v2973_v11 = vadd.f32 %v13073_v14, %v2943_v31  ;;  %v13213_v62 = vpop.f32.mrf.mxu1  ;;  %v3775_v14 = vunpack.c.h.b16 %v3623_v61  ;;  %4170 = vmatpush.bf16.msrb.mxu0 %v10690_v33  ;;  %v10712_v61 = vld [vmem:[%s14749_s1 + $0x8d8] sm:$0xff]  ;;  %v10703_v33 = vld [vmem:[%s14749_s1 + $0x890] sm:$0xff]  ;;  %14967 = vst [vmem:[#allocation6_spill] sm:$0xff] %v13298_v1 }
 0x208   :  { %4199 = vmatpush.bf16.msra.mxu1 %v10698_v12  ;;  %4229 = vmatpush.bf16.msra.mxu2 %v10705_v20 }
 0x209   :  { %v3002_v23 = vadd.f32 %v13094_v57, %v2973_v11  ;;  %v3800_v47 = vpack.c.b16 %v3775_v14, %v3775_v14  ;;  %v10697_v57 = vld [vmem:[%s14749_s1 + $0x860] sm:$0xff]  ;;  %v3185_v11 = vpack.c.b16 %v13013_v56, %v14966_v10  ;;  %4845 = vmatpush.bf16.msra.mxu3 %v10712_v61  ;;  %v10711_v56 = vld [vmem:[%s14749_s1 + $0x8d0] sm:$0xff]  ;;  %v10702_v14 = vld [vmem:[%s14749_s1 + $0x888] sm:$0xff]  ;;  %v13326_v61 = vor.u32 %v10658_v27, %v9091_v50 }
 0x20a   :  { %v4370_v10 = vshrl.u32 %v13007_v15, 16 }
 0x20b   :  { %v13229_v34 = vadd.f32 %v13098_v8, %v3002_v23  ;;  %v3842_v8 = vrot.slane %v3800_v47, 2  ;;  %4171 = vmatpush.bf16.msrb.mxu0 %v10689_v37  ;;  %v3601_v23 = vld [vmem:[%s14748_s0 + $0x24] sm:$0xc]  ;;  %v10710_v47 = vld [vmem:[%s14749_s1 + $0x8c8] sm:$0xff]  ;;  %14968 = vst [vmem:[#allocation7_spill] sm:$0xff] %v13326_v61 }
 0x20c   :  { %4200 = vmatpush.bf16.msra.mxu1 %v10697_v57  ;;  %4230 = vmatpush.bf16.msra.mxu2 %v10704_v28  ;;  %v3738_v37 = vunpack.c.l.b16 %v3601_v23  ;;  %v14850_v57 = vunpack.c.l.b16 %v13298_v1  ;;  %v14969_v23 = vunpack.c.h.b16 %v14935_v18  ;;  %v10655_v18 = vld [vmem:[%s14748_s0 + $0x48] sm:$0xf] }
 0x20d   :  { %v13231_v29 = vpop.f32.mrf.mxu2  ;;  %v3843_v49 = vsel %vm3804_vm4, %v3832_v16, %v3842_v8  ;;  %4846 = vmatpush.bf16.msra.mxu3 %v10711_v56 }
 0x20e   :  { %v13246_v9 = vpop.f32.mrf.mxu3  ;;  %v2946_v39 = vpop.f32.mrf.mxu0 }
 0x20f   :  { %v2976_v31 = vadd.f32 %v13107_v19, %v2946_v39  ;;  %v13255_v43 = vpop.f32.mrf.mxu1  ;;  %v10696_v19 = vld [vmem:[%s14749_s1 + $0x858] sm:$0xff]  ;;  %4172 = vmatpush.bf16.msrb.mxu0 %v10688_v41  ;;  %v10701_v39 = vld [vmem:[%s14749_s1 + $0x880] sm:$0xff] }
 0x210   :  { %4201 = vmatpush.bf16.msra.mxu1 %v10696_v19  ;;  %4231 = vmatpush.bf16.msra.mxu2 %v10703_v33  ;;  %v13336_v41 = vld [vmem:[%s14748_s0 + $0x1c] sm:$0xcc] }
 0x211   :  { %v3005_v16 = vadd.f32 %v13116_v3, %v2976_v31  ;;  %3546 = vmatmul.bf16.gmra.mxu0 %v3174_v36  ;;  %v10687_v3 = vld [vmem:[%s14749_s1 + $0x810] sm:$0xff]  ;;  %4847 = vmatpush.bf16.msra.mxu3 %v10710_v47  ;;  %v10686_v36 = vld [vmem:[%s14749_s1 + $0x808] sm:$0xff]  ;;  %v4362_v31 = vshrl.u32 %v13005_v24, 16  ;;  %v10709_v19 = vld [vmem:[%s14749_s1 + $0x8c0] sm:$0xff] }
 0x212   :  { %4133 = vmatmul.bf16.gmra.mxu2 %v3841_v51  ;;  %3585 = vmatmul.bf16.gmra.mxu1 %v3185_v11  ;;  %v13324_v51 = vpack.c.b16 %v14850_v57, %v3738_v37  ;;  %v4373_v11 = vshll.u32 %v13007_v15, 16 }
 0x213   :  { %4162 = vmatmul.bf16.gmra.mxu3 %v3843_v49  ;;  %v13277_v12 = vadd.f32 %v13119_v6, %v3005_v16  ;;  %4173 = vmatpush.bf16.msrb.mxu0 %v10687_v3  ;;  %v4365_v49 = vshll.u32 %v13005_v24, 16  ;;  %v3818_v16 = vrot.slane %v13326_v61, 2  ;;  %v4364_v24 = vrot.slane %v4362_v31, 2 }
 0x214   :  { %4202 = vmatpush.bf16.msra.mxu1 %v10695_v22  ;;  %4232 = vmatpush.bf16.msra.mxu2 %v10702_v14  ;;  %v3817_v33 = vrot.slane %v13324_v51, 2  ;;  %v4372_v22 = vrot.slane %v4370_v10, 2  ;;  %v4375_v14 = vrot.slane %v4373_v11, 3 }
 0x215   :  { %v13279_v20 = vpop.f32.mrf.mxu2  ;;  %v4367_v56 = vrot.slane %v4365_v49, 3  ;;  %4848 = vmatpush.bf16.msra.mxu3 %v10709_v19 }
 0x216   :  { %v13290_v6 = vpop.f32.mrf.mxu3  ;;  %v2948_v44 = vpop.f32.mrf.mxu0  ;;  %v3819_v49 = vsel %vm3804_vm4, %v3817_v33, %v3818_v16 }
 0x217   :  { %v2978_v28 = vadd.f32 %v13125_v58, %v2948_v44  ;;  %v13305_v8 = vpop.f32.mrf.mxu1  ;;  %v10694_v58 = vld [vmem:[%s14749_s1 + $0x848] sm:$0xff]  ;;  %4174 = vmatpush.bf16.msrb.mxu0 %v10686_v36  ;;  %v14970_v44 = vunpack.c.h.b16 %v14937_v59  ;;  %v4368_v50 = vor.u32 %v4367_v56, %v4364_v24  ;;  %v4376_v59 = vor.u32 %v4375_v14, %v4372_v22  ;;  %v9085_v36 = vld [vmem:[%s14748_s0 + $0x58] sm:$0xf0] }
 0x218   :  { %4203 = vmatpush.bf16.msra.mxu1 %v10694_v58  ;;  %4233 = vmatpush.bf16.msra.mxu2 %v10701_v39  ;;  %v3737_v58 = vunpack.c.h.b16 %v13336_v41 }
 0x219   :  { %v3007_v42 = vadd.f32 %v13146_v60, %v2978_v28  ;;  %v13346_v60 = vld [vmem:[%s14748_s0 + $0x30] sm:$0xff]  ;;  %v3179_v47 = vpack.c.b16 %v14970_v44, %v14969_v23  ;;  %v10685_v28 = vld [vmem:[%s14749_s1 + $0x800] sm:$0xff]  ;;  %v4377_v19 = vsel %vm4360_vm5, %v4368_v50, %v4376_v59 }
 0x21a   :  { %v14853_v39 = vunpack.c.h.b16 %v13346_v60 }
 0x21b   :  { %v13349_v3 = vadd.f32 %v13156_v30, %v3007_v42  ;;  %v10693_v30 = vld [vmem:[%s14749_s1 + $0x840] sm:$0xff]  ;;  %v13376_v42 = vor.u32 %v10655_v18, %v9085_v36  ;;  %4175 = vmatpush.bf16.msrb.mxu0 %v10685_v28 }
 0x21c   :  { %4204 = vmatpush.bf16.msra.mxu1 %v10693_v30  ;;  %v13382_v24 = vpack.c.b16 %v14853_v39, %v3737_v58  ;;  %v4447_v58 = vshrl.u32 %v13081_v0, 16  ;;  %v10729_v39 = vld [vmem:[%s14749_s1 + $0x960] sm:$0xff] }
 0x21d   :  { %v13355_v37 = vpop.f32.mrf.mxu2  ;;  %v3815_v56 = vrot.slane %v13376_v42, 2 }
 0x21e   :  { %v13366_v27 = vpop.f32.mrf.mxu3  ;;  %v2951_v31 = vpop.f32.mrf.mxu0  ;;  %v3814_v33 = vrot.slane %v13382_v24, 2 }
 0x21f   :  { %v2981_v10 = vadd.f32 %v13168_v13, %v2951_v31  ;;  %v3455_v11 = vpop.f32.mrf.mxu1  ;;  %v4450_v31 = vshll.u32 %v13081_v0, 16 }
 0x220   :  { %v3816_v14 = vsel %vm3804_vm4, %v3814_v33, %v3815_v56 }
 0x221   :  { %v3010_v22 = vadd.f32 %v13193_v54, %v2981_v10  ;;  %3551 = vmatmul.bf16.gmra.mxu0 %v3179_v47  ;;  %v9111_v47 = vld [vmem:[%s14748_s0 + $0x74] sm:$0xf]  ;;  %v4449_v10 = vrot.slane %v4447_v58, 2 }
 0x222   :  { %4234 = vmatmul.bf16.vlgmr.msra.gmra.mxu2 %v3819_v49  ;;  %4205 = vmatmul.bf16.vlgmr.msra.gmra.mxu1 %v3816_v14 }
 0x223   :  { %4849 = vmatmul.bf16.vlgmr.msra.gmra.mxu3 %v4377_v19  ;;  %v13388_v13 = vadd.f32 %v13204_v63, %v3010_v22  ;;  %v10663_v63 = vld [vmem:[%s14748_s0 + $0x84] sm:$0xf0]  ;;  %v10660_v22 = vld [vmem:[%s14748_s0 + $0x70] sm:$0xf] }
 0x224   :  { %v13400_v36 = vor.u32 %v10663_v63, %v9111_v47 }
 0x225   :  { %v3484_v23 = vpop.f32.mrf.mxu2 }
 0x226   :  { %v3485_v44 = vadd.f32 %v3484_v23, %v3455_v11  ;;  %v3513_v28 = vpop.f32.mrf.mxu3  ;;  %v2953_v30 = vpop.f32.mrf.mxu0  ;;  %14971 = vst [vmem:[#allocation10_spill] sm:$0xff] %v13400_v36  ;;  %v4452_v11 = vrot.slane %v4450_v31, 3  ;;  %v9105_v23 = vld [vmem:[%s14748_s0 + $0x80] sm:$0xf0] }
 0x227   :  { %v2983_v50 = vadd.f32 %v13213_v62, %v2953_v30  ;;  %v3457_v54 = vpop.f32.mrf.mxu1  ;;  %v3828_v62 = vrot.slane %v13400_v36, 2  ;;  %v13418_v47 = vor.u32 %v10660_v22, %v9105_v23  ;;  %v9083_v22 = vld [vmem:[%s14748_s0 + $0x44] sm:$0xf] }
 0x228   :  { %v13392_v18 = vadd.f32 %v3513_v28, %v3485_v44  ;;  %v4453_v14 = vor.u32 %v4452_v11, %v4449_v10  ;;  %v14972_v44 = vunpack.c.h.b16 %v14945_v21 }
 0x229   :  { %v3012_v49 = vadd.f32 %v13231_v29, %v2983_v50  ;;  %v14973_v29 = vld [vmem:[#allocation26_spill] sm:$0xff]  ;;  %v3829_v63 = vsel %vm3804_vm4, %v3818_v16, %v3828_v62  ;;  %v3826_v21 = vrot.slane %v13418_v47, 2  ;;  %v3736_v16 = vunpack.c.l.b16 %v13336_v41 }
 0x22a   :  { %v3184_v28 = vpack.c.b16 %v14973_v29, %v14972_v44  ;;  %v4454_v10 = vsel %vm4360_vm5, %v4376_v59, %v4453_v14  ;;  %v14854_v59 = vunpack.c.l.b16 %v13346_v60 }
 0x22b   :  { %v13407_v19 = vadd.f32 %v13246_v9, %v3012_v49 }
 0x22d   :  { %v3486_v33 = vpop.f32.mrf.mxu2 }
 0x22e   :  { %v3487_v30 = vadd.f32 %v3486_v33, %v3457_v54  ;;  %v3515_v50 = vpop.f32.mrf.mxu3  ;;  %v2956_v9 = vpop.f32.mrf.mxu0  ;;  %v3827_v54 = vsel %vm3804_vm4, %v3815_v56, %v3826_v21 }
 0x22f   :  { %v2986_v58 = vadd.f32 %v13255_v43, %v2956_v9  ;;  %v3460_v49 = vpop.f32.mrf.mxu1  ;;  %v10657_v43 = vld [vmem:[%s14748_s0 + $0x54] sm:$0xf0]  ;;  %v10668_v9 = vld [vmem:[%s14748_s0 + $0xac] sm:$0xf0] }
 0x230   :  { %v13424_v31 = vadd.f32 %v3515_v50, %v3487_v30  ;;  %v13441_v23 = vor.u32 %v10657_v43, %v9083_v22 }
 0x231   :  { %v3015_v11 = vadd.f32 %v13279_v20, %v2986_v58  ;;  %3556 = vmatmul.bf16.gmra.mxu0 %v3184_v28  ;;  %v13445_v28 = vpack.c.b16 %v14854_v59, %v3736_v16  ;;  %v4492_v58 = vshrl.u32 %v13133_v25, 16 }
 0x232   :  { %4239 = vmatmul.bf16.gmra.mxu2 %v3829_v63  ;;  %4210 = vmatmul.bf16.gmra.mxu1 %v3827_v54 }
 0x233   :  { %4854 = vmatmul.bf16.gmra.mxu3 %v4454_v10  ;;  %v13439_v33 = vadd.f32 %v13290_v6, %v3015_v11  ;;  %v9131_v6 = vld [vmem:[%s14748_s0 + $0x9c] sm:$0xf]  ;;  %v3811_v11 = vrot.slane %v13445_v28, 2  ;;  %v4494_v22 = vrot.slane %v4492_v58, 2 }
 0x234   :  { %v13456_v63 = vor.u32 %v10668_v9, %v9131_v6 }
 0x235   :  { %v3489_v20 = vpop.f32.mrf.mxu2 }
 0x236   :  { %v3490_v56 = vadd.f32 %v3489_v20, %v3460_v49  ;;  %v3518_v44 = vpop.f32.mrf.mxu3  ;;  %v2958_v29 = vpop.f32.mrf.mxu0  ;;  %14974 = vst [vmem:[#allocation8_spill] sm:$0xff] %v13456_v63  ;;  %v4495_v49 = vshll.u32 %v13133_v25, 16  ;;  %v3838_v54 = vrot.slane %v13456_v63, 2  ;;  %v10665_v20 = vld [vmem:[%s14748_s0 + $0x98] sm:$0xf] }
 0x237   :  { %v2988_v30 = vadd.f32 %v13305_v8, %v2958_v29  ;;  %v3462_v50 = vpop.f32.mrf.mxu1  ;;  %v3812_v8 = vrot.slane %v13441_v23, 2  ;;  %v9125_v29 = vld [vmem:[%s14748_s0 + $0xa8] sm:$0xf0] }
 0x238   :  { %v13448_v41 = vadd.f32 %v3518_v44, %v3490_v56  ;;  %v4497_v43 = vrot.slane %v4495_v49, 3  ;;  %v13478_v9 = vor.u32 %v10665_v20, %v9125_v29  ;;  %v3839_v49 = vsel %vm3804_vm4, %v3828_v62, %v3838_v54  ;;  %v10724_v62 = vld [vmem:[%s14749_s1 + $0x938] sm:$0xff]  ;;  %v10747_v29 = vld [vmem:[%s14749_s1 + $0x9f0] sm:$0xff] }
 0x239   :  { %v3017_v10 = vadd.f32 %v13355_v37, %v2988_v30  ;;  %v10740_v37 = vld [vmem:[%s14749_s1 + $0x9b8] sm:$0xff]  ;;  %v3813_v58 = vsel %vm3804_vm4, %v3811_v11, %v3812_v8  ;;  %4870 = vmatpush.bf16.msra.mxu0 %v10724_v62  ;;  %v3625_v62 = vld [vmem:[%s14748_s0 + $0xc4] sm:$0x3] }
 0x23a   :  { %v13473_v44 = vor.u32 %v4497_v43, %v4494_v22  ;;  %4928 = vmatpush.bf16.msrb.mxu2 %v10740_v37  ;;  %v10732_v11 = vld [vmem:[%s14749_s1 + $0x978] sm:$0xff] }
 0x23b   :  { %v13465_v16 = vadd.f32 %v13366_v27, %v3017_v10  ;;  %v10748_v10 = vld [vmem:[%s14749_s1 + $0x9f8] sm:$0xff]  ;;  %4899 = vmatpush.bf16.msrb.mxu1 %v10732_v11 }
 0x23c   :  { %v4499_v20 = vsel %vm4360_vm5, %v4453_v14, %v13473_v44  ;;  %4957 = vmatpush.bf16.msrb.mxu3 %v10748_v10 }
 0x23d   :  { %v3491_v56 = vpop.f32.mrf.mxu2 }
 0x23e   :  { %v3492_v30 = vadd.f32 %v3491_v56, %v3462_v50  ;;  %v3520_v6 = vpop.f32.mrf.mxu3  ;;  %v3057_v27 = vpop.f32.mrf.mxu0  ;;  %v14855_v56 = vrot.slane %v13478_v9, 2 }
 0x23f   :  { %v3058_v22 = vadd.f32 %v3057_v27, %v13191_v5  ;;  %v3465_v43 = vpop.f32.mrf.mxu1  ;;  %v10739_v5 = vld [vmem:[%s14749_s1 + $0x9b0] sm:$0xff] }
 0x240   :  { %v13490_v50 = vadd.f32 %v3520_v6, %v3492_v30  ;;  %v3837_v14 = vsel %vm3804_vm4, %v3826_v21, %v14855_v56  ;;  %v9103_v30 = vld [vmem:[%s14748_s0 + $0x6c] sm:$0xf]  ;;  %4929 = vmatpush.bf16.msrb.mxu2 %v10739_v5  ;;  %v13522_v21 = vld [vmem:[%s14748_s0 + $0xb4] sm:$0x77]  ;;  %4958 = vmatpush.bf16.msrb.mxu3 %v10747_v29  ;;  %v3778_v29 = vunpack.c.l.b16 %v3625_v62 }
 0x241   :  { %v13505_v37 = vadd.f32 %v3058_v22, %v12879_v46  ;;  %4176 = vmatmul.bf16.vlgmr.msrb.gmra.mxu0 %v3813_v58  ;;  %v10662_v46 = vld [vmem:[%s14748_s0 + $0x7c] sm:$0xf0]  ;;  %v10723_v27 = vld [vmem:[%s14749_s1 + $0x930] sm:$0xff]  ;;  %v4350_v10 = vunpack.c.l.b16 %v13522_v21  ;;  %v10744_v56 = vld [vmem:[%s14749_s1 + $0x9d8] sm:$0xff] }
 0x242   :  { %4244 = vmatmul.bf16.gmra.mxu2 %v3839_v49  ;;  %4215 = vmatmul.bf16.gmra.mxu1 %v3837_v14  ;;  %v10731_v58 = vld [vmem:[%s14749_s1 + $0x970] sm:$0xff]  ;;  %v10738_v49 = vld [vmem:[%s14749_s1 + $0x9a8] sm:$0xff]  ;;  %v13537_v5 = vor.u32 %v10662_v46, %v9103_v30 }
 0x243   :  { %4859 = vmatmul.bf16.gmra.mxu3 %v4499_v20  ;;  %4871 = vmatpush.bf16.msra.mxu0 %v10723_v27  ;;  %v10746_v14 = vld [vmem:[%s14749_s1 + $0x9e8] sm:$0xff]  ;;  %v13542_v57 = vpack.c.b16 %v4350_v10, %v4350_v10  ;;  %v3803_v27 = vpack.c.b16 %v3778_v29, %v3778_v29  ;;  %v10721_v29 = vld [vmem:[%s14749_s1 + $0x920] sm:$0xff] }
 0x244   :  { %4900 = vmatpush.bf16.msrb.mxu1 %v10731_v58  ;;  %4930 = vmatpush.bf16.msrb.mxu2 %v10738_v49  ;;  %v10722_v30 = vld [vmem:[%s14749_s1 + $0x928] sm:$0xff]  ;;  %v10745_v49 = vld [vmem:[%s14749_s1 + $0x9e0] sm:$0xff] }
 0x245   :  { %v3494_v6 = vpop.f32.mrf.mxu2  ;;  %14975 = vst [vmem:[#allocation14_spill] sm:$0xff] %v13542_v57  ;;  %4959 = vmatpush.bf16.msrb.mxu3 %v10746_v14  ;;  %v10730_v46 = vld [vmem:[%s14749_s1 + $0x968] sm:$0xff]  ;;  %v4540_v10 = vshll.u32 %v13542_v57, 16  ;;  %v3848_v62 = vrot.slane %v3803_v27, 2 }
 0x246   :  { %v3495_v22 = vadd.f32 %v3494_v6, %v3465_v43  ;;  %v3523_v20 = vpop.f32.mrf.mxu3  ;;  %v3059_v11 = vpop.f32.mrf.mxu0  ;;  %v10737_v6 = vld [vmem:[%s14749_s1 + $0x9a0] sm:$0xff] }
 0x247   :  { %v3060_v53 = vadd.f32 %v3059_v11, %v13229_v34  ;;  %v3467_v43 = vpop.f32.mrf.mxu1  ;;  %v4537_v34 = vshrl.u32 %v13542_v57, 16  ;;  %4872 = vmatpush.bf16.msra.mxu0 %v10722_v30  ;;  %v4542_v14 = vrot.slane %v4540_v10, 3  ;;  %v10736_v30 = vld [vmem:[%s14749_s1 + $0x998] sm:$0xff]  ;;  %v3849_v59 = vsel %vm3804_vm4, %v3838_v54, %v3848_v62 }
 0x248   :  { %v13545_v48 = vadd.f32 %v3523_v20, %v3495_v22  ;;  %v13567_v22 = vld [vmem:[%s14748_s0 + $0xbc] sm:$0x33]  ;;  %v14856_v20 = vrot.slane %v13537_v5, 2  ;;  %4901 = vmatpush.bf16.msrb.mxu1 %v10730_v46  ;;  %4931 = vmatpush.bf16.msrb.mxu2 %v10737_v6 }
 0x249   :  { %v13559_v58 = vadd.f32 %v3060_v53, %v12927_v55  ;;  %v4539_v11 = vrot.slane %v4537_v34, 2  ;;  %v3777_v55 = vunpack.c.h.b16 %v13567_v22  ;;  %4960 = vmatpush.bf16.msrb.mxu3 %v10745_v49  ;;  %v10720_v54 = vld [vmem:[%s14749_s1 + $0x918] sm:$0xff] }
 0x24a   :  { %v3825_v49 = vsel %vm3804_vm4, %v3812_v8, %v14856_v20  ;;  %v10728_v62 = vld [vmem:[%s14749_s1 + $0x958] sm:$0xff] }
 0x24b   :  { %v4543_v27 = vor.u32 %v4542_v14, %v4539_v11  ;;  %v3802_v6 = vpack.c.b16 %v3777_v55, %v3777_v55  ;;  %4873 = vmatpush.bf16.msra.mxu0 %v10721_v29  ;;  %v9123_v29 = vld [vmem:[%s14748_s0 + $0x94] sm:$0xf] }
 0x24c   :  { %4902 = vmatpush.bf16.msrb.mxu1 %v10729_v39  ;;  %4932 = vmatpush.bf16.msrb.mxu2 %v10736_v30  ;;  %v10667_v30 = vld [vmem:[%s14748_s0 + $0xa4] sm:$0xf0] }
 0x24d   :  { %v3496_v53 = vpop.f32.mrf.mxu2  ;;  %v4544_v55 = vsel %vm4360_vm5, %v13473_v44, %v4543_v27  ;;  %v3846_v8 = vrot.slane %v3802_v6, 2  ;;  %4961 = vmatpush.bf16.msrb.mxu3 %v10744_v56  ;;  %v14976_v44 = vrot.slane %v13478_v9, 2  ;;  %v10727_v27 = vld [vmem:[%s14749_s1 + $0x950] sm:$0xff] }
 0x24e   :  { %v3497_v34 = vadd.f32 %v3496_v53, %v3467_v43  ;;  %v3525_v46 = vpop.f32.mrf.mxu3  ;;  %v3062_v10 = vpop.f32.mrf.mxu0  ;;  %v10743_v53 = vld [vmem:[%s14749_s1 + $0x9d0] sm:$0xff] }
 0x24f   :  { %v3063_v43 = vadd.f32 %v3062_v10, %v13277_v12  ;;  %v3470_v14 = vpop.f32.mrf.mxu1  ;;  %v10735_v12 = vld [vmem:[%s14749_s1 + $0x990] sm:$0xff]  ;;  %v3847_v56 = vsel %vm3804_vm4, %v14976_v44, %v3846_v8  ;;  %4874 = vmatpush.bf16.msra.mxu0 %v10720_v54  ;;  %v4416_v8 = vshll.u32 %v13382_v24, 16  ;;  %v4421_v54 = vshrl.u32 %v13376_v42, 16 }
 0x250   :  { %v13592_v11 = vadd.f32 %v3525_v46, %v3497_v34  ;;  %4903 = vmatpush.bf16.msrb.mxu1 %v10728_v62  ;;  %4933 = vmatpush.bf16.msrb.mxu2 %v10735_v12  ;;  %v10734_v34 = vld [vmem:[%s14749_s1 + $0x988] sm:$0xff]  ;;  %v13629_v46 = vor.u32 %v10667_v30, %v9123_v29  ;;  %v4424_v62 = vshll.u32 %v13376_v42, 16 }
 0x251   :  { %v13606_v39 = vadd.f32 %v3063_v43, %v12983_v32  ;;  %4181 = vmatmul.bf16.gmra.mxu0 %v3825_v49  ;;  %4962 = vmatpush.bf16.msrb.mxu3 %v10743_v53  ;;  %v10742_v43 = vld [vmem:[%s14749_s1 + $0x9c8] sm:$0xff]  ;;  %v10733_v53 = vld [vmem:[%s14749_s1 + $0x980] sm:$0xff]  ;;  %v4423_v30 = vrot.slane %v4421_v54, 2 }
 0x252   :  { %4249 = vmatmul.bf16.gmra.mxu2 %v3849_v59  ;;  %4220 = vmatmul.bf16.gmra.mxu1 %v3847_v56  ;;  %v10719_v59 = vld [vmem:[%s14749_s1 + $0x910] sm:$0xff]  ;;  %v10718_v56 = vld [vmem:[%s14749_s1 + $0x908] sm:$0xff] }
 0x253   :  { %4864 = vmatmul.bf16.gmra.mxu3 %v4544_v55  ;;  %4875 = vmatpush.bf16.msra.mxu0 %v10719_v59  ;;  %v4413_v55 = vshrl.u32 %v13382_v24, 16  ;;  %v10726_v24 = vld [vmem:[%s14749_s1 + $0x948] sm:$0xff]  ;;  %v10741_v59 = vld [vmem:[%s14749_s1 + $0x9c0] sm:$0xff] }
 0x254   :  { %4904 = vmatpush.bf16.msrb.mxu1 %v10727_v27  ;;  %4934 = vmatpush.bf16.msrb.mxu2 %v10734_v34  ;;  %v4426_v27 = vrot.slane %v4424_v62, 3  ;;  %v4430_v34 = vshrl.u32 %v13324_v51, 16  ;;  %v10725_v62 = vld [vmem:[%s14749_s1 + $0x940] sm:$0xff] }
 0x255   :  { %v3499_v32 = vpop.f32.mrf.mxu2  ;;  %4963 = vmatpush.bf16.msrb.mxu3 %v10742_v43  ;;  %v4415_v29 = vrot.slane %v4413_v55, 2  ;;  %v4438_v43 = vshrl.u32 %v13326_v61, 16  ;;  %v4441_v55 = vshll.u32 %v13326_v61, 16  ;;  %v14978_v61 = vrot.slane %v13629_v46, 2 }
 0x256   :  { %v3500_v6 = vadd.f32 %v3499_v32, %v3470_v14  ;;  %v3528_v10 = vpop.f32.mrf.mxu3  ;;  %v3064_v49 = vpop.f32.mrf.mxu0 }
 0x257   :  { %v3065_v12 = vadd.f32 %v3064_v49, %v13349_v3  ;;  %v3472_v14 = vpop.f32.mrf.mxu1  ;;  %v4418_v3 = vrot.slane %v4416_v8, 3  ;;  %4876 = vmatpush.bf16.msra.mxu0 %v10718_v56  ;;  %v4432_v8 = vrot.slane %v4430_v34, 2  ;;  %v4440_v56 = vrot.slane %v4438_v43, 2 }
 0x258   :  { %v13639_v44 = vadd.f32 %v3528_v10, %v3500_v6  ;;  %v4433_v6 = vshll.u32 %v13324_v51, 16  ;;  %v14857_v10 = vrot.slane %v13629_v46, 2  ;;  %4905 = vmatpush.bf16.msrb.mxu1 %v10726_v24  ;;  %4935 = vmatpush.bf16.msrb.mxu2 %v10733_v53  ;;  %v10717_v51 = vld [vmem:[%s14749_s1 + $0x900] sm:$0xff] }
 0x259   :  { %v13651_v32 = vadd.f32 %v3065_v12, %v13053_v35  ;;  %v4419_v49 = vor.u32 %v4418_v3, %v4415_v29  ;;  %v13661_v35 = vor.u32 %v4426_v27, %v4423_v30  ;;  %4964 = vmatpush.bf16.msrb.mxu3 %v10741_v59  ;;  %v4443_v29 = vrot.slane %v4441_v55, 3 }
 0x25a   :  { %v4435_v54 = vrot.slane %v4433_v6, 3  ;;  %v14977_v30 = vrot.slane %v13537_v5, 2  ;;  %v4396_v6 = vshrl.u32 %v13445_v28, 16 }
 0x25b   :  { %v4428_v27 = vsel %vm4360_vm5, %v4419_v49, %v13661_v35  ;;  %4877 = vmatpush.bf16.msra.mxu0 %v10717_v51  ;;  %v4444_v34 = vor.u32 %v4443_v29, %v4440_v56 }
 0x25c   :  { %v4436_v24 = vor.u32 %v4435_v54, %v4432_v8  ;;  %v3835_v59 = vsel %vm3804_vm4, %v14977_v30, %v14857_v10  ;;  %4906 = vmatpush.bf16.msrb.mxu1 %v10725_v62  ;;  %v4399_v8 = vshll.u32 %v13445_v28, 16  ;;  %v4404_v30 = vshrl.u32 %v13441_v23, 16 }
 0x25d   :  { %v3501_v12 = vpop.f32.mrf.mxu2 }
 0x25e   :  { %v3502_v3 = vadd.f32 %v3501_v12, %v3472_v14  ;;  %v3530_v20 = vpop.f32.mrf.mxu3  ;;  %v3067_v53 = vpop.f32.mrf.mxu0  ;;  %v4445_v54 = vsel %vm4360_vm5, %v4436_v24, %v4444_v34  ;;  %v4398_v12 = vrot.slane %v4396_v6, 2  ;;  %v4401_v51 = vrot.slane %v4399_v8, 3 }
 0x25f   :  { %v3068_v43 = vadd.f32 %v3067_v53, %v13388_v13  ;;  %v13680_v14 = vpop.f32.mrf.mxu1  ;;  %v4407_v13 = vshll.u32 %v13441_v23, 16  ;;  %v4406_v56 = vrot.slane %v4404_v30, 2  ;;  %v4486_v30 = vshll.u32 %v13400_v36, 16 }
 0x260   :  { %v13678_v55 = vadd.f32 %v3530_v20, %v3502_v3  ;;  %v3776_v20 = vunpack.c.l.b16 %v13567_v22  ;;  %v4402_v62 = vor.u32 %v4401_v51, %v4398_v12  ;;  %v4483_v12 = vshrl.u32 %v13400_v36, 16 }
 0x261   :  { %v13686_v49 = vadd.f32 %v3068_v43, %v13070_v52  ;;  %4186 = vmatmul.bf16.gmra.mxu0 %v3835_v59  ;;  %v4409_v29 = vrot.slane %v4407_v13, 3  ;;  %v4474_v52 = vshrl.u32 %v13418_v47, 16  ;;  %v4477_v59 = vshll.u32 %v13418_v47, 16 }
 0x262   :  { %4936 = vmatmul.bf16.vlgmr.msrb.gmra.mxu2 %v4428_v27  ;;  %v3801_v6 = vpack.c.b16 %v3776_v20, %v3776_v20 }
 0x263   :  { %4965 = vmatmul.bf16.vlgmr.msrb.gmra.mxu3 %v4445_v54  ;;  %v4410_v3 = vor.u32 %v4409_v29, %v4406_v56  ;;  %v4476_v8 = vrot.slane %v4474_v52, 2  ;;  %v4479_v54 = vrot.slane %v4477_v59, 3  ;;  %v4485_v56 = vrot.slane %v4483_v12, 2 }
 0x264   :  { %v3844_v13 = vrot.slane %v3801_v6, 2  ;;  %v4488_v29 = vrot.slane %v4486_v30, 3  ;;  %v4379_v12 = vshrl.u32 %v13028_v4, 16 }
 0x265   :  { %v4119_v28 = vpop.f32.mrf.mxu2  ;;  %v4411_v43 = vsel %vm4360_vm5, %v4402_v62, %v4410_v3  ;;  %v4480_v20 = vor.u32 %v4479_v54, %v4476_v8  ;;  %v4468_v62 = vshll.u32 %v13537_v5, 16 }
 0x266   :  { %v4148_v24 = vpop.f32.mrf.mxu3  ;;  %v3069_v53 = vpop.f32.mrf.mxu0  ;;  %4907 = vmatmul.bf16.vlgmr.msrb.gmra.mxu1 %v4411_v43  ;;  %v3845_v36 = vsel %vm3804_vm4, %v14978_v61, %v3844_v13  ;;  %v4387_v61 = vshrl.u32 %v13030_v7, 16 }
 0x267   :  { %v13690_v10 = vadd.f32 %v4148_v24, %v4119_v28  ;;  %v3070_v27 = vadd.f32 %v3069_v53, %v13407_v19  ;;  %v13696_v22 = vpop.f32.mrf.mxu1  ;;  %v4465_v19 = vshrl.u32 %v13537_v5, 16  ;;  %v4489_v24 = vor.u32 %v4488_v29, %v4485_v56 }
 0x268   :  { %v4470_v59 = vrot.slane %v4468_v62, 3  ;;  %v4481_v6 = vsel %vm4360_vm5, %v13661_v35, %v4480_v20  ;;  %v4382_v56 = vshll.u32 %v13028_v4, 16  ;;  %v4390_v35 = vshll.u32 %v13030_v7, 16 }
 0x269   :  { %v13701_v51 = vadd.f32 %v3070_v27, %v13104_v40  ;;  %v4467_v52 = vrot.slane %v4465_v19, 2  ;;  %v4490_v54 = vsel %vm4360_vm5, %v4444_v34, %v4489_v24  ;;  %v4381_v29 = vrot.slane %v4379_v12, 2 }
 0x26a   :  { %v4384_v19 = vrot.slane %v4382_v56, 3  ;;  %v4389_v34 = vrot.slane %v4387_v61, 2  ;;  %v4519_v4 = vshrl.u32 %v13478_v9, 16 }
 0x26b   :  { %v13722_v13 = vor.u32 %v4470_v59, %v4467_v52  ;;  %v4522_v52 = vshll.u32 %v13478_v9, 16 }
 0x26c   :  { %v4385_v56 = vor.u32 %v4384_v19, %v4381_v29 }
 0x26d   :  { %v4121_v28 = vpop.f32.mrf.mxu2  ;;  %v4472_v62 = vsel %vm4360_vm5, %v4410_v3, %v13722_v13  ;;  %v4531_v3 = vshll.u32 %v13456_v63, 16 }
 0x26e   :  { %v4150_v53 = vpop.f32.mrf.mxu3  ;;  %v3072_v43 = vpop.f32.mrf.mxu0 }
 0x26f   :  { %v13708_v40 = vadd.f32 %v4150_v53, %v4121_v28  ;;  %v3073_v27 = vadd.f32 %v3072_v43, %v13439_v33  ;;  %v13713_v8 = vpop.f32.mrf.mxu1 }
 0x271   :  { %v13718_v30 = vadd.f32 %v3073_v27, %v13122_v26  ;;  %4191 = vmatmul.bf16.gmra.mxu0 %v3845_v36  ;;  %v4392_v36 = vrot.slane %v4390_v35, 3  ;;  %v4524_v27 = vrot.slane %v4522_v52, 3 }
 0x272   :  { %4941 = vmatmul.bf16.gmra.mxu2 %v4481_v6  ;;  %v4521_v6 = vrot.slane %v4519_v4, 2  ;;  %v10772_v4 = vld [vmem:[%s14749_s1 + $0xab8] sm:$0xff] }
 0x273   :  { %4970 = vmatmul.bf16.gmra.mxu3 %v4490_v54  ;;  %v4528_v54 = vshrl.u32 %v13456_v63, 16  ;;  %v13739_v61 = vor.u32 %v4392_v36, %v4389_v34  ;;  %5454 = vmatpush.bf16.msra.mxu2 %v10772_v4  ;;  %v10779_v4 = vld [vmem:[%s14749_s1 + $0xaf0] sm:$0xff] }
 0x274   :  { %v13741_v35 = vor.u32 %v4524_v27, %v4521_v6  ;;  %v10780_v27 = vld [vmem:[%s14749_s1 + $0xaf8] sm:$0xff] }
 0x275   :  { %v4124_v33 = vpop.f32.mrf.mxu2  ;;  %v4394_v34 = vsel %vm4360_vm5, %v4385_v56, %v13739_v61  ;;  %5483 = vmatpush.bf16.msra.mxu3 %v10780_v27  ;;  %v10756_v56 = vld [vmem:[%s14749_s1 + $0xa38] sm:$0xff] }
 0x276   :  { %v4153_v26 = vpop.f32.mrf.mxu3  ;;  %v3074_v28 = vpop.f32.mrf.mxu0  ;;  %4912 = vmatmul.bf16.gmra.mxu1 %v4472_v62  ;;  %v4513_v62 = vshll.u32 %v13629_v46, 16  ;;  %v4526_v6 = vsel %vm4360_vm5, %v4480_v20, %v13741_v35  ;;  %v10764_v20 = vld [vmem:[%s14749_s1 + $0xa78] sm:$0xff]  ;;  %5396 = vmatpush.bf16.msrb.mxu0 %v10756_v56 }
 0x277   :  { %v13727_v53 = vadd.f32 %v4153_v26, %v4124_v33  ;;  %v3075_v59 = vadd.f32 %v3074_v28, %v13465_v16  ;;  %v13732_v43 = vpop.f32.mrf.mxu1  ;;  %v4530_v33 = vrot.slane %v4528_v54, 2  ;;  %v4533_v26 = vrot.slane %v4531_v3, 3  ;;  %5425 = vmatpush.bf16.msra.mxu1 %v10764_v20 }
 0x278   :  { %v4510_v16 = vshrl.u32 %v13629_v46, 16  ;;  %v4515_v29 = vrot.slane %v4513_v62, 3 }
 0x279   :  { %v13737_v12 = vadd.f32 %v3075_v59, %v13165_v45  ;;  %v13748_v52 = vor.u32 %v4533_v26, %v4530_v33  ;;  %v10771_v26 = vld [vmem:[%s14749_s1 + $0xab0] sm:$0xff]  ;;  %5484 = vmatpush.bf16.msra.mxu3 %v10779_v4  ;;  %v10778_v4 = vld [vmem:[%s14749_s1 + $0xae8] sm:$0xff] }
 0x27a   :  { %v4512_v59 = vrot.slane %v4510_v16, 2  ;;  %v4456_v16 = vshrl.u32 %v13091_v2, 16  ;;  %5455 = vmatpush.bf16.msra.mxu2 %v10771_v26 }
 0x27b   :  { %v4535_v33 = vsel %vm4360_vm5, %v4489_v24, %v13748_v52  ;;  %v4459_v24 = vshll.u32 %v13091_v2, 16 }
 0x27c   :  { %v13776_v62 = vor.u32 %v4515_v29, %v4512_v59  ;;  %v4265_v59 = vld [vmem:[%s14748_s0 + $0xc4] sm:$0x7] }
 0x27d   :  { %v4126_v28 = vpop.f32.mrf.mxu2  ;;  %v4354_v27 = vunpack.c.l.b16 %v4265_v59  ;;  %5485 = vmatpush.bf16.msra.mxu3 %v10778_v4  ;;  %v10777_v4 = vld [vmem:[%s14749_s1 + $0xae0] sm:$0xff] }
 0x27e   :  { %v4155_v45 = vpop.f32.mrf.mxu3  ;;  %v3542_v19 = vpop.f32.mrf.mxu0  ;;  %v4517_v56 = vsel %vm4360_vm5, %v13722_v13, %v13776_v62 }
 0x27f   :  { %v13752_v36 = vadd.f32 %v4155_v45, %v4126_v28  ;;  %v3543_v54 = vadd.f32 %v3542_v19, %v13392_v18  ;;  %v13760_v3 = vpop.f32.mrf.mxu1  ;;  %v4264_v28 = vld [vmem:[%s14748_s0 + $0xbc] sm:$0x77]  ;;  %v10755_v19 = vld [vmem:[%s14749_s1 + $0xa30] sm:$0xff]  ;;  %v13811_v59 = vpack.c.b16 %v4354_v27, %v4354_v27 }
 0x280   :  { %v4353_v45 = vunpack.c.h.b16 %v4264_v28  ;;  %5397 = vmatpush.bf16.msrb.mxu0 %v10755_v19  ;;  %v4352_v13 = vunpack.c.l.b16 %v4264_v28  ;;  %v10762_v19 = vld [vmem:[%s14749_s1 + $0xa68] sm:$0xff]  ;;  %v10769_v27 = vld [vmem:[%s14749_s1 + $0xaa0] sm:$0xff] }
 0x281   :  { %v3572_v18 = vadd.f32 %v13680_v14, %v3543_v54  ;;  %4878 = vmatmul.bf16.vlgmr.msra.gmra.mxu0 %v4394_v34  ;;  %v10763_v34 = vld [vmem:[%s14749_s1 + $0xa70] sm:$0xff]  ;;  %v4458_v54 = vrot.slane %v4456_v16, 2  ;;  %14980 = vst [vmem:[#allocation13_spill] sm:$0xff] %v13811_v59  ;;  %5486 = vmatpush.bf16.msra.mxu3 %v10777_v4 }
 0x282   :  { %4946 = vmatmul.bf16.gmra.mxu2 %v4526_v6  ;;  %v13799_v6 = vpack.c.b16 %v4353_v45, %v4353_v45  ;;  %5426 = vmatpush.bf16.msra.mxu1 %v10763_v34  ;;  %v4573_v34 = vshrl.u32 %v13811_v59, 16 }
 0x283   :  { %4975 = vmatmul.bf16.gmra.mxu3 %v4535_v33  ;;  %v13785_v14 = vadd.f32 %v3572_v18, %v13505_v37  ;;  %v10770_v37 = vld [vmem:[%s14749_s1 + $0xaa8] sm:$0xff]  ;;  %v4461_v33 = vrot.slane %v4459_v24, 3 }
 0x284   :  { %v4564_v63 = vshrl.u32 %v13799_v6, 16  ;;  %v4567_v45 = vshll.u32 %v13799_v6, 16  ;;  %5456 = vmatpush.bf16.msra.mxu2 %v10770_v37  ;;  %v4575_v57 = vrot.slane %v4573_v34, 2 }
 0x285   :  { %v4129_v29 = vpop.f32.mrf.mxu2  ;;  %v13827_v37 = vor.u32 %v4461_v33, %v4458_v54  ;;  %v10753_v54 = vld [vmem:[%s14749_s1 + $0xa20] sm:$0xff] }
 0x286   :  { %v4158_v20 = vpop.f32.mrf.mxu3  ;;  %v3544_v26 = vpop.f32.mrf.mxu0  ;;  %4917 = vmatmul.bf16.gmra.mxu1 %v4517_v56  ;;  %v4576_v56 = vshll.u32 %v13811_v59, 16  ;;  %v10761_v33 = vld [vmem:[%s14749_s1 + $0xa60] sm:$0xff] }
 0x287   :  { %v13804_v18 = vadd.f32 %v4158_v20, %v4129_v29  ;;  %v3545_v16 = vadd.f32 %v3544_v26, %v13424_v31  ;;  %v13814_v24 = vpop.f32.mrf.mxu1  ;;  %v10754_v29 = vld [vmem:[%s14749_s1 + $0xa28] sm:$0xff]  ;;  %v4566_v31 = vrot.slane %v4564_v63, 2  ;;  %v4569_v20 = vrot.slane %v4567_v45, 3  ;;  %5427 = vmatpush.bf16.msra.mxu1 %v10762_v19 }
 0x288   :  { %v13830_v26 = vpack.c.b16 %v4352_v13, %v4352_v13  ;;  %5398 = vmatpush.bf16.msrb.mxu0 %v10754_v29  ;;  %5457 = vmatpush.bf16.msra.mxu2 %v10769_v27  ;;  %v4578_v45 = vrot.slane %v4576_v56, 3  ;;  %v4463_v29 = vsel %vm4360_vm5, %v13739_v61, %v13827_v37  ;;  %v10760_v61 = vld [vmem:[%s14749_s1 + $0xa58] sm:$0xff] }
 0x289   :  { %14979 = vst [vmem:[#allocation25_spill] sm:$0xff] %v13804_v18  ;;  %v3574_v28 = vadd.f32 %v13696_v22, %v3545_v16  ;;  %v4570_v1 = vor.u32 %v4569_v20, %v4566_v31  ;;  %v10768_v16 = vld [vmem:[%s14749_s1 + $0xa98] sm:$0xff] }
 0x28a   :  { %v4558_v13 = vshll.u32 %v13830_v26, 16  ;;  %v4579_v27 = vor.u32 %v4578_v45, %v4575_v57  ;;  %v4501_v45 = vshrl.u32 %v13143_v17, 16 }
 0x28b   :  { %v13836_v63 = vadd.f32 %v3574_v28, %v13559_v58  ;;  %v4555_v58 = vshrl.u32 %v13830_v26, 16  ;;  %v4571_v34 = vsel %vm4360_vm5, %v13741_v35, %v4570_v1  ;;  %v10776_v28 = vld [vmem:[%s14749_s1 + $0xad8] sm:$0xff]  ;;  %5428 = vmatpush.bf16.msra.mxu1 %v10761_v33 }
 0x28c   :  { %5399 = vmatpush.bf16.msrb.mxu0 %v10753_v54  ;;  %v4560_v4 = vrot.slane %v4558_v13, 3  ;;  %5458 = vmatpush.bf16.msra.mxu2 %v10768_v16  ;;  %v4580_v57 = vsel %vm4360_vm5, %v13748_v52, %v4579_v27  ;;  %v10752_v1 = vld [vmem:[%s14749_s1 + $0xa18] sm:$0xff]  ;;  %v4504_v52 = vshll.u32 %v13143_v17, 16  ;;  %v10775_v54 = vld [vmem:[%s14749_s1 + $0xad0] sm:$0xff]  ;;  %v4503_v13 = vrot.slane %v4501_v45, 2 }
 0x28d   :  { %v4131_v22 = vpop.f32.mrf.mxu2  ;;  %v4557_v56 = vrot.slane %v4555_v58, 2  ;;  %5487 = vmatpush.bf16.msra.mxu3 %v10776_v28  ;;  %v10766_v58 = vld [vmem:[%s14749_s1 + $0xa88] sm:$0xff]  ;;  %v4995_v27 = vld [vmem:[%s14748_s0 + $0x1c] sm:$0x88] }
 0x28e   :  { %v4160_v19 = vpop.f32.mrf.mxu3  ;;  %v3547_v31 = vpop.f32.mrf.mxu0  ;;  %v10774_v28 = vld [vmem:[%s14749_s1 + $0xac8] sm:$0xff] }
 0x28f   :  { %v13852_v20 = vadd.f32 %v4160_v19, %v4131_v22  ;;  %v3548_v59 = vadd.f32 %v3547_v31, %v13448_v41  ;;  %v13860_v18 = vpop.f32.mrf.mxu1  ;;  %v10767_v41 = vld [vmem:[%s14749_s1 + $0xa90] sm:$0xff]  ;;  %v4561_v22 = vor.u32 %v4560_v4, %v4557_v56  ;;  %5429 = vmatpush.bf16.msra.mxu1 %v10760_v61  ;;  %v5083_v56 = vunpack.c.l.b16 %v4995_v27  ;;  %v10765_v61 = vld [vmem:[%s14749_s1 + $0xa80] sm:$0xff] }
 0x290   :  { %5400 = vmatpush.bf16.msrb.mxu0 %v10752_v1  ;;  %5459 = vmatpush.bf16.msra.mxu2 %v10767_v41  ;;  %v10758_v1 = vld [vmem:[%s14749_s1 + $0xa48] sm:$0xff] }
 0x291   :  { %v3577_v35 = vadd.f32 %v13713_v8, %v3548_v59  ;;  %4883 = vmatmul.bf16.gmra.mxu0 %v4463_v29  ;;  %5488 = vmatpush.bf16.msra.mxu3 %v10775_v54  ;;  %v10751_v8 = vld [vmem:[%s14749_s1 + $0xa10] sm:$0xff]  ;;  %v4506_v29 = vrot.slane %v4504_v52, 3  ;;  %v4351_v54 = vunpack.c.h.b16 %v13522_v21  ;;  %v10749_v21 = vld [vmem:[%s14749_s1 + $0xa00] sm:$0xff] }
 0x292   :  { %4951 = vmatmul.bf16.gmra.mxu2 %v4571_v34  ;;  %v10759_v59 = vld [vmem:[%s14749_s1 + $0xa50] sm:$0xff] }
 0x293   :  { %4980 = vmatmul.bf16.gmra.mxu3 %v4580_v57  ;;  %v13880_v33 = vadd.f32 %v3577_v35, %v13606_v39  ;;  %v4562_v39 = vsel %vm4360_vm5, %v13776_v62, %v4561_v22  ;;  %5430 = vmatpush.bf16.msra.mxu1 %v10759_v59  ;;  %v10750_v62 = vld [vmem:[%s14749_s1 + $0xa08] sm:$0xff]  ;;  %v5084_v35 = vunpack.c.h.b16 %v4995_v27  ;;  %v4507_v52 = vor.u32 %v4506_v29, %v4503_v13  ;;  %v13919_v22 = vld [vmem:[%s14748_s0 + $0x14] sm:$0x88] }
 0x294   :  { %5401 = vmatpush.bf16.msrb.mxu0 %v10751_v8  ;;  %5460 = vmatpush.bf16.msra.mxu2 %v10766_v58  ;;  %v5098_v59 = vrot.slane %v13441_v23, 3  ;;  %v14982_v58 = vunpack.c.h.b16 %v13346_v60  ;;  %v5082_v13 = vunpack.c.h.b16 %v13919_v22  ;;  %v10757_v23 = vld [vmem:[%s14749_s1 + $0xa40] sm:$0xff] }
 0x295   :  { %v4134_v16 = vpop.f32.mrf.mxu2  ;;  %5489 = vmatpush.bf16.msra.mxu3 %v10774_v28 }
 0x296   :  { %v4163_v19 = vpop.f32.mrf.mxu3  ;;  %v3549_v31 = vpop.f32.mrf.mxu0  ;;  %4922 = vmatmul.bf16.gmra.mxu1 %v4562_v39  ;;  %v5089_v39 = vpack.c.b16 %v14982_v58, %v5084_v35 }
 0x297   :  { %v13896_v34 = vadd.f32 %v4163_v19, %v4134_v16  ;;  %v3550_v4 = vadd.f32 %v3549_v31, %v13490_v50  ;;  %v13902_v57 = vpop.f32.mrf.mxu1  ;;  %v14981_v50 = vunpack.c.l.b16 %v13346_v60  ;;  %v10773_v16 = vld [vmem:[%s14749_s1 + $0xac0] sm:$0xff]  ;;  %5431 = vmatpush.bf16.msra.mxu1 %v10758_v1  ;;  %v5101_v60 = vrot.slane %v13376_v42, 3 }
 0x298   :  { %5402 = vmatpush.bf16.msrb.mxu0 %v10750_v62  ;;  %5461 = vmatpush.bf16.msra.mxu2 %v10765_v61  ;;  %v5100_v19 = vrot.slane %v5089_v39, 3 }
 0x299   :  { %v5088_v41 = vpack.c.b16 %v14981_v50, %v5083_v56  ;;  %v3579_v45 = vadd.f32 %v13732_v43, %v3550_v4  ;;  %5490 = vmatpush.bf16.msra.mxu3 %v10773_v16  ;;  %v4508_v56 = vsel %vm4360_vm5, %v13827_v37, %v4507_v52  ;;  %v13943_v4 = vpack.c.b16 %v4351_v54, %v4351_v54 }
 0x29a   :  { %v5102_v42 = vsel %vm1970_vm2, %v5100_v19, %v5101_v60  ;;  %v5095_v37 = vrot.slane %v13030_v7, 3  ;;  %v5110_v19 = vrot.slane %v13537_v5, 3 }
 0x29b   :  { %v5097_v8 = vrot.slane %v5088_v41, 3  ;;  %v13929_v43 = vadd.f32 %v3579_v45, %v13651_v32  ;;  %v14983_v32 = vunpack.c.h.b16 %v12973_v38  ;;  %5432 = vmatpush.bf16.msra.mxu1 %v10757_v23  ;;  %v4546_v45 = vshrl.u32 %v13943_v4, 16 }
 0x29c   :  { %5403 = vmatpush.bf16.msrb.mxu0 %v10749_v21  ;;  %v4549_v54 = vshll.u32 %v13943_v4, 16 }
 0x29d   :  { %v4136_v29 = vpop.f32.mrf.mxu2  ;;  %v5087_v31 = vpack.c.b16 %v14983_v32, %v5082_v13  ;;  %v5099_v1 = vsel %vm1970_vm2, %v5097_v8, %v5098_v59  ;;  %v4548_v39 = vrot.slane %v4546_v45, 2  ;;  %v5112_v32 = vrot.slane %v13418_v47, 3 }
 0x29e   :  { %v4165_v27 = vpop.f32.mrf.mxu3  ;;  %v3552_v28 = vpop.f32.mrf.mxu0  ;;  %v4551_v13 = vrot.slane %v4549_v54, 3  ;;  %v5081_v47 = vunpack.c.l.b16 %v13919_v22  ;;  %v5092_v45 = vrot.slane %v13007_v15, 3  ;;  %v5120_v54 = vrot.slane %v13629_v46, 3  ;;  %v10788_v46 = vld [vmem:[%s14749_s1 + $0xb38] sm:$0xff] }
 0x29f   :  { %v13945_v62 = vadd.f32 %v4165_v27, %v4136_v29  ;;  %v3553_v61 = vadd.f32 %v3552_v28, %v13545_v48  ;;  %v4206_v41 = vpop.f32.mrf.mxu1  ;;  %v5094_v35 = vrot.slane %v5087_v31, 3 }
 0x2a0   :  { %v4552_v23 = vor.u32 %v4551_v13, %v4548_v39  ;;  %5512 = vmatpush.bf16.msra.mxu0 %v10788_v46 }
 0x2a1   :  { %v3582_v50 = vadd.f32 %v13760_v3, %v3553_v61  ;;  %4888 = vmatmul.bf16.gmra.mxu0 %v4508_v56  ;;  %v5096_v8 = vsel %vm1970_vm2, %v5094_v35, %v5095_v37 }
 0x2a2   :  { %5462 = vmatmul.bf16.vlgmr.msra.gmra.mxu2 %v5099_v1  ;;  %v4553_v56 = vsel %vm4360_vm5, %v4507_v52, %v4552_v23  ;;  %v10787_v23 = vld [vmem:[%s14749_s1 + $0xb30] sm:$0xff] }
 0x2a3   :  { %5491 = vmatmul.bf16.vlgmr.msra.gmra.mxu3 %v5102_v42  ;;  %v13955_v16 = vadd.f32 %v3582_v50, %v13686_v49 }
 0x2a4   :  { %5513 = vmatpush.bf16.msra.mxu0 %v10787_v23 }
 0x2a5   :  { %v4235_v48 = vpop.f32.mrf.mxu2 }
 0x2a6   :  { %v13958_v58 = vpop.f32.mrf.mxu3  ;;  %v3554_v3 = vpop.f32.mrf.mxu0  ;;  %5433 = vmatmul.bf16.vlgmr.msra.gmra.mxu1 %v5096_v8 }
 0x2a7   :  { %v3555_v29 = vadd.f32 %v3554_v3, %v13592_v11  ;;  %v4208_v21 = vpop.f32.mrf.mxu1  ;;  %v5111_v11 = vsel %vm1970_vm2, %v5098_v59, %v5110_v19 }
 0x2a9   :  { %v3584_v7 = vadd.f32 %v13814_v24, %v3555_v29  ;;  %v5113_v24 = vsel %vm1970_vm2, %v5101_v60, %v5112_v32 }
 0x2ab   :  { %v13964_v49 = vadd.f32 %v3584_v7, %v13701_v51  ;;  %v5108_v51 = vrot.slane %v13091_v2, 3 }
 0x2ad   :  { %v4237_v27 = vpop.f32.mrf.mxu2  ;;  %v5109_v59 = vsel %vm1970_vm2, %v5095_v37, %v5108_v51 }
 0x2ae   :  { %v13967_v31 = vpop.f32.mrf.mxu3  ;;  %v3557_v28 = vpop.f32.mrf.mxu0 }
 0x2af   :  { %v3558_v1 = vadd.f32 %v3557_v28, %v13639_v44  ;;  %v4211_v5 = vpop.f32.mrf.mxu1 }
 0x2b1   :  { %v3587_v61 = vadd.f32 %v13860_v18, %v3558_v1  ;;  %4893 = vmatmul.bf16.gmra.mxu0 %v4553_v56  ;;  %v14984_v18 = vunpack.c.l.b16 %v12973_v38  ;;  %v5122_v38 = vrot.slane %v13478_v9, 3  ;;  %v5118_v9 = vrot.slane %v13143_v17, 3 }
 0x2b2   :  { %5467 = vmatmul.bf16.gmra.mxu2 %v5111_v11  ;;  %v5106_v11 = vrot.slane %v13081_v0, 3 }
 0x2b3   :  { %5496 = vmatmul.bf16.gmra.mxu3 %v5113_v24  ;;  %v13977_v42 = vadd.f32 %v3587_v61, %v13718_v30  ;;  %v5086_v50 = vpack.c.b16 %v14984_v18, %v5081_v47  ;;  %v5123_v13 = vsel %vm1970_vm2, %v5112_v32, %v5122_v38  ;;  %v10785_v24 = vld [vmem:[%s14749_s1 + $0xb20] sm:$0xff] }
 0x2b4   :  { %v5107_v47 = vsel %vm1970_vm2, %v5092_v45, %v5106_v11 }
 0x2b5   :  { %v13979_v52 = vpop.f32.mrf.mxu2  ;;  %v5091_v22 = vrot.slane %v5086_v50, 3 }
 0x2b6   :  { %v13982_v44 = vpop.f32.mrf.mxu3  ;;  %v3559_v60 = vpop.f32.mrf.mxu0  ;;  %5438 = vmatmul.bf16.gmra.mxu1 %v5109_v59 }
 0x2b7   :  { %v3560_v35 = vadd.f32 %v3559_v60, %v13678_v55  ;;  %v13989_v30 = vpop.f32.mrf.mxu1  ;;  %v5093_v55 = vsel %vm1970_vm2, %v5091_v22, %v5092_v45  ;;  %v10784_v60 = vld [vmem:[%s14749_s1 + $0xb18] sm:$0xff]  ;;  %v10782_v45 = vld [vmem:[%s14749_s1 + $0xb08] sm:$0xff] }
 0x2b9   :  { %v3589_v2 = vadd.f32 %v13902_v57, %v3560_v35  ;;  %v5121_v57 = vsel %vm1970_vm2, %v5110_v19, %v5120_v54  ;;  %v5119_v19 = vsel %vm1970_vm2, %v5108_v51, %v5118_v9 }
 0x2bb   :  { %v13993_v37 = vadd.f32 %v3589_v2, %v13737_v12 }
 0x2bd   :  { %v13995_v8 = vpop.f32.mrf.mxu2 }
 0x2be   :  { %v4177_v3 = vpop.f32.mrf.mxu0  ;;  %v13999_v39 = vpop.f32.mrf.mxu3 }
 0x2bf   :  { %v4178_v15 = vadd.f32 %v4177_v3, %v13690_v10  ;;  %v4216_v7 = vpop.f32.mrf.mxu1 }
 0x2c1   :  { %v4207_v12 = vadd.f32 %v4206_v41, %v4178_v15  ;;  %5404 = vmatmul.bf16.vlgmr.msrb.gmra.mxu0 %v5093_v55 }
 0x2c2   :  { %5472 = vmatmul.bf16.gmra.mxu2 %v5121_v57 }
 0x2c3   :  { %5501 = vmatmul.bf16.gmra.mxu3 %v5123_v13  ;;  %v4236_v29 = vadd.f32 %v4235_v48, %v4207_v12  ;;  %v10786_v48 = vld [vmem:[%s14749_s1 + $0xb28] sm:$0xff] }
 0x2c4   :  { %5514 = vmatpush.bf16.msra.mxu0 %v10786_v48 }
 0x2c5   :  { %v14012_v10 = vadd.f32 %v4236_v29, %v13785_v14  ;;  %v4245_v28 = vpop.f32.mrf.mxu2  ;;  %v5130_v14 = vrot.slane %v13830_v26, 3 }
 0x2c6   :  { %v4179_v32 = vpop.f32.mrf.mxu0  ;;  %5443 = vmatmul.bf16.gmra.mxu1 %v5119_v19  ;;  %v14016_v17 = vpop.f32.mrf.mxu3 }
 0x2c7   :  { %v4180_v41 = vadd.f32 %v4179_v32, %v13708_v40  ;;  %v5132_v40 = vrot.slane %v13799_v6, 3  ;;  %v4218_v59 = vpop.f32.mrf.mxu1  ;;  %v14986_v32 = vld [vmem:[#allocation14_spill] sm:$0xff] }
 0x2c8   :  { %5515 = vmatpush.bf16.msra.mxu0 %v10785_v24 }
 0x2c9   :  { %v4209_v56 = vadd.f32 %v4208_v21, %v4180_v41  ;;  %v5131_v21 = vsel %vm1970_vm2, %v5120_v54, %v5130_v14  ;;  %v5133_v26 = vsel %vm1970_vm2, %v5122_v38, %v5132_v40  ;;  %v5116_v54 = vrot.slane %v13133_v25, 3 }
 0x2ca   :  { %v5126_v41 = vrot.slane %v14986_v32, 3 }
 0x2cb   :  { %v4238_v1 = vadd.f32 %v4237_v27, %v4209_v56  ;;  %v5117_v15 = vsel %vm1970_vm2, %v5106_v11, %v5116_v54 }
 0x2cc   :  { %5516 = vmatpush.bf16.msra.mxu0 %v10784_v60 }
 0x2cd   :  { %v14028_v61 = vadd.f32 %v4238_v1, %v13836_v63  ;;  %v4247_v27 = vpop.f32.mrf.mxu2  ;;  %v5128_v63 = vrot.slane %v13943_v4, 3  ;;  %v4996_v1 = vld [vmem:[%s14748_s0 + $0x24] sm:$0x8] }
 0x2ce   :  { %v4182_v51 = vpop.f32.mrf.mxu0  ;;  %v14038_v18 = vpop.f32.mrf.mxu3  ;;  %v5085_v40 = vunpack.c.l.b16 %v4996_v1 }
 0x2cf   :  { %v4183_v0 = vadd.f32 %v4182_v51, %v13727_v53  ;;  %v10783_v53 = vld [vmem:[%s14749_s1 + $0xb10] sm:$0xff]  ;;  %v5129_v2 = vsel %vm1970_vm2, %v5118_v9, %v5128_v63  ;;  %v4221_v4 = vpop.f32.mrf.mxu1  ;;  %v14989_v63 = vld [vmem:[#allocation7_spill] sm:$0xff] }
 0x2d0   :  { %5517 = vmatpush.bf16.msra.mxu0 %v10783_v53 }
 0x2d1   :  { %v4212_v6 = vadd.f32 %v4211_v5, %v4183_v0  ;;  %5409 = vmatmul.bf16.gmra.mxu0 %v5107_v47 }
 0x2d2   :  { %5477 = vmatmul.bf16.gmra.mxu2 %v5131_v21 }
 0x2d3   :  { %5506 = vmatmul.bf16.gmra.mxu3 %v5133_v26  ;;  %v4241_v50 = vadd.f32 %v13979_v52, %v4212_v6 }
 0x2d4   :  { %5518 = vmatpush.bf16.msra.mxu0 %v10782_v45 }
 0x2d5   :  { %v14045_v35 = vadd.f32 %v4241_v50, %v13880_v33  ;;  %v4250_v38 = vpop.f32.mrf.mxu2  ;;  %v5104_v50 = vrot.slane %v14989_v63, 3 }
 0x2d6   :  { %v4184_v5 = vpop.f32.mrf.mxu0  ;;  %5448 = vmatmul.bf16.gmra.mxu1 %v5129_v2  ;;  %v14055_v3 = vpop.f32.mrf.mxu3 }
 0x2d7   :  { %v4185_v22 = vadd.f32 %v4184_v5, %v13752_v36  ;;  %v10781_v36 = vld [vmem:[%s14749_s1 + $0xb00] sm:$0xff]  ;;  %v4223_v46 = vpop.f32.mrf.mxu1 }
 0x2d8   :  { %5519 = vmatpush.bf16.msra.mxu0 %v10781_v36 }
 0x2d9   :  { %v4214_v52 = vadd.f32 %v13989_v30, %v4185_v22  ;;  %v14985_v30 = vld [vmem:[#allocation25_spill] sm:$0xff] }
 0x2db   :  { %v4243_v33 = vadd.f32 %v13995_v8, %v4214_v52 }
 0x2dd   :  { %v14061_v55 = vadd.f32 %v4243_v33, %v13929_v43  ;;  %v4252_v8 = vpop.f32.mrf.mxu2 }
 0x2de   :  { %v4187_v57 = vpop.f32.mrf.mxu0  ;;  %v14068_v23 = vpop.f32.mrf.mxu3 }
 0x2df   :  { %v4188_v13 = vadd.f32 %v4187_v57, %v14985_v30  ;;  %v14990_v30 = vld [vmem:[#allocation10_spill] sm:$0xff] }
 0x2e1   :  { %v4217_v25 = vadd.f32 %v4216_v7, %v4188_v13  ;;  %5414 = vmatmul.bf16.gmra.mxu0 %v5117_v15  ;;  %v5114_v13 = vrot.slane %v14990_v30, 3 }
 0x2e3   :  { %v4246_v12 = vadd.f32 %v4245_v28, %v4217_v25  ;;  %v4908_v56 = vpop.f32.mrf.mxu1  ;;  %v5127_v28 = vsel %vm1970_vm2, %v5116_v54, %v5126_v41 }
 0x2e5   :  { %v14066_v9 = vadd.f32 %v4246_v12, %v13955_v16  ;;  %v4937_v14 = vpop.f32.mrf.mxu2 }
 0x2e6   :  { %v4189_v29 = vpop.f32.mrf.mxu0  ;;  %v4966_v24 = vpop.f32.mrf.mxu3 }
 0x2e7   :  { %v4190_v43 = vadd.f32 %v4189_v29, %v13852_v20  ;;  %v5115_v29 = vsel %vm1970_vm2, %v5104_v50, %v5114_v13 }
 0x2e9   :  { %v4219_v19 = vadd.f32 %v4218_v59, %v4190_v43  ;;  %v14987_v59 = vld [vmem:[#allocation6_spill] sm:$0xff] }
 0x2ea   :  { %v14988_v21 = vunpack.c.l.b16 %v14987_v59 }
 0x2eb   :  { %v4248_v48 = vadd.f32 %v4247_v27, %v4219_v19  ;;  %v4910_v26 = vpop.f32.mrf.mxu1 }
 0x2ec   :  { %v5090_v0 = vpack.c.b16 %v14988_v21, %v5085_v40 }
 0x2ed   :  { %v14073_v11 = vadd.f32 %v4248_v48, %v13964_v49 }
 0x2ee   :  { %v4192_v7 = vpop.f32.mrf.mxu0  ;;  %v5103_v6 = vrot.slane %v5090_v0, 3  ;;  %v4968_v53 = vpop.f32.mrf.mxu3 }
 0x2ef   :  { %v4193_v16 = vadd.f32 %v4192_v7, %v13896_v34  ;;  %v4939_v34 = vpop.f32.mrf.mxu2 }
 0x2f1   :  { %v4222_v20 = vadd.f32 %v4221_v4, %v4193_v16  ;;  %5419 = vmatmul.bf16.gmra.mxu0 %v5127_v28 }
 0x2f3   :  { %v4251_v51 = vadd.f32 %v4250_v38, %v4222_v20  ;;  %v4913_v45 = vpop.f32.mrf.mxu1 }
 0x2f5   :  { %v14081_v47 = vadd.f32 %v4251_v51, %v13977_v42  ;;  %v5105_v42 = vsel %vm1970_vm2, %v5103_v6, %v5104_v50 }
 0x2f6   :  { %v4194_v49 = vpop.f32.mrf.mxu0  ;;  %v4971_v38 = vpop.f32.mrf.mxu3 }
 0x2f7   :  { %v4195_v27 = vadd.f32 %v4194_v49, %v13945_v62  ;;  %v4942_v54 = vpop.f32.mrf.mxu2 }
 0x2f9   :  { %v4224_v60 = vadd.f32 %v4223_v46, %v4195_v27 }
 0x2fb   :  { %v4253_v2 = vadd.f32 %v4252_v8, %v4224_v60  ;;  %v4915_v25 = vpop.f32.mrf.mxu1 }
 0x2fd   :  { %v14088_v5 = vadd.f32 %v4253_v2, %v13993_v37  ;;  %v14992_v2 = vld [vmem:[#allocation13_spill] sm:$0xff] }
 0x2fe   :  { %v4879_v22 = vpop.f32.mrf.mxu0  ;;  %v4973_v43 = vpop.f32.mrf.mxu3 }
 0x2ff   :  { %v4880_v4 = vadd.f32 %v4879_v22, %v13958_v58  ;;  %v4944_v12 = vpop.f32.mrf.mxu2 }
 0x301   :  { %v4909_v52 = vadd.f32 %v4908_v56, %v4880_v4  ;;  %5520 = vmatmul.bf16.vlgmr.msra.gmra.mxu0 %v5105_v42 }
 0x303   :  { %v4938_v62 = vadd.f32 %v4937_v14, %v4909_v52 }
 0x305   :  { %v4967_v33 = vadd.f32 %v4966_v24, %v4938_v62  ;;  %v14991_v24 = vld [vmem:[#allocation8_spill] sm:$0xff] }
 0x306   :  { %v4881_v36 = vpop.f32.mrf.mxu0  ;;  %v4976_v16 = vpop.f32.mrf.mxu3  ;;  %v5124_v20 = vrot.slane %v14991_v24, 3 }
 0x307   :  { %v14093_v57 = vadd.f32 %v4967_v33, %v14012_v10  ;;  %v4882_v15 = vadd.f32 %v4881_v36, %v13967_v31  ;;  %v4918_v31 = vpop.f32.mrf.mxu1  ;;  %v4947_v7 = vpop.f32.mrf.mxu2 }
 0x309   :  { %v4911_v37 = vadd.f32 %v4910_v26, %v4882_v15 }
 0x30b   :  { %v4940_v46 = vadd.f32 %v4939_v34, %v4911_v37 }
 0x30d   :  { %v4969_v58 = vadd.f32 %v4968_v53, %v4940_v46 }
 0x30e   :  { %v4884_v8 = vpop.f32.mrf.mxu0  ;;  %v4978_v26 = vpop.f32.mrf.mxu3 }
 0x30f   :  { %v14099_v19 = vadd.f32 %v4969_v58, %v14028_v61  ;;  %v4885_v32 = vadd.f32 %v4884_v8, %v13982_v44  ;;  %v5125_v44 = vsel %vm1970_vm2, %v5114_v13, %v5124_v20  ;;  %v4920_v49 = vpop.f32.mrf.mxu1  ;;  %v4949_v0 = vpop.f32.mrf.mxu2 }
 0x311   :  { %v4914_v10 = vadd.f32 %v4913_v45, %v4885_v32  ;;  %5525 = vmatmul.bf16.gmra.mxu0 %v5115_v29 }
 0x313   :  { %v4943_v41 = vadd.f32 %v4942_v54, %v4914_v10 }
 0x315   :  { %v4972_v48 = vadd.f32 %v4971_v38, %v4943_v41 }
 0x316   :  { %v4886_v56 = vpop.f32.mrf.mxu0  ;;  %v4981_v42 = vpop.f32.mrf.mxu3 }
 0x317   :  { %v14103_v28 = vadd.f32 %v4972_v48, %v14045_v35  ;;  %v4887_v14 = vadd.f32 %v4886_v56, %v13999_v39  ;;  %v4923_v63 = vpop.f32.mrf.mxu1  ;;  %v4952_v53 = vpop.f32.mrf.mxu2 }
 0x319   :  { %v4916_v1 = vadd.f32 %v4915_v25, %v4887_v14 }
 0x31b   :  { %v4945_v61 = vadd.f32 %v4944_v12, %v4916_v1 }
 0x31d   :  { %v4974_v40 = vadd.f32 %v4973_v43, %v4945_v61 }
 0x31e   :  { %v4889_v51 = vpop.f32.mrf.mxu0  ;;  %v4983_v15 = vpop.f32.mrf.mxu3 }
 0x31f   :  { %v14109_v59 = vadd.f32 %v4974_v40, %v14061_v55  ;;  %v4890_v21 = vadd.f32 %v4889_v51, %v14016_v17  ;;  %v5134_v55 = vrot.slane %v14992_v2, 3  ;;  %v4925_v62 = vpop.f32.mrf.mxu1  ;;  %v4954_v38 = vpop.f32.mrf.mxu2 }
 0x321   :  { %v4919_v35 = vadd.f32 %v4918_v31, %v4890_v21  ;;  %5530 = vmatmul.bf16.gmra.mxu0 %v5125_v44  ;;  %v5135_v45 = vsel %vm1970_vm2, %v5124_v20, %v5134_v55 }
 0x323   :  { %v4948_v39 = vadd.f32 %v4947_v7, %v4919_v35 }
 0x325   :  { %v4977_v27 = vadd.f32 %v4976_v16, %v4948_v39 }
 0x326   :  { %v4891_v34 = vpop.f32.mrf.mxu0  ;;  %v5492_v29 = vpop.f32.mrf.mxu3 }
 0x327   :  { %v14113_v60 = vadd.f32 %v4977_v27, %v14066_v9  ;;  %v4892_v6 = vadd.f32 %v4891_v34, %v14038_v18  ;;  %v5434_v46 = vpop.f32.mrf.mxu1  ;;  %v5463_v58 = vpop.f32.mrf.mxu2 }
 0x329   :  { %v4921_v50 = vadd.f32 %v4920_v49, %v4892_v6 }
 0x32b   :  { %v4950_v22 = vadd.f32 %v4949_v0, %v4921_v50 }
 0x32d   :  { %v4979_v17 = vadd.f32 %v4978_v26, %v4950_v22 }
 0x32e   :  { %v4894_v4 = vpop.f32.mrf.mxu0  ;;  %v5494_v14 = vpop.f32.mrf.mxu3 }
 0x32f   :  { %v14119_v52 = vadd.f32 %v4979_v17, %v14073_v11  ;;  %v4895_v54 = vadd.f32 %v4894_v4, %v14055_v3  ;;  %v5436_v56 = vpop.f32.mrf.mxu1  ;;  %v5465_v7 = vpop.f32.mrf.mxu2 }
 0x331   :  { %v4924_v9 = vadd.f32 %v4923_v63, %v4895_v54  ;;  %5535 = vmatmul.bf16.gmra.mxu0 %v5135_v45 }
 0x333   :  { %v4953_v18 = vadd.f32 %v4952_v53, %v4924_v9 }
 0x335   :  { %v4982_v33 = vadd.f32 %v4981_v42, %v4953_v18 }
 0x336   :  { %v4896_v36 = vpop.f32.mrf.mxu0  ;;  %v5497_v40 = vpop.f32.mrf.mxu3 }
 0x337   :  { %v14123_v37 = vadd.f32 %v4982_v33, %v14081_v47  ;;  %v4897_v30 = vadd.f32 %v4896_v36, %v14068_v23  ;;  %v5439_v1 = vpop.f32.mrf.mxu1  ;;  %v5468_v24 = vpop.f32.mrf.mxu2 }
 0x339   :  { %v4926_v13 = vadd.f32 %v4925_v62, %v4897_v30 }
 0x33b   :  { %v4955_v25 = vadd.f32 %v4954_v38, %v4926_v13 }
 0x33d   :  { %v4984_v11 = vadd.f32 %v4983_v15, %v4955_v25 }
 0x33e   :  { %v5405_v12 = vpop.f32.mrf.mxu0  ;;  %v5499_v6 = vpop.f32.mrf.mxu3 }
 0x33f   :  { %v14127_v3 = vadd.f32 %v4984_v11, %v14088_v5  ;;  %v5435_v8 = vadd.f32 %v5434_v46, %v5405_v12  ;;  %v5441_v49 = vpop.f32.mrf.mxu1  ;;  %v5470_v35 = vpop.f32.mrf.mxu2 }
 0x341   :  { %v5464_v43 = vadd.f32 %v5463_v58, %v5435_v8 }
 0x343   :  { %v5493_v32 = vadd.f32 %v5492_v29, %v5464_v43 }
 0x346   :  { %v5407_v10 = vpop.f32.mrf.mxu0 }
 0x347   :  { %v5437_v20 = vadd.f32 %v5436_v56, %v5407_v10  ;;  %v5444_v63 = vpop.f32.mrf.mxu1  ;;  %v5473_v55 = vpop.f32.mrf.mxu2 }
 0x349   :  { %v5466_v51 = vadd.f32 %v5465_v7, %v5437_v20 }
 0x34b   :  { %v5495_v21 = vadd.f32 %v5494_v14, %v5466_v51 }
 0x34e   :  { %v5410_v41 = vpop.f32.mrf.mxu0 }
 0x34f   :  { %v5440_v0 = vadd.f32 %v5439_v1, %v5410_v41  ;;  %v5446_v17 = vpop.f32.mrf.mxu1  ;;  %v5475_v54 = vpop.f32.mrf.mxu2 }
 0x351   :  { %v5469_v27 = vadd.f32 %v5468_v24, %v5440_v0  ;;  %v9882_v0 = vld [vmem:[%s14752_s4 + $0xe0] sm:$0xf0] }
 0x353   :  { %v5498_v50 = vadd.f32 %v5497_v40, %v5469_v27  ;;  %v10814_v27 = vld [vmem:[%s14752_s4 + $0xcc] sm:$0xf] }
 0x356   :  { %v5412_v31 = vpop.f32.mrf.mxu0 }
 0x357   :  { %v5449_v38 = vpop.f32.mrf.mxu1  ;;  %v5478_v36 = vpop.f32.mrf.mxu2 }
 0x35e   :  { %v5415_v47 = vpop.f32.mrf.mxu0 }
 0x35f   :  { %v5445_v42 = vadd.f32 %v5444_v63, %v5415_v47  ;;  %v5480_v58 = vpop.f32.mrf.mxu2  ;;  %v5442_v47 = vadd.f32 %v5441_v49, %v5412_v31 }
 0x361   :  { %v5474_v45 = vadd.f32 %v5473_v55, %v5445_v42  ;;  %v5471_v1 = vadd.f32 %v5470_v35, %v5442_v47  ;;  %v9850_v35 = vld [vmem:[%s14752_s4 + $0xa0] sm:$0xf0] }
 0x362   :  { %v9818_v55 = vld [vmem:[%s14752_s4 + $0x60] sm:$0xf0] }
 0x366   :  { %v5417_v48 = vpop.f32.mrf.mxu0 }
 0x367   :  { %v5447_v46 = vadd.f32 %v5446_v17, %v5417_v48  ;;  %v10967_v48 = vld [vmem:[%s14750_s2] ss:$0 sm:$0xff] }
 0x369   :  { %v5476_v43 = vadd.f32 %v5475_v54, %v5447_v46  ;;  %v5577_v46 = vld [vmem:[%s14751_s3] sm:$0xff] }
 0x36e   :  { %v5420_v23 = vpop.f32.mrf.mxu0 }
 0x36f   :  { %v5450_v15 = vadd.f32 %v5449_v38, %v5420_v23 }
 0x371   :  { %v5479_v25 = vadd.f32 %v5478_v36, %v5450_v15 }
 0x376   :  { %v5422_v16 = vpop.f32.mrf.mxu0 }
 0x37e   :  { %v5521_v61 = vpop.f32.mrf.mxu0 }
 0x37f   :  { %v5522_v5 = vadd.f32 %v5521_v61, %v5493_v32 }
 0x381   :  { %v14130_v44 = vadd.f32 %v5522_v5, %v14093_v57  ;;  %v5502_v57 = vpop.f32.mrf.mxu3  ;;  %v5500_v5 = vadd.f32 %v5499_v6, %v5471_v1  ;;  %v9890_v6 = vld [vmem:[%s14752_s4 + $0xe8] sm:$0xf0] }
 0x382   :  { %v5503_v9 = vadd.f32 %v5502_v57, %v5474_v45  ;;  %v10790_v1 = vld [vmem:[%s14752_s4 + $0xc] sm:$0xf] }
 0x383   :  { %v5553_v38 = vadd.f32 %v10967_v48, %v14130_v44  ;;  %v9848_v44 = vld [vmem:[%s14752_s4 + $0x80] sm:$0xf] }
 0x385   :  { %v5561_v15 = vmax.f32 %v5553_v38, 0.0  ;;  %v9808_v38 = vld [vmem:[%s14752_s4 + $0x18] sm:$0xf] }
 0x386   :  { %v5523_v26 = vpop.f32.mrf.mxu0 }
 0x387   :  { %v5524_v39 = vadd.f32 %v5523_v26, %v5495_v21  ;;  %v10813_v21 = vld [vmem:[%s14752_s4 + $0xc4] sm:$0xf] }
 0x389   :  { %v14133_v34 = vadd.f32 %v5524_v39, %v14099_v19  ;;  %v5504_v62 = vpop.f32.mrf.mxu3 }
 0x38a   :  { %v5505_v56 = vadd.f32 %v5504_v62, %v5476_v43  ;;  %v9858_v43 = vld [vmem:[%s14752_s4 + $0xa8] sm:$0xf0] }
 0x38b   :  { %v5554_v62 = vadd.f32 %v10967_v48, %v14133_v34  ;;  %v10817_v34 = vld [vmem:[%s14752_s4 + $0xdc] sm:$0xf0] }
 0x38e   :  { %v5526_v53 = vpop.f32.mrf.mxu0 }
 0x38f   :  { %v5527_v2 = vadd.f32 %v5526_v53, %v5498_v50 }
 0x391   :  { %v14136_v22 = vadd.f32 %v5527_v2, %v14103_v28  ;;  %v5507_v13 = vpop.f32.mrf.mxu3  ;;  %v5451_v28 = vpop.f32.mrf.mxu1  ;;  %v9893_v2 = vor.u32 %v10814_v27, %v9890_v6  ;;  %v9824_v27 = vld [vmem:[%s14752_s4 + $0x48] sm:$0xf] }
 0x392   :  { %v5508_v11 = vadd.f32 %v5507_v13, %v5479_v25  ;;  %v5452_v12 = vadd.f32 %v5451_v28, %v5422_v16  ;;  %v5569_v25 = vmin.f32 %v5561_v15, 6.0  ;;  %v10809_v28 = vld [vmem:[%s14752_s4 + $0x9c] sm:$0xf0]  ;;  %v10802_v6 = vld [vmem:[%s14752_s4 + $0x64] sm:$0xf0] }
 0x393   :  { %5865 = vmatpush.bf16.msrb.mxu2 %v9893_v2  ;;  %v5555_v45 = vadd.f32 %v10967_v48, %v14136_v22  ;;  %v9880_v22 = vld [vmem:[%s14752_s4 + $0xc0] sm:$0xf]  ;;  %v10812_v2 = vld [vmem:[%s14752_s4 + $0xb4] sm:$0xf0]  ;;  %v10815_v15 = vld [vmem:[%s14752_s4 + $0xd4] sm:$0xf] }
 0x394   :  { %v5481_v32 = vadd.f32 %v5480_v58, %v5452_v12  ;;  %v9881_v13 = vor.u32 %v10817_v34, %v9880_v22  ;;  %v9816_v12 = vld [vmem:[%s14752_s4 + $0x40] sm:$0xf]  ;;  %v10816_v22 = vld [vmem:[%s14752_s4 + $0xdc] sm:$0xf] }
 0x395   :  { %v10801_v58 = vld [vmem:[%s14752_s4 + $0x5c] sm:$0xf0]  ;;  %v9906_v34 = vld [vmem:[%s14752_s4 + $0xf8] sm:$0xf0] }
 0x396   :  { %v5528_v4 = vpop.f32.mrf.mxu0 }
 0x397   :  { %v5529_v40 = vadd.f32 %v5528_v4, %v5500_v5  ;;  %v9896_v5 = vld [vmem:[%s14752_s4 + $0xd0] sm:$0xf] }
 0x399   :  { %v5509_v41 = vpop.f32.mrf.mxu3  ;;  %v5544_v26 = vadd.f32 %v5529_v40, %v14109_v59  ;;  %v10797_v59 = vld [vmem:[%s14752_s4 + $0x44] sm:$0xf]  ;;  %v10819_v40 = vld [vmem:[%s14752_s4 + $0xec] sm:$0xf0] }
 0x39a   :  { %v9821_v4 = vor.u32 %v10797_v59, %v9818_v55  ;;  %v9825_v59 = vor.u32 %v10802_v6, %v9824_v27 }
 0x39b   :  { %v5556_v57 = vadd.f32 %v10967_v48, %v5544_v26  ;;  %v10811_v26 = vld [vmem:[%s14752_s4 + $0xac] sm:$0xf0] }
 0x39d   :  { %v5564_v54 = vmax.f32 %v5556_v57, 0.0 }
 0x39e   :  { %v5531_v18 = vpop.f32.mrf.mxu0 }
 0x39f   :  { %v5532_v19 = vadd.f32 %v5531_v18, %v5503_v9  ;;  %v5563_v18 = vmax.f32 %v5555_v45, 0.0  ;;  %v10795_v45 = vld [vmem:[%s14752_s4 + $0x2c] sm:$0xf0] }
 0x3a1   :  { %v5545_v33 = vadd.f32 %v5532_v19, %v14113_v60  ;;  %v5510_v60 = vadd.f32 %v5509_v41, %v5481_v32  ;;  %v5572_v19 = vmin.f32 %v5564_v54, 6.0  ;;  %v5571_v36 = vmin.f32 %v5563_v18, 6.0  ;;  %v9826_v41 = vld [vmem:[%s14752_s4 + $0x68] sm:$0xf0]  ;;  %v9840_v54 = vld [vmem:[%s14752_s4 + $0x58] sm:$0xf] }
 0x3a3   :  { %v5557_v39 = vadd.f32 %v10967_v48, %v5545_v33  ;;  %v5562_v33 = vmax.f32 %v5554_v62, 0.0 }
 0x3a5   :  { %v5565_v42 = vmax.f32 %v5557_v39, 0.0 }
 0x3a6   :  { %v5533_v30 = vpop.f32.mrf.mxu0 }
 0x3a7   :  { %v5534_v23 = vadd.f32 %v5533_v30, %v5505_v56  ;;  %v5573_v9 = vmin.f32 %v5565_v42, 6.0  ;;  %v5570_v30 = vmin.f32 %v5562_v33, 6.0  ;;  %v9784_v56 = vld [vmem:[%s14752_s4] sm:$0xf]  ;;  %v9792_v42 = vld [vmem:[%s14752_s4 + $0x8] sm:$0xf] }
 0x3a8   :  { %v10796_v33 = vld [vmem:[%s14752_s4 + $0x34] sm:$0xf0] }
 0x3a9   :  { %v5546_v24 = vadd.f32 %v5534_v23, %v14119_v52  ;;  %v9885_v52 = vor.u32 %v10813_v21, %v9882_v0  ;;  %v9856_v21 = vld [vmem:[%s14752_s4 + $0x88] sm:$0xf] }
 0x3aa   :  { %v10810_v0 = vld [vmem:[%s14752_s4 + $0xa4] sm:$0xf0] }
 0x3ab   :  { %v5558_v31 = vadd.f32 %v10967_v48, %v5546_v24  ;;  %5839 = vmatpush.bf16.msrb.mxu3 %v9885_v52  ;;  %v9864_v52 = vld [vmem:[%s14752_s4 + $0x90] sm:$0xf] }
 0x3ac   :  { %v9865_v39 = vor.u32 %v10811_v26, %v9864_v52 }
 0x3ad   :  { %v5566_v63 = vmax.f32 %v5558_v31, 0.0  ;;  %v9904_v31 = vld [vmem:[%s14752_s4 + $0xd8] sm:$0xf] }
 0x3ae   :  { %v5536_v8 = vpop.f32.mrf.mxu0 }
 0x3af   :  { %v5537_v29 = vadd.f32 %v5536_v8, %v5508_v11  ;;  %v5574_v17 = vmin.f32 %v5566_v63, 6.0  ;;  %v9849_v11 = vor.u32 %v10809_v28, %v9848_v44  ;;  %v9817_v8 = vor.u32 %v10801_v58, %v9816_v12  ;;  %v9832_v63 = vld [vmem:[%s14752_s4 + $0x50] sm:$0xf]  ;;  %v10808_v12 = vld [vmem:[%s14752_s4 + $0x9c] sm:$0xf] }
 0x3b0   :  { %v9909_v28 = vor.u32 %v10816_v22, %v9906_v34  ;;  %v9874_v58 = vld [vmem:[%s14752_s4 + $0xb8] sm:$0xf0]  ;;  %v10823_v34 = vld [vmem:[%s14753_s5 + $0x10] sm:$0xff] }
 0x3b1   :  { %v5547_v10 = vadd.f32 %v5537_v29, %v14123_v37  ;;  %v10806_v29 = vld [vmem:[%s14752_s4 + $0x8c] sm:$0xf]  ;;  %v10896_v22 = vld [vmem:[%s14753_s5 + $0x258] sm:$0xff] }
 0x3b2   :  { %v9861_v32 = vor.u32 %v10806_v29, %v9858_v43  ;;  %v9877_v29 = vor.u32 %v10808_v12, %v9874_v58  ;;  %v10799_v43 = vld [vmem:[%s14752_s4 + $0x54] sm:$0xf]  ;;  %v10898_v12 = vld [vmem:[%s14753_s5 + $0x268] sm:$0xff]  ;;  %v10825_v58 = vld [vmem:[%s14753_s5 + $0x20] sm:$0xff] }
 0x3b3   :  { %v5559_v20 = vadd.f32 %v10967_v48, %v5547_v10  ;;  %v10798_v10 = vld [vmem:[%s14752_s4 + $0x4c] sm:$0xf] }
 0x3b4   :  { %5866 = vmatpush.bf16.msrb.mxu2 %v9861_v32  ;;  %v9829_v47 = vor.u32 %v10798_v10, %v9826_v41  ;;  %v9834_v32 = vld [vmem:[%s14752_s4 + $0x70] sm:$0xf0]  ;;  %v10800_v10 = vld [vmem:[%s14752_s4 + $0x5c] sm:$0xf] }
 0x3b5   :  { %v5567_v51 = vmax.f32 %v5559_v20, 0.0  ;;  %v9888_v20 = vld [vmem:[%s14752_s4 + $0xc8] sm:$0xf]  ;;  %v9842_v41 = vld [vmem:[%s14752_s4 + $0x78] sm:$0xf0] }
 0x3b6   :  { %v5538_v7 = vpop.f32.mrf.mxu0 }
 0x3b7   :  { %v5539_v14 = vadd.f32 %v5538_v7, %v5510_v60  ;;  %v5575_v50 = vmin.f32 %v5567_v51, 6.0  ;;  %v10793_v60 = vld [vmem:[%s14752_s4 + $0x1c] sm:$0xf0]  ;;  %v10789_v7 = vld [vmem:[%s14752_s4 + $0x4] sm:$0xf] }
 0x3b8   :  { %5867 = vmatpush.bf16.msrb.mxu2 %v9829_v47  ;;  %v9785_v23 = vor.u32 %v10793_v60, %v9784_v56  ;;  %v10820_v51 = vld [vmem:[%s14752_s4 + $0xf4] sm:$0xf0]  ;;  %v9837_v47 = vor.u32 %v10799_v43, %v9834_v32  ;;  %v9845_v56 = vor.u32 %v10800_v10, %v9842_v41  ;;  %v10791_v60 = vld [vmem:[%s14752_s4 + $0x14] sm:$0xf]  ;;  %v10826_v32 = vld [vmem:[%s14753_s5 + $0x28] sm:$0xff] }
 0x3b9   :  { %v5548_v16 = vadd.f32 %v5539_v14, %v14127_v3  ;;  %v10805_v3 = vld [vmem:[%s14752_s4 + $0x84] sm:$0xf]  ;;  %v10899_v43 = vld [vmem:[%s14753_s5 + $0x270] sm:$0xff]  ;;  %v10850_v10 = vld [vmem:[%s14753_s5 + $0xe8] sm:$0xff] }
 0x3ba   :  { %v9853_v53 = vor.u32 %v10805_v3, %v9850_v35  ;;  %v9786_v14 = vld [vmem:[%s14752_s4 + $0x20] sm:$0xf0]  ;;  %v9905_v3 = vor.u32 %v10820_v51, %v9904_v31  ;;  %v9857_v35 = vor.u32 %v10810_v0, %v9856_v21  ;;  %v10875_v41 = vld [vmem:[%s14753_s5 + $0x1b0] sm:$0xff] }
 0x3bb   :  { %v5560_v61 = vadd.f32 %v10967_v48, %v5548_v16  ;;  %v9794_v48 = vld [vmem:[%s14752_s4 + $0x28] sm:$0xf0]  ;;  %v9789_v16 = vor.u32 %v10789_v7, %v9786_v14  ;;  %v9802_v7 = vld [vmem:[%s14752_s4 + $0x30] sm:$0xf0]  ;;  %v9810_v14 = vld [vmem:[%s14752_s4 + $0x38] sm:$0xf0] }
 0x3bc   :  { %5840 = vmatpush.bf16.msrb.mxu3 %v9853_v53  ;;  %v9797_v24 = vor.u32 %v10790_v1, %v9794_v48  ;;  %v9872_v53 = vld [vmem:[%s14752_s4 + $0x98] sm:$0xf]  ;;  %v9805_v1 = vor.u32 %v10791_v60, %v9802_v7  ;;  %v10827_v60 = vld [vmem:[%s14753_s5 + $0x30] sm:$0xff] }
 0x3bd   :  { %v5568_v37 = vmax.f32 %v5560_v61, 0.0  ;;  %v10818_v61 = vld [vmem:[%s14752_s4 + $0xe4] sm:$0xf0]  ;;  %v9873_v55 = vor.u32 %v10812_v2, %v9872_v53 }
 0x3be   :  { %5868 = vmatpush.bf16.msrb.mxu2 %v9797_v24 }
 0x3bf   :  { %v5576_v49 = vmin.f32 %v5568_v37, 6.0  ;;  %v9889_v37 = vor.u32 %v10818_v61, %v9888_v20 }
 0x3c0   :  { %5841 = vmatpush.bf16.msrb.mxu3 %v9821_v4  ;;  %v9800_v4 = vld [vmem:[%s14752_s4 + $0x10] sm:$0xf] }
 0x3c1   :  { %9773 = vmatpush.xpose.msk.msrb.mxu1 %vm5578_vm6, %v5576_v49  ;;  %v9897_v49 = vor.u32 %v10819_v40, %v9896_v5 }
 0x3c2   :  { %5904 = vmatpush.bf16.msra.mxu2 %v9905_v3 }
 0x3c4   :  { %5842 = vmatpush.bf16.msrb.mxu3 %v9789_v16 }
 0x3c5   :  { %9774 = vmatpush.xpose.msk.msrb.mxu1 %vm5578_vm6, %v5575_v50  ;;  %v10803_v50 = vld [vmem:[%s14752_s4 + $0x6c] sm:$0xf0] }
 0x3c6   :  { %v9833_v57 = vor.u32 %v10803_v50, %v9832_v63  ;;  %5905 = vmatpush.bf16.msra.mxu2 %v9873_v55  ;;  %v10842_v55 = vld [vmem:[%s14753_s5 + $0xa8] sm:$0xff] }
 0x3c8   :  { %5878 = vmatpush.bf16.msra.mxu3 %v9897_v49 }
 0x3c9   :  { %9775 = vmatpush.xpose.msk.msrb.mxu1 %vm5578_vm6, %v5574_v17  ;;  %v10794_v17 = vld [vmem:[%s14752_s4 + $0x24] sm:$0xf0] }
 0x3ca   :  { %v9793_v18 = vor.u32 %v10794_v17, %v9792_v42  ;;  %v10892_v42 = vld [vmem:[%s14753_s5 + $0x238] sm:$0xff]  ;;  %v10843_v17 = vld [vmem:[%s14753_s5 + $0xb0] sm:$0xff] }
 0x3cc   :  { %5879 = vmatpush.bf16.msra.mxu3 %v9865_v39 }
 0x3cd   :  { %9776 = vmatpush.xpose.msk.msrb.mxu1 %vm5578_vm6, %v5573_v9  ;;  %v10804_v9 = vld [vmem:[%s14752_s4 + $0x74] sm:$0xf0] }
 0x3ce   :  { %v9841_v62 = vor.u32 %v10804_v9, %v9840_v54  ;;  %v10844_v54 = vld [vmem:[%s14753_s5 + $0xb8] sm:$0xff]  ;;  %v10869_v9 = vld [vmem:[%s14753_s5 + $0x180] sm:$0xff] }
 0x3d0   :  { %5880 = vmatpush.bf16.msra.mxu3 %v9833_v57  ;;  %5906 = vmatpush.bf16.msra.mxu2 %v9841_v62  ;;  %v10867_v57 = vld [vmem:[%s14753_s5 + $0x170] sm:$0xff]  ;;  %v10894_v62 = vld [vmem:[%s14753_s5 + $0x248] sm:$0xff] }
 0x3d1   :  { %9777 = vmatpush.xpose.msk.msrb.mxu1 %vm5578_vm6, %v5572_v19  ;;  %v9801_v19 = vor.u32 %v10795_v45, %v9800_v4  ;;  %v10868_v4 = vld [vmem:[%s14753_s5 + $0x178] sm:$0xff]  ;;  %v10893_v45 = vld [vmem:[%s14753_s5 + $0x240] sm:$0xff] }
 0x3d4   :  { %5881 = vmatpush.bf16.msra.mxu3 %v9801_v19  ;;  %v10845_v19 = vld [vmem:[%s14753_s5 + $0xc0] sm:$0xff] }
 0x3d5   :  { %9778 = vmatpush.xpose.msk.msrb.mxu1 %vm5578_vm6, %v5571_v36  ;;  %v9809_v36 = vor.u32 %v10796_v33, %v9808_v38  ;;  %v10870_v38 = vld [vmem:[%s14753_s5 + $0x188] sm:$0xff]  ;;  %v10895_v33 = vld [vmem:[%s14753_s5 + $0x250] sm:$0xff] }
 0x3d7   :  { %5907 = vmatpush.bf16.msra.mxu2 %v9809_v36  ;;  %v10822_v36 = vld [vmem:[%s14753_s5 + $0x8] sm:$0xff] }
 0x3d9   :  { %9779 = vmatpush.xpose.msk.msrb.mxu1 %vm5578_vm6, %v5570_v30  ;;  %v9898_v30 = vld [vmem:[%s14752_s4 + $0xf0] sm:$0xf0] }
 0x3dd   :  { %9780 = vmatpush.xpose.msk.msrb.mxu1 %vm5578_vm6, %v5569_v25  ;;  %v9901_v25 = vor.u32 %v10815_v15, %v9898_v30  ;;  %v10846_v15 = vld [vmem:[%s14753_s5 + $0xc8] sm:$0xff]  ;;  %v10871_v30 = vld [vmem:[%s14753_s5 + $0x190] sm:$0xff] }
 0x3e0   :  { %9781 = vmatmul.msk.f32.vlgmr.msrb.gmra.mxu1 %vm5578_vm6, %v5577_v46  ;;  %v10807_v46 = vld [vmem:[%s14752_s4 + $0x94] sm:$0xf] }
 0x3e1   :  { %5826 = vmatpush.bf16.msra.mxu1 %v9881_v13 }
 0x3e5   :  { %5827 = vmatpush.bf16.msra.mxu1 %v9849_v11  ;;  %v9866_v11 = vld [vmem:[%s14752_s4 + $0xb0] sm:$0xf0] }
 0x3e9   :  { %5828 = vmatpush.bf16.msra.mxu1 %v9817_v8  ;;  %v9869_v8 = vor.u32 %v10807_v46, %v9866_v11  ;;  %v10848_v46 = vld [vmem:[%s14753_s5 + $0xd8] sm:$0xff]  ;;  %v10873_v11 = vld [vmem:[%s14753_s5 + $0x1a0] sm:$0xff] }
 0x3ed   :  { %5829 = vmatpush.bf16.msra.mxu1 %v9785_v23  ;;  %v10792_v23 = vld [vmem:[%s14752_s4 + $0x1c] sm:$0xf] }
 0x3ee   :  { %v9813_v48 = vor.u32 %v10792_v23, %v9810_v14 }
 0x3f1   :  { %5852 = vmatpush.bf16.msrb.mxu1 %v9889_v37 }
 0x3f5   :  { %5853 = vmatpush.bf16.msrb.mxu1 %v9857_v35 }
 0x3f9   :  { %5854 = vmatpush.bf16.msrb.mxu1 %v9825_v59 }
 0x3fd   :  { %5855 = vmatpush.bf16.msrb.mxu1 %v9793_v18  ;;  %v10821_v18 = vld [vmem:[%s14753_s5] sm:$0xff] }
 0x45d   :  { %v5623_v13 = vpop.f32.mrf.mxu1 }
 0x45e   :  { %v5626_v44 = vpack.c.bf16 %v5623_v13, %v5623_v13  ;;  %v10847_v13 = vld [vmem:[%s14753_s5 + $0xd0] sm:$0xff] }
 0x460   :  { %9910 = vmatmul.msk.bf16.vlgmr.msra.gmra.mxu1 %vm5578_vm6, %v5626_v44  ;;  %9911 = vmatmul.msk.bf16.vlgmr.msrb.gmra.mxu3 %vm5578_vm6, %v5626_v44 }
 0x461   :  { %9913 = vmatmul.msk.bf16.vlgmr.msrb.gmra.mxu2 %vm5578_vm6, %v5626_v44  ;;  %5891 = vmatpush.bf16.msra.mxu1 %v9901_v25  ;;  %v10872_v25 = vld [vmem:[%s14753_s5 + $0x198] sm:$0xff] }
 0x462   :  { %5917 = vmatpush.bf16.msrb.mxu3 %v9909_v28  ;;  %v10824_v28 = vld [vmem:[%s14753_s5 + $0x18] sm:$0xff] }
 0x465   :  { %5892 = vmatpush.bf16.msra.mxu1 %v9869_v8  ;;  %v10849_v8 = vld [vmem:[%s14753_s5 + $0xe0] sm:$0xff] }
 0x466   :  { %5918 = vmatpush.bf16.msrb.mxu3 %v9877_v29  ;;  %v10874_v29 = vld [vmem:[%s14753_s5 + $0x1a8] sm:$0xff] }
 0x469   :  { %5893 = vmatpush.bf16.msra.mxu1 %v9837_v47  ;;  %v10900_v47 = vld [vmem:[%s14753_s5 + $0x278] sm:$0xff] }
 0x46a   :  { %5919 = vmatpush.bf16.msrb.mxu3 %v9845_v56 }
 0x46d   :  { %5894 = vmatpush.bf16.msra.mxu1 %v9805_v1 }
 0x46e   :  { %5920 = vmatpush.bf16.msrb.mxu3 %v9813_v48 }
 0x470   :  { %9912 = vmatmul.msk.bf16.vlgmr.msrb.gmra.mxu1 %vm5578_vm6, %v5626_v44  ;;  %9914 = vmatmul.msk.bf16.vlgmr.msra.gmra.mxu3 %vm5578_vm6, %v5626_v44 }
 0x471   :  { %9916 = vmatmul.msk.bf16.vlgmr.msra.gmra.mxu2 %vm5578_vm6, %v5626_v44 }
 0x480   :  { %9915 = vmatmul.msk.bf16.vlgmr.msra.gmra.mxu1 %vm5578_vm6, %v5626_v44  ;;  %9917 = vmatmul.msk.bf16.vlgmr.msrb.gmra.mxu3 %vm5578_vm6, %v5626_v44  ;;  %v10897_v44 = vld [vmem:[%s14753_s5 + $0x260] sm:$0xff] }
 0x4dd   :  { %v5831_v16 = vpop.f32.mrf.mxu1 }
 0x4e3   :  { %v5844_v24 = vpop.f32.mrf.mxu3 }
 0x4e4   :  { %v10924_v20 = vpack.c.bf16 %v5844_v24, %v5831_v16  ;;  %v5870_v61 = vpop.f32.mrf.mxu2  ;;  %v10851_v16 = vld [vmem:[%s14753_s5 + $0xf0] sm:$0xff]  ;;  %v10876_v24 = vld [vmem:[%s14753_s5 + $0x1b8] sm:$0xff] }
 0x4e5   :  { %v5833_v5 = vpop.f32.mrf.mxu1 }
 0x4e6   :  { %10925 = vst [vmem:[#allocation2 + $0x10] sm:$0xff] %v10924_v20   ;;  %v10901_v20 = vld [vmem:[%s14753_s5 + $0x280] sm:$0xff]  ;;  %v10828_v5 = vld [vmem:[%s14753_s5 + $0x38] sm:$0xff] }
 0x4eb   :  { %v5846_v37 = vpop.f32.mrf.mxu3 }
 0x4ec   :  { %v5872_v40 = vpop.f32.mrf.mxu2 }
 0x4ed   :  { %v5857_v31 = vpop.f32.mrf.mxu1  ;;  %v10917_v59 = vld [vmem:[#allocation2 + $0x10] sm:$0xff] }
 0x4ee   :  { %v10929_v51 = vpack.c.bf16 %v5870_v61, %v5857_v31 }
 0x4f0   :  { %10941 = vst [vmem:[#allocation2] sm:$0xff] %v10929_v51  }
 0x4f3   :  { %v5883_v49 = vpop.f32.mrf.mxu3 }
 0x4f4   :  { %v5909_v21 = vpop.f32.mrf.mxu2 }
 0x4f5   :  { %v5859_v0 = vpop.f32.mrf.mxu1 }
 0x4f6   :  { %v10877_v0 = vld [vmem:[%s14753_s5 + $0x1c0] sm:$0xff] }
 0x4f7   :  { %v10918_v2 = vld [vmem:[#allocation2] sm:$0xff] }
 0x4fb   :  { %v5885_v52 = vpop.f32.mrf.mxu3 }
 0x4fc   :  { %v5911_v3 = vpop.f32.mrf.mxu2  ;;  %v10902_v52 = vld [vmem:[%s14753_s5 + $0x288] sm:$0xff] }
 0x4fd   :  { %v5896_v35 = vpop.f32.mrf.mxu1 }
 0x4fe   :  { %v10934_v26 = vpack.c.bf16 %v5896_v35, %v5883_v49 }
 0x500   :  { %10942 = vst [vmem:[#allocation2 + $0x18] sm:$0xff] %v10934_v26   ;;  %v10829_v26 = vld [vmem:[%s14753_s5 + $0x40] sm:$0xff] }
 0x503   :  { %v5922_v39 = vpop.f32.mrf.mxu3 }
 0x504   :  { %v10939_v27 = vpack.c.bf16 %v5922_v39, %v5909_v21  ;;  %v10852_v21 = vld [vmem:[%s14753_s5 + $0xf8] sm:$0xff] }
 0x505   :  { %v5898_v6 = vpop.f32.mrf.mxu1 }
 0x506   :  { %10943 = vst [vmem:[#allocation2 + $0x8] sm:$0xff] %v10939_v27  }
 0x507   :  { %v10919_v53 = vld [vmem:[#allocation2 + $0x18] sm:$0xff] }
 0x50b   :  { %v5924_v63 = vpop.f32.mrf.mxu3 }
 0x50d   :  { %v10920_v50 = vld [vmem:[#allocation2 + $0x8] sm:$0xff] }
 0x50e   :  { %6938 = vmatpush.bf16.msrb.mxu0 %v10920_v50  ;;  %10952 = vmatpush.bf16.msrb.mxu1 %v10920_v50 }
 0x50f   :  { %10953 = vmatpush.bf16.msrb.mxu2 %v10920_v50  ;;  %10954 = vmatpush.bf16.msra.mxu3 %v10920_v50 }
 0x512   :  { %6939 = vmatpush.bf16.msrb.mxu0 %v10919_v53  ;;  %10955 = vmatpush.bf16.msrb.mxu1 %v10919_v53 }
 0x513   :  { %10956 = vmatpush.bf16.msrb.mxu2 %v10919_v53  ;;  %10957 = vmatpush.bf16.msra.mxu3 %v10919_v53 }
 0x516   :  { %6940 = vmatpush.bf16.msrb.mxu0 %v10918_v2  ;;  %10958 = vmatpush.bf16.msrb.mxu1 %v10918_v2 }
 0x517   :  { %10959 = vmatpush.bf16.msrb.mxu2 %v10918_v2  ;;  %10960 = vmatpush.bf16.msra.mxu3 %v10918_v2  ;;  %v10853_v2 = vld [vmem:[%s14753_s5 + $0x100] sm:$0xff] }
 0x51a   :  { %6941 = vmatpush.bf16.msrb.mxu0 %v10917_v59  ;;  %10961 = vmatpush.bf16.msrb.mxu1 %v10917_v59 }
 0x51b   :  { %10962 = vmatpush.bf16.msrb.mxu2 %v10917_v59  ;;  %10963 = vmatpush.bf16.msra.mxu3 %v10917_v59  ;;  %v10878_v59 = vld [vmem:[%s14753_s5 + $0x1c8] sm:$0xff] }
 0x51d   :  { %10339 = vmatmul.msk.bf16.vlgmr.msrb.gmra.mxu1 %vm5578_vm6, %v10842_v55  ;;  %10318 = vmatmul.msk.bf16.vlgmr.msrb.gmra.mxu0 %vm5578_vm6, %v10821_v18  ;;  %v10903_v55 = vld [vmem:[%s14753_s5 + $0x290] sm:$0xff] }
 0x51e   :  { %10364 = vmatmul.msk.bf16.vlgmr.msrb.gmra.mxu2 %vm5578_vm6, %v10867_v57  ;;  %10389 = vmatmul.msk.bf16.vlgmr.msra.gmra.mxu3 %vm5578_vm6, %v10892_v42 }
 0x52d   :  { %10340 = vmatmul.msk.bf16.gmra.mxu1 %vm5578_vm6, %v10843_v17  ;;  %10319 = vmatmul.msk.bf16.gmra.mxu0 %vm5578_vm6, %v10822_v36  ;;  %v10830_v17 = vld [vmem:[%s14753_s5 + $0x48] sm:$0xff] }
 0x52e   :  { %10365 = vmatmul.msk.bf16.gmra.mxu2 %vm5578_vm6, %v10868_v4  ;;  %10390 = vmatmul.msk.bf16.gmra.mxu3 %vm5578_vm6, %v10893_v45 }
 0x53d   :  { %10341 = vmatmul.msk.bf16.gmra.mxu1 %vm5578_vm6, %v10844_v54  ;;  %10320 = vmatmul.msk.bf16.gmra.mxu0 %vm5578_vm6, %v10823_v34 }
 0x53e   :  { %10366 = vmatmul.msk.bf16.gmra.mxu2 %vm5578_vm6, %v10869_v9  ;;  %10391 = vmatmul.msk.bf16.gmra.mxu3 %vm5578_vm6, %v10894_v62 }
 0x54d   :  { %10342 = vmatmul.msk.bf16.gmra.mxu1 %vm5578_vm6, %v10845_v19  ;;  %10321 = vmatmul.msk.bf16.gmra.mxu0 %vm5578_vm6, %v10824_v28  ;;  %v10854_v19 = vld [vmem:[%s14753_s5 + $0x108] sm:$0xff] }
 0x54e   :  { %10367 = vmatmul.msk.bf16.gmra.mxu2 %vm5578_vm6, %v10870_v38  ;;  %10392 = vmatmul.msk.bf16.gmra.mxu3 %vm5578_vm6, %v10895_v33  ;;  %v10879_v38 = vld [vmem:[%s14753_s5 + $0x1d0] sm:$0xff]  ;;  %v10904_v33 = vld [vmem:[%s14753_s5 + $0x298] sm:$0xff] }
 0x55d   :  { %10343 = vmatmul.msk.bf16.gmra.mxu1 %vm5578_vm6, %v10846_v15  ;;  %10322 = vmatmul.msk.bf16.gmra.mxu0 %vm5578_vm6, %v10825_v58 }
 0x55e   :  { %10368 = vmatmul.msk.bf16.gmra.mxu2 %vm5578_vm6, %v10871_v30  ;;  %10393 = vmatmul.msk.bf16.gmra.mxu3 %vm5578_vm6, %v10896_v22  ;;  %v10831_v30 = vld [vmem:[%s14753_s5 + $0x50] sm:$0xff] }
 0x56d   :  { %10344 = vmatmul.msk.bf16.gmra.mxu1 %vm5578_vm6, %v10847_v13  ;;  %10323 = vmatmul.msk.bf16.gmra.mxu0 %vm5578_vm6, %v10826_v32 }
 0x56e   :  { %10369 = vmatmul.msk.bf16.gmra.mxu2 %vm5578_vm6, %v10872_v25  ;;  %10394 = vmatmul.msk.bf16.gmra.mxu3 %vm5578_vm6, %v10897_v44 }
 0x57d   :  { %10345 = vmatmul.msk.bf16.gmra.mxu1 %vm5578_vm6, %v10848_v46  ;;  %10324 = vmatmul.msk.bf16.gmra.mxu0 %vm5578_vm6, %v10827_v60  ;;  %v10855_v46 = vld [vmem:[%s14753_s5 + $0x110] sm:$0xff]  ;;  %v10856_v60 = vld [vmem:[%s14753_s5 + $0x118] sm:$0xff] }
 0x57e   :  { %10370 = vmatmul.msk.bf16.gmra.mxu2 %vm5578_vm6, %v10873_v11  ;;  %10395 = vmatmul.msk.bf16.gmra.mxu3 %vm5578_vm6, %v10898_v12  ;;  %v10880_v11 = vld [vmem:[%s14753_s5 + $0x1d8] sm:$0xff]  ;;  %v10905_v12 = vld [vmem:[%s14753_s5 + $0x2a0] sm:$0xff] }
 0x58d   :  { %10346 = vmatmul.msk.bf16.gmra.mxu1 %vm5578_vm6, %v10849_v8  ;;  %10325 = vmatmul.msk.bf16.gmra.mxu0 %vm5578_vm6, %v10828_v5 }
 0x58e   :  { %10371 = vmatmul.msk.bf16.gmra.mxu2 %vm5578_vm6, %v10874_v29  ;;  %10396 = vmatmul.msk.bf16.gmra.mxu3 %vm5578_vm6, %v10899_v43  ;;  %v10832_v29 = vld [vmem:[%s14753_s5 + $0x58] sm:$0xff] }
 0x59a   :  { %v7048_v56 = vpop.f32.mrf.mxu1  ;;  %v6943_v35 = vpop.f32.mrf.mxu0 }
 0x59b   :  { %7465 = vst [vmem:[#allocation3 + $0x150] sm:$0xff] %v7048_v56 }
 0x59c   :  { %7423 = vst [vmem:[#allocation3] sm:$0xff] %v6943_v35 }
 0x59d   :  { %10347 = vmatmul.msk.bf16.gmra.mxu1 %vm5578_vm6, %v10850_v10  ;;  %10326 = vmatmul.msk.bf16.gmra.mxu0 %vm5578_vm6, %v10829_v26 }
 0x59e   :  { %10372 = vmatmul.msk.bf16.gmra.mxu2 %vm5578_vm6, %v10875_v41  ;;  %10397 = vmatmul.msk.bf16.gmra.mxu3 %vm5578_vm6, %v10900_v47 }
 0x5a1   :  { %v7173_v7 = vpop.f32.mrf.mxu2  ;;  %v7298_v23 = vpop.f32.mrf.mxu3 }
 0x5a2   :  { %7515 = vst [vmem:[#allocation3 + $0x2e0] sm:$0xff] %v7173_v7  ;;  %v7050_v14 = vpop.f32.mrf.mxu1  ;;  %v6945_v63 = vpop.f32.mrf.mxu0  ;;  %v10881_v7 = vld [vmem:[%s14753_s5 + $0x1e0] sm:$0xff] }
 0x5a3   :  { %7565 = vst [vmem:[#allocation3 + $0x470] sm:$0xff] %v7298_v23  ;;  %v10906_v23 = vld [vmem:[%s14753_s5 + $0x2a8] sm:$0xff] }
 0x5a4   :  { %7466 = vst [vmem:[#allocation3 + $0x158] sm:$0xff] %v7050_v14 }
 0x5a5   :  { %7424 = vst [vmem:[#allocation3 + $0x8] sm:$0xff] %v6945_v63  ;;  %v10883_v63 = vld [vmem:[%s14753_s5 + $0x1f0] sm:$0xff] }
 0x5a9   :  { %v7175_v1 = vpop.f32.mrf.mxu2  ;;  %v7300_v48 = vpop.f32.mrf.mxu3 }
 0x5aa   :  { %7516 = vst [vmem:[#allocation3 + $0x2e8] sm:$0xff] %v7175_v1  ;;  %v7053_v61 = vpop.f32.mrf.mxu1  ;;  %v6948_v42 = vpop.f32.mrf.mxu0 }
 0x5ab   :  { %7566 = vst [vmem:[#allocation3 + $0x478] sm:$0xff] %v7300_v48  ;;  %v10833_v48 = vld [vmem:[%s14753_s5 + $0x60] sm:$0xff] }
 0x5ac   :  { %7467 = vst [vmem:[#allocation3 + $0x160] sm:$0xff] %v7053_v61 }
 0x5ad   :  { %10348 = vmatmul.msk.bf16.gmra.mxu1 %vm5578_vm6, %v10851_v16  ;;  %7425 = vst [vmem:[#allocation3 + $0x10] sm:$0xff] %v6948_v42  ;;  %10327 = vmatmul.msk.bf16.gmra.mxu0 %vm5578_vm6, %v10830_v17 }
 0x5ae   :  { %10373 = vmatmul.msk.bf16.gmra.mxu2 %vm5578_vm6, %v10876_v24  ;;  %10398 = vmatmul.msk.bf16.gmra.mxu3 %vm5578_vm6, %v10901_v20 }
 0x5b1   :  { %v7178_v37 = vpop.f32.mrf.mxu2  ;;  %v7303_v40 = vpop.f32.mrf.mxu3 }
 0x5b2   :  { %7517 = vst [vmem:[#allocation3 + $0x2f0] sm:$0xff] %v7178_v37  ;;  %v7055_v31 = vpop.f32.mrf.mxu1  ;;  %v6950_v9 = vpop.f32.mrf.mxu0 }
 0x5b3   :  { %7567 = vst [vmem:[#allocation3 + $0x480] sm:$0xff] %v7303_v40  ;;  %v10857_v40 = vld [vmem:[%s14753_s5 + $0x120] sm:$0xff] }
 0x5b4   :  { %7468 = vst [vmem:[#allocation3 + $0x168] sm:$0xff] %v7055_v31  ;;  %v10882_v31 = vld [vmem:[%s14753_s5 + $0x1e8] sm:$0xff] }
 0x5b5   :  { %7426 = vst [vmem:[#allocation3 + $0x18] sm:$0xff] %v6950_v9  ;;  %v10884_v9 = vld [vmem:[%s14753_s5 + $0x1f8] sm:$0xff] }
 0x5b9   :  { %v7180_v51 = vpop.f32.mrf.mxu2  ;;  %v7305_v49 = vpop.f32.mrf.mxu3 }
 0x5ba   :  { %7518 = vst [vmem:[#allocation3 + $0x2f8] sm:$0xff] %v7180_v51  ;;  %v7058_v3 = vpop.f32.mrf.mxu1  ;;  %v6953_v15 = vpop.f32.mrf.mxu0  ;;  %v10907_v51 = vld [vmem:[%s14753_s5 + $0x2b0] sm:$0xff] }
 0x5bb   :  { %7568 = vst [vmem:[#allocation3 + $0x488] sm:$0xff] %v7305_v49 }
 0x5bc   :  { %7469 = vst [vmem:[#allocation3 + $0x170] sm:$0xff] %v7058_v3 }
 0x5bd   :  { %10349 = vmatmul.msk.bf16.gmra.mxu1 %vm5578_vm6, %v10852_v21  ;;  %7427 = vst [vmem:[#allocation3 + $0x20] sm:$0xff] %v6953_v15  ;;  %10328 = vmatmul.msk.bf16.gmra.mxu0 %vm5578_vm6, %v10831_v30 }
 0x5be   :  { %10374 = vmatmul.msk.bf16.gmra.mxu2 %vm5578_vm6, %v10877_v0  ;;  %10399 = vmatmul.msk.bf16.gmra.mxu3 %vm5578_vm6, %v10902_v52  ;;  %v10834_v0 = vld [vmem:[%s14753_s5 + $0x68] sm:$0xff] }
 0x5c1   :  { %v7183_v39 = vpop.f32.mrf.mxu2  ;;  %v7308_v27 = vpop.f32.mrf.mxu3 }
 0x5c2   :  { %7519 = vst [vmem:[#allocation3 + $0x300] sm:$0xff] %v7183_v39  ;;  %v7060_v6 = vpop.f32.mrf.mxu1  ;;  %v6955_v25 = vpop.f32.mrf.mxu0 }
 0x5c3   :  { %7569 = vst [vmem:[#allocation3 + $0x490] sm:$0xff] %v7308_v27 }
 0x5c4   :  { %7470 = vst [vmem:[#allocation3 + $0x178] sm:$0xff] %v7060_v6  ;;  %v10858_v6 = vld [vmem:[%s14753_s5 + $0x128] sm:$0xff] }
 0x5c5   :  { %7428 = vst [vmem:[#allocation3 + $0x28] sm:$0xff] %v6955_v25  ;;  %v10885_v25 = vld [vmem:[%s14753_s5 + $0x200] sm:$0xff] }
 0x5c9   :  { %v7185_v50 = vpop.f32.mrf.mxu2  ;;  %v7310_v53 = vpop.f32.mrf.mxu3 }
 0x5ca   :  { %7520 = vst [vmem:[#allocation3 + $0x308] sm:$0xff] %v7185_v50  ;;  %v7063_v57 = vpop.f32.mrf.mxu1  ;;  %v6958_v8 = vpop.f32.mrf.mxu0  ;;  %v10908_v50 = vld [vmem:[%s14753_s5 + $0x2b8] sm:$0xff] }
 0x5cb   :  { %7570 = vst [vmem:[#allocation3 + $0x498] sm:$0xff] %v7310_v53 }
 0x5cc   :  { %7471 = vst [vmem:[#allocation3 + $0x180] sm:$0xff] %v7063_v57 }
 0x5cd   :  { %10350 = vmatmul.msk.bf16.gmra.mxu1 %vm5578_vm6, %v10853_v2  ;;  %7429 = vst [vmem:[#allocation3 + $0x30] sm:$0xff] %v6958_v8  ;;  %10329 = vmatmul.msk.bf16.gmra.mxu0 %vm5578_vm6, %v10832_v29 }
 0x5ce   :  { %10375 = vmatmul.msk.bf16.gmra.mxu2 %vm5578_vm6, %v10878_v59  ;;  %10400 = vmatmul.msk.bf16.gmra.mxu3 %vm5578_vm6, %v10903_v55  ;;  %v10835_v59 = vld [vmem:[%s14753_s5 + $0x70] sm:$0xff] }
 0x5d1   :  { %v7188_v4 = vpop.f32.mrf.mxu2  ;;  %v7313_v45 = vpop.f32.mrf.mxu3 }
 0x5d2   :  { %7521 = vst [vmem:[#allocation3 + $0x310] sm:$0xff] %v7188_v4  ;;  %v7065_v54 = vpop.f32.mrf.mxu1  ;;  %v6960_v41 = vpop.f32.mrf.mxu0 }
 0x5d3   :  { %7571 = vst [vmem:[#allocation3 + $0x4a0] sm:$0xff] %v7313_v45 }
 0x5d4   :  { %7472 = vst [vmem:[#allocation3 + $0x188] sm:$0xff] %v7065_v54  ;;  %v10859_v54 = vld [vmem:[%s14753_s5 + $0x130] sm:$0xff] }
 0x5d5   :  { %7430 = vst [vmem:[#allocation3 + $0x38] sm:$0xff] %v6960_v41  ;;  %v10886_v41 = vld [vmem:[%s14753_s5 + $0x208] sm:$0xff] }
 0x5d9   :  { %v7190_v62 = vpop.f32.mrf.mxu2  ;;  %v7315_v18 = vpop.f32.mrf.mxu3 }
 0x5da   :  { %7522 = vst [vmem:[#allocation3 + $0x318] sm:$0xff] %v7190_v62  ;;  %v7068_v36 = vpop.f32.mrf.mxu1  ;;  %v6963_v1 = vpop.f32.mrf.mxu0  ;;  %v10909_v62 = vld [vmem:[%s14753_s5 + $0x2c0] sm:$0xff] }
 0x5db   :  { %7572 = vst [vmem:[#allocation3 + $0x4a8] sm:$0xff] %v7315_v18 }
 0x5dc   :  { %7473 = vst [vmem:[#allocation3 + $0x190] sm:$0xff] %v7068_v36 }
 0x5dd   :  { %10351 = vmatmul.msk.bf16.gmra.mxu1 %vm5578_vm6, %v10854_v19  ;;  %7431 = vst [vmem:[#allocation3 + $0x40] sm:$0xff] %v6963_v1  ;;  %10330 = vmatmul.msk.bf16.gmra.mxu0 %vm5578_vm6, %v10833_v48 }
 0x5de   :  { %10376 = vmatmul.msk.bf16.gmra.mxu2 %vm5578_vm6, %v10879_v38  ;;  %10401 = vmatmul.msk.bf16.gmra.mxu3 %vm5578_vm6, %v10904_v33  ;;  %v10836_v38 = vld [vmem:[%s14753_s5 + $0x78] sm:$0xff] }
 0x5e1   :  { %v7193_v22 = vpop.f32.mrf.mxu2  ;;  %v7318_v34 = vpop.f32.mrf.mxu3 }
 0x5e2   :  { %7523 = vst [vmem:[#allocation3 + $0x320] sm:$0xff] %v7193_v22  ;;  %v7070_v13 = vpop.f32.mrf.mxu1  ;;  %v6965_v61 = vpop.f32.mrf.mxu0 }
 0x5e3   :  { %7573 = vst [vmem:[#allocation3 + $0x4b0] sm:$0xff] %v7318_v34 }
 0x5e4   :  { %7474 = vst [vmem:[#allocation3 + $0x198] sm:$0xff] %v7070_v13  ;;  %v10860_v13 = vld [vmem:[%s14753_s5 + $0x138] sm:$0xff] }
 0x5e5   :  { %7432 = vst [vmem:[#allocation3 + $0x48] sm:$0xff] %v6965_v61  ;;  %v10887_v61 = vld [vmem:[%s14753_s5 + $0x210] sm:$0xff] }
 0x5e9   :  { %v7195_v44 = vpop.f32.mrf.mxu2  ;;  %v7320_v28 = vpop.f32.mrf.mxu3 }
 0x5ea   :  { %7524 = vst [vmem:[#allocation3 + $0x328] sm:$0xff] %v7195_v44  ;;  %v7073_v58 = vpop.f32.mrf.mxu1  ;;  %v6968_v21 = vpop.f32.mrf.mxu0  ;;  %v10910_v44 = vld [vmem:[%s14753_s5 + $0x2c8] sm:$0xff] }
 0x5eb   :  { %7574 = vst [vmem:[#allocation3 + $0x4b8] sm:$0xff] %v7320_v28 }
 0x5ec   :  { %7475 = vst [vmem:[#allocation3 + $0x1a0] sm:$0xff] %v7073_v58 }
 0x5ed   :  { %10352 = vmatmul.msk.bf16.gmra.mxu1 %vm5578_vm6, %v10855_v46  ;;  %7433 = vst [vmem:[#allocation3 + $0x50] sm:$0xff] %v6968_v21  ;;  %10331 = vmatmul.msk.bf16.gmra.mxu0 %vm5578_vm6, %v10834_v0 }
 0x5ee   :  { %10377 = vmatmul.msk.bf16.gmra.mxu2 %vm5578_vm6, %v10880_v11  ;;  %10402 = vmatmul.msk.bf16.gmra.mxu3 %vm5578_vm6, %v10905_v12  ;;  %v10837_v11 = vld [vmem:[%s14753_s5 + $0x80] sm:$0xff] }
 0x5f1   :  { %v7198_v43 = vpop.f32.mrf.mxu2  ;;  %v7323_v32 = vpop.f32.mrf.mxu3 }
 0x5f2   :  { %7525 = vst [vmem:[#allocation3 + $0x330] sm:$0xff] %v7198_v43  ;;  %v7075_v10 = vpop.f32.mrf.mxu1  ;;  %v6970_v26 = vpop.f32.mrf.mxu0 }
 0x5f3   :  { %7575 = vst [vmem:[#allocation3 + $0x4c0] sm:$0xff] %v7323_v32 }
 0x5f4   :  { %7476 = vst [vmem:[#allocation3 + $0x1a8] sm:$0xff] %v7075_v10  ;;  %v10861_v10 = vld [vmem:[%s14753_s5 + $0x140] sm:$0xff] }
 0x5f5   :  { %7434 = vst [vmem:[#allocation3 + $0x58] sm:$0xff] %v6970_v26  ;;  %v10888_v26 = vld [vmem:[%s14753_s5 + $0x218] sm:$0xff] }
 0x5f9   :  { %v7200_v47 = vpop.f32.mrf.mxu2  ;;  %v7325_v56 = vpop.f32.mrf.mxu3 }
 0x5fa   :  { %7526 = vst [vmem:[#allocation3 + $0x338] sm:$0xff] %v7200_v47  ;;  %v7078_v14 = vpop.f32.mrf.mxu1  ;;  %v6973_v2 = vpop.f32.mrf.mxu0  ;;  %v10911_v47 = vld [vmem:[%s14753_s5 + $0x2d0] sm:$0xff] }
 0x5fb   :  { %7576 = vst [vmem:[#allocation3 + $0x4c8] sm:$0xff] %v7325_v56 }
 0x5fc   :  { %7477 = vst [vmem:[#allocation3 + $0x1b0] sm:$0xff] %v7078_v14 }
 0x5fd   :  { %10353 = vmatmul.msk.bf16.gmra.mxu1 %vm5578_vm6, %v10856_v60  ;;  %7435 = vst [vmem:[#allocation3 + $0x60] sm:$0xff] %v6973_v2  ;;  %10332 = vmatmul.msk.bf16.gmra.mxu0 %vm5578_vm6, %v10835_v59 }
 0x5fe   :  { %10378 = vmatmul.msk.bf16.gmra.mxu2 %vm5578_vm6, %v10881_v7  ;;  %10403 = vmatmul.msk.bf16.gmra.mxu3 %vm5578_vm6, %v10906_v23  ;;  %v10838_v7 = vld [vmem:[%s14753_s5 + $0x88] sm:$0xff] }
 0x601   :  { %v7203_v16 = vpop.f32.mrf.mxu2  ;;  %v7328_v24 = vpop.f32.mrf.mxu3 }
 0x602   :  { %7527 = vst [vmem:[#allocation3 + $0x340] sm:$0xff] %v7203_v16  ;;  %v7080_v20 = vpop.f32.mrf.mxu1  ;;  %v6975_v17 = vpop.f32.mrf.mxu0 }
 0x603   :  { %7577 = vst [vmem:[#allocation3 + $0x4d0] sm:$0xff] %v7328_v24 }
 0x604   :  { %7478 = vst [vmem:[#allocation3 + $0x1b8] sm:$0xff] %v7080_v20  ;;  %v10862_v20 = vld [vmem:[%s14753_s5 + $0x148] sm:$0xff] }
 0x605   :  { %7436 = vst [vmem:[#allocation3 + $0x68] sm:$0xff] %v6975_v17  ;;  %v10889_v17 = vld [vmem:[%s14753_s5 + $0x220] sm:$0xff] }
 0x609   :  { %v7205_v5 = vpop.f32.mrf.mxu2  ;;  %v7330_v37 = vpop.f32.mrf.mxu3 }
 0x60a   :  { %7528 = vst [vmem:[#allocation3 + $0x348] sm:$0xff] %v7205_v5  ;;  %v7083_v49 = vpop.f32.mrf.mxu1  ;;  %v6978_v19 = vpop.f32.mrf.mxu0  ;;  %v10912_v5 = vld [vmem:[%s14753_s5 + $0x2d8] sm:$0xff] }
 0x60b   :  { %7578 = vst [vmem:[#allocation3 + $0x4d8] sm:$0xff] %v7330_v37 }
 0x60c   :  { %7479 = vst [vmem:[#allocation3 + $0x1c0] sm:$0xff] %v7083_v49 }
 0x60d   :  { %10354 = vmatmul.msk.bf16.gmra.mxu1 %vm5578_vm6, %v10857_v40  ;;  %7437 = vst [vmem:[#allocation3 + $0x70] sm:$0xff] %v6978_v19  ;;  %10333 = vmatmul.msk.bf16.gmra.mxu0 %vm5578_vm6, %v10836_v38 }
 0x60e   :  { %10379 = vmatmul.msk.bf16.gmra.mxu2 %vm5578_vm6, %v10882_v31  ;;  %10404 = vmatmul.msk.bf16.gmra.mxu3 %vm5578_vm6, %v10907_v51  ;;  %v10839_v31 = vld [vmem:[%s14753_s5 + $0x90] sm:$0xff] }
 0x611   :  { %v7208_v52 = vpop.f32.mrf.mxu2  ;;  %v7333_v3 = vpop.f32.mrf.mxu3 }
 0x612   :  { %7529 = vst [vmem:[#allocation3 + $0x350] sm:$0xff] %v7208_v52  ;;  %v7085_v35 = vpop.f32.mrf.mxu1  ;;  %v6980_v30 = vpop.f32.mrf.mxu0 }
 0x613   :  { %7579 = vst [vmem:[#allocation3 + $0x4e0] sm:$0xff] %v7333_v3 }
 0x614   :  { %7480 = vst [vmem:[#allocation3 + $0x1c8] sm:$0xff] %v7085_v35  ;;  %v10863_v35 = vld [vmem:[%s14753_s5 + $0x150] sm:$0xff] }
 0x615   :  { %7438 = vst [vmem:[#allocation3 + $0x78] sm:$0xff] %v6980_v30  ;;  %v10890_v30 = vld [vmem:[%s14753_s5 + $0x228] sm:$0xff] }
 0x619   :  { %v7210_v39 = vpop.f32.mrf.mxu2  ;;  %v7335_v27 = vpop.f32.mrf.mxu3 }
 0x61a   :  { %7530 = vst [vmem:[#allocation3 + $0x358] sm:$0xff] %v7210_v39  ;;  %v7088_v53 = vpop.f32.mrf.mxu1  ;;  %v6983_v46 = vpop.f32.mrf.mxu0  ;;  %v10913_v39 = vld [vmem:[%s14753_s5 + $0x2e0] sm:$0xff] }
 0x61b   :  { %7580 = vst [vmem:[#allocation3 + $0x4e8] sm:$0xff] %v7335_v27 }
 0x61c   :  { %7481 = vst [vmem:[#allocation3 + $0x1d0] sm:$0xff] %v7088_v53 }
 0x61d   :  { %10355 = vmatmul.msk.bf16.gmra.mxu1 %vm5578_vm6, %v10858_v6  ;;  %7439 = vst [vmem:[#allocation3 + $0x80] sm:$0xff] %v6983_v46  ;;  %10334 = vmatmul.msk.bf16.gmra.mxu0 %vm5578_vm6, %v10837_v11 }
 0x61e   :  { %10380 = vmatmul.msk.bf16.gmra.mxu2 %vm5578_vm6, %v10883_v63  ;;  %10405 = vmatmul.msk.bf16.gmra.mxu3 %vm5578_vm6, %v10908_v50  ;;  %v10840_v63 = vld [vmem:[%s14753_s5 + $0x98] sm:$0xff] }
 0x621   :  { %v7213_v55 = vpop.f32.mrf.mxu2  ;;  %v7338_v57 = vpop.f32.mrf.mxu3 }
 0x622   :  { %7531 = vst [vmem:[#allocation3 + $0x360] sm:$0xff] %v7213_v55  ;;  %v7090_v42 = vpop.f32.mrf.mxu1  ;;  %v6985_v29 = vpop.f32.mrf.mxu0 }
 0x623   :  { %7581 = vst [vmem:[#allocation3 + $0x4f0] sm:$0xff] %v7338_v57 }
 0x624   :  { %7482 = vst [vmem:[#allocation3 + $0x1d8] sm:$0xff] %v7090_v42  ;;  %v10864_v42 = vld [vmem:[%s14753_s5 + $0x158] sm:$0xff] }
 0x625   :  { %7440 = vst [vmem:[#allocation3 + $0x88] sm:$0xff] %v6985_v29  ;;  %v10916_v29 = vld [vmem:[%s14753_s5 + $0x2f8] sm:$0xff] }
 0x629   :  { %v7215_v4 = vpop.f32.mrf.mxu2  ;;  %v7340_v45 = vpop.f32.mrf.mxu3 }
 0x62a   :  { %7532 = vst [vmem:[#allocation3 + $0x368] sm:$0xff] %v7215_v4  ;;  %v7093_v18 = vpop.f32.mrf.mxu1  ;;  %v6988_v60 = vpop.f32.mrf.mxu0  ;;  %v10914_v4 = vld [vmem:[%s14753_s5 + $0x2e8] sm:$0xff] }
 0x62b   :  { %7582 = vst [vmem:[#allocation3 + $0x4f8] sm:$0xff] %v7340_v45 }
 0x62c   :  { %7483 = vst [vmem:[#allocation3 + $0x1e0] sm:$0xff] %v7093_v18 }
 0x62d   :  { %10356 = vmatmul.msk.bf16.gmra.mxu1 %vm5578_vm6, %v10859_v54  ;;  %7441 = vst [vmem:[#allocation3 + $0x90] sm:$0xff] %v6988_v60  ;;  %10335 = vmatmul.msk.bf16.gmra.mxu0 %vm5578_vm6, %v10838_v7 }
 0x62e   :  { %10381 = vmatmul.msk.bf16.gmra.mxu2 %vm5578_vm6, %v10884_v9  ;;  %10406 = vmatmul.msk.bf16.gmra.mxu3 %vm5578_vm6, %v10909_v62  ;;  %v10841_v9 = vld [vmem:[%s14753_s5 + $0xa0] sm:$0xff] }
 0x631   :  { %v7218_v33 = vpop.f32.mrf.mxu2  ;;  %v7343_v36 = vpop.f32.mrf.mxu3 }
 0x632   :  { %7533 = vst [vmem:[#allocation3 + $0x370] sm:$0xff] %v7218_v33  ;;  %v7095_v15 = vpop.f32.mrf.mxu1  ;;  %v6990_v48 = vpop.f32.mrf.mxu0 }
 0x633   :  { %7583 = vst [vmem:[#allocation3 + $0x500] sm:$0xff] %v7343_v36 }
 0x634   :  { %7484 = vst [vmem:[#allocation3 + $0x1e8] sm:$0xff] %v7095_v15  ;;  %v10865_v15 = vld [vmem:[%s14753_s5 + $0x160] sm:$0xff] }
 0x635   :  { %7442 = vst [vmem:[#allocation3 + $0x98] sm:$0xff] %v6990_v48 }
 0x639   :  { %v7220_v22 = vpop.f32.mrf.mxu2  ;;  %v7345_v34 = vpop.f32.mrf.mxu3 }
 0x63a   :  { %7534 = vst [vmem:[#allocation3 + $0x378] sm:$0xff] %v7220_v22  ;;  %v7098_v28 = vpop.f32.mrf.mxu1  ;;  %v6993_v40 = vpop.f32.mrf.mxu0  ;;  %v10915_v22 = vld [vmem:[%s14753_s5 + $0x2f0] sm:$0xff] }
 0x63b   :  { %7584 = vst [vmem:[#allocation3 + $0x508] sm:$0xff] %v7345_v34 }
 0x63c   :  { %7485 = vst [vmem:[#allocation3 + $0x1f0] sm:$0xff] %v7098_v28 }
 0x63d   :  { %10357 = vmatmul.msk.bf16.gmra.mxu1 %vm5578_vm6, %v10860_v13  ;;  %7443 = vst [vmem:[#allocation3 + $0xa0] sm:$0xff] %v6993_v40  ;;  %10336 = vmatmul.msk.bf16.gmra.mxu0 %vm5578_vm6, %v10839_v31 }
 0x63e   :  { %10382 = vmatmul.msk.bf16.gmra.mxu2 %vm5578_vm6, %v10885_v25  ;;  %10407 = vmatmul.msk.bf16.gmra.mxu3 %vm5578_vm6, %v10910_v44 }
 0x641   :  { %v7223_v12 = vpop.f32.mrf.mxu2  ;;  %v7348_v58 = vpop.f32.mrf.mxu3 }
 0x642   :  { %7535 = vst [vmem:[#allocation3 + $0x380] sm:$0xff] %v7223_v12  ;;  %v7100_v8 = vpop.f32.mrf.mxu1  ;;  %v6995_v0 = vpop.f32.mrf.mxu0 }
 0x643   :  { %7585 = vst [vmem:[#allocation3 + $0x510] sm:$0xff] %v7348_v58  ;;  %v10866_v58 = vld [vmem:[%s14753_s5 + $0x168] sm:$0xff] }
 0x644   :  { %7486 = vst [vmem:[#allocation3 + $0x1f8] sm:$0xff] %v7100_v8  ;;  %v10891_v8 = vld [vmem:[%s14753_s5 + $0x230] sm:$0xff]  ;;  %s10994_s5 = smov [#allocation3]  }
 0x645   :  { %7444 = vst [vmem:[#allocation3 + $0xa8] sm:$0xff] %v6995_v0  ;;  %s7619_s27 = sshll.u32 %s10994_s5, 4  ;;  %s7620_s27 = int_to_ptr.vmem [resolvable:$true] %s7619_s27 }
 0x649   :  { %v7225_v43 = vpop.f32.mrf.mxu2  ;;  %v7350_v32 = vpop.f32.mrf.mxu3 }
 0x64a   :  { %7536 = vst [vmem:[#allocation3 + $0x388] sm:$0xff] %v7225_v43  ;;  %v7103_v56 = vpop.f32.mrf.mxu1  ;;  %v6998_v6 = vpop.f32.mrf.mxu0 }
 0x64b   :  { %7586 = vst [vmem:[#allocation3 + $0x518] sm:$0xff] %v7350_v32 }
 0x64c   :  { %7487 = vst [vmem:[#allocation3 + $0x200] sm:$0xff] %v7103_v56 }
 0x64d   :  { %10358 = vmatmul.msk.bf16.gmra.mxu1 %vm5578_vm6, %v10861_v10  ;;  %7445 = vst [vmem:[#allocation3 + $0xb0] sm:$0xff] %v6998_v6  ;;  %10337 = vmatmul.msk.bf16.gmra.mxu0 %vm5578_vm6, %v10840_v63 }
 0x64e   :  { %10383 = vmatmul.msk.bf16.gmra.mxu2 %vm5578_vm6, %v10886_v41  ;;  %10408 = vmatmul.msk.bf16.gmra.mxu3 %vm5578_vm6, %v10911_v47 }
 0x651   :  { %v7228_v23 = vpop.f32.mrf.mxu2  ;;  %v7353_v14 = vpop.f32.mrf.mxu3 }
 0x652   :  { %7537 = vst [vmem:[#allocation3 + $0x390] sm:$0xff] %v7228_v23  ;;  %v7105_v1 = vpop.f32.mrf.mxu1  ;;  %v7000_v59 = vpop.f32.mrf.mxu0 }
 0x653   :  { %7587 = vst [vmem:[#allocation3 + $0x520] sm:$0xff] %v7353_v14 }
 0x654   :  { %7488 = vst [vmem:[#allocation3 + $0x208] sm:$0xff] %v7105_v1 }
 0x655   :  { %7446 = vst [vmem:[#allocation3 + $0xb8] sm:$0xff] %v7000_v59 }
 0x659   :  { %v7230_v16 = vpop.f32.mrf.mxu2  ;;  %v7355_v24 = vpop.f32.mrf.mxu3 }
 0x65a   :  { %7538 = vst [vmem:[#allocation3 + $0x398] sm:$0xff] %v7230_v16  ;;  %v7108_v37 = vpop.f32.mrf.mxu1  ;;  %v7003_v54 = vpop.f32.mrf.mxu0 }
 0x65b   :  { %7588 = vst [vmem:[#allocation3 + $0x528] sm:$0xff] %v7355_v24 }
 0x65c   :  { %7489 = vst [vmem:[#allocation3 + $0x210] sm:$0xff] %v7108_v37 }
 0x65d   :  { %10359 = vmatmul.msk.bf16.gmra.mxu1 %vm5578_vm6, %v10862_v20  ;;  %7447 = vst [vmem:[#allocation3 + $0xc0] sm:$0xff] %v7003_v54  ;;  %10338 = vmatmul.msk.bf16.gmra.mxu0 %vm5578_vm6, %v10841_v9 }
 0x65e   :  { %10384 = vmatmul.msk.bf16.gmra.mxu2 %vm5578_vm6, %v10887_v61  ;;  %10409 = vmatmul.msk.bf16.gmra.mxu3 %vm5578_vm6, %v10912_v5 }
 0x661   :  { %v7233_v51 = vpop.f32.mrf.mxu2  ;;  %v7358_v49 = vpop.f32.mrf.mxu3 }
 0x662   :  { %7539 = vst [vmem:[#allocation3 + $0x3a0] sm:$0xff] %v7233_v51  ;;  %v7110_v21 = vpop.f32.mrf.mxu1  ;;  %v7005_v38 = vpop.f32.mrf.mxu0 }
 0x663   :  { %7589 = vst [vmem:[#allocation3 + $0x530] sm:$0xff] %v7358_v49 }
 0x664   :  { %7490 = vst [vmem:[#allocation3 + $0x218] sm:$0xff] %v7110_v21 }
 0x665   :  { %7448 = vst [vmem:[#allocation3 + $0xc8] sm:$0xff] %v7005_v38 }
 0x669   :  { %v7235_v52 = vpop.f32.mrf.mxu2  ;;  %v7360_v3 = vpop.f32.mrf.mxu3 }
 0x66a   :  { %7540 = vst [vmem:[#allocation3 + $0x3a8] sm:$0xff] %v7235_v52  ;;  %v7113_v27 = vpop.f32.mrf.mxu1  ;;  %v7008_v13 = vpop.f32.mrf.mxu0 }
 0x66b   :  { %7590 = vst [vmem:[#allocation3 + $0x538] sm:$0xff] %v7360_v3 }
 0x66c   :  { %7491 = vst [vmem:[#allocation3 + $0x220] sm:$0xff] %v7113_v27 }
 0x66d   :  { %10360 = vmatmul.msk.bf16.gmra.mxu1 %vm5578_vm6, %v10863_v35  ;;  %7449 = vst [vmem:[#allocation3 + $0xd0] sm:$0xff] %v7008_v13 }
 0x66e   :  { %10385 = vmatmul.msk.bf16.gmra.mxu2 %vm5578_vm6, %v10888_v26  ;;  %10410 = vmatmul.msk.bf16.gmra.mxu3 %vm5578_vm6, %v10913_v39 }
 0x671   :  { %v7238_v50 = vpop.f32.mrf.mxu2  ;;  %v7363_v53 = vpop.f32.mrf.mxu3 }
 0x672   :  { %7541 = vst [vmem:[#allocation3 + $0x3b0] sm:$0xff] %v7238_v50  ;;  %v7115_v2 = vpop.f32.mrf.mxu1  ;;  %v7010_v46 = vpop.f32.mrf.mxu0 }
 0x673   :  { %7591 = vst [vmem:[#allocation3 + $0x540] sm:$0xff] %v7363_v53 }
 0x674   :  { %7492 = vst [vmem:[#allocation3 + $0x228] sm:$0xff] %v7115_v2 }
 0x675   :  { %7450 = vst [vmem:[#allocation3 + $0xd8] sm:$0xff] %v7010_v46 }
 0x679   :  { %v7240_v55 = vpop.f32.mrf.mxu2  ;;  %v7365_v57 = vpop.f32.mrf.mxu3 }
 0x67a   :  { %7542 = vst [vmem:[#allocation3 + $0x3b8] sm:$0xff] %v7240_v55  ;;  %v7118_v45 = vpop.f32.mrf.mxu1  ;;  %v7013_v32 = vpop.f32.mrf.mxu0 }
 0x67b   :  { %7592 = vst [vmem:[#allocation3 + $0x548] sm:$0xff] %v7365_v57 }
 0x67c   :  { %7493 = vst [vmem:[#allocation3 + $0x230] sm:$0xff] %v7118_v45 }
 0x67d   :  { %10361 = vmatmul.msk.bf16.gmra.mxu1 %vm5578_vm6, %v10864_v42  ;;  %7451 = vst [vmem:[#allocation3 + $0xe0] sm:$0xff] %v7013_v32 }
 0x67e   :  { %10386 = vmatmul.msk.bf16.gmra.mxu2 %vm5578_vm6, %v10889_v17  ;;  %10411 = vmatmul.msk.bf16.gmra.mxu3 %vm5578_vm6, %v10914_v4 }
 0x681   :  { %v7243_v62 = vpop.f32.mrf.mxu2  ;;  %v7368_v18 = vpop.f32.mrf.mxu3 }
 0x682   :  { %7543 = vst [vmem:[#allocation3 + $0x3c0] sm:$0xff] %v7243_v62  ;;  %v7120_v19 = vpop.f32.mrf.mxu1  ;;  %v7015_v56 = vpop.f32.mrf.mxu0 }
 0x683   :  { %7593 = vst [vmem:[#allocation3 + $0x550] sm:$0xff] %v7368_v18 }
 0x684   :  { %7494 = vst [vmem:[#allocation3 + $0x238] sm:$0xff] %v7120_v19 }
 0x685   :  { %7452 = vst [vmem:[#allocation3 + $0xe8] sm:$0xff] %v7015_v56 }
 0x689   :  { %v7245_v33 = vpop.f32.mrf.mxu2  ;;  %v7370_v36 = vpop.f32.mrf.mxu3 }
 0x68a   :  { %7544 = vst [vmem:[#allocation3 + $0x3c8] sm:$0xff] %v7245_v33  ;;  %v7123_v34 = vpop.f32.mrf.mxu1  ;;  %v7018_v14 = vpop.f32.mrf.mxu0 }
 0x68b   :  { %7594 = vst [vmem:[#allocation3 + $0x558] sm:$0xff] %v7370_v36 }
 0x68c   :  { %7495 = vst [vmem:[#allocation3 + $0x240] sm:$0xff] %v7123_v34 }
 0x68d   :  { %10362 = vmatmul.msk.bf16.gmra.mxu1 %vm5578_vm6, %v10865_v15  ;;  %7453 = vst [vmem:[#allocation3 + $0xf0] sm:$0xff] %v7018_v14 }
 0x68e   :  { %10387 = vmatmul.msk.bf16.gmra.mxu2 %vm5578_vm6, %v10890_v30  ;;  %10412 = vmatmul.msk.bf16.gmra.mxu3 %vm5578_vm6, %v10915_v22 }
 0x691   :  { %v7248_v25 = vpop.f32.mrf.mxu2  ;;  %v7373_v44 = vpop.f32.mrf.mxu3 }
 0x692   :  { %7545 = vst [vmem:[#allocation3 + $0x3d0] sm:$0xff] %v7248_v25  ;;  %v7125_v28 = vpop.f32.mrf.mxu1  ;;  %v7020_v24 = vpop.f32.mrf.mxu0 }
 0x693   :  { %7595 = vst [vmem:[#allocation3 + $0x560] sm:$0xff] %v7373_v44 }
 0x694   :  { %7496 = vst [vmem:[#allocation3 + $0x248] sm:$0xff] %v7125_v28 }
 0x695   :  { %7454 = vst [vmem:[#allocation3 + $0xf8] sm:$0xff] %v7020_v24 }
 0x699   :  { %v7250_v11 = vpop.f32.mrf.mxu2  ;;  %v7375_v12 = vpop.f32.mrf.mxu3 }
 0x69a   :  { %7546 = vst [vmem:[#allocation3 + $0x3d8] sm:$0xff] %v7250_v11  ;;  %v7128_v43 = vpop.f32.mrf.mxu1  ;;  %v7023_v37 = vpop.f32.mrf.mxu0 }
 0x69b   :  { %7596 = vst [vmem:[#allocation3 + $0x568] sm:$0xff] %v7375_v12 }
 0x69c   :  { %7497 = vst [vmem:[#allocation3 + $0x250] sm:$0xff] %v7128_v43 }
 0x69d   :  { %10363 = vmatmul.msk.bf16.gmra.mxu1 %vm5578_vm6, %v10866_v58  ;;  %7455 = vst [vmem:[#allocation3 + $0x100] sm:$0xff] %v7023_v37 }
 0x69e   :  { %10388 = vmatmul.msk.bf16.gmra.mxu2 %vm5578_vm6, %v10891_v8  ;;  %10413 = vmatmul.msk.bf16.gmra.mxu3 %vm5578_vm6, %v10916_v29 }
 0x6a1   :  { %v7253_v10 = vpop.f32.mrf.mxu2  ;;  %v7378_v41 = vpop.f32.mrf.mxu3 }
 0x6a2   :  { %7547 = vst [vmem:[#allocation3 + $0x3e0] sm:$0xff] %v7253_v10  ;;  %v7130_v47 = vpop.f32.mrf.mxu1  ;;  %v7025_v49 = vpop.f32.mrf.mxu0 }
 0x6a3   :  { %7597 = vst [vmem:[#allocation3 + $0x570] sm:$0xff] %v7378_v41 }
 0x6a4   :  { %7498 = vst [vmem:[#allocation3 + $0x258] sm:$0xff] %v7130_v47 }
 0x6a5   :  { %7456 = vst [vmem:[#allocation3 + $0x108] sm:$0xff] %v7025_v49 }
 0x6a9   :  { %v7255_v60 = vpop.f32.mrf.mxu2  ;;  %v7380_v7 = vpop.f32.mrf.mxu3 }
 0x6aa   :  { %7548 = vst [vmem:[#allocation3 + $0x3e8] sm:$0xff] %v7255_v60  ;;  %v7133_v23 = vpop.f32.mrf.mxu1  ;;  %v7028_v3 = vpop.f32.mrf.mxu0 }
 0x6ab   :  { %7598 = vst [vmem:[#allocation3 + $0x578] sm:$0xff] %v7380_v7 }
 0x6ac   :  { %7499 = vst [vmem:[#allocation3 + $0x260] sm:$0xff] %v7133_v23 }
 0x6ad   :  { %7457 = vst [vmem:[#allocation3 + $0x110] sm:$0xff] %v7028_v3 }
 0x6b1   :  { %v7258_v1 = vpop.f32.mrf.mxu2  ;;  %v7383_v48 = vpop.f32.mrf.mxu3 }
 0x6b2   :  { %7549 = vst [vmem:[#allocation3 + $0x3f0] sm:$0xff] %v7258_v1  ;;  %v7135_v16 = vpop.f32.mrf.mxu1  ;;  %v7030_v27 = vpop.f32.mrf.mxu0 }
 0x6b3   :  { %7599 = vst [vmem:[#allocation3 + $0x580] sm:$0xff] %v7383_v48 }
 0x6b4   :  { %7500 = vst [vmem:[#allocation3 + $0x268] sm:$0xff] %v7135_v16 }
 0x6b5   :  { %7458 = vst [vmem:[#allocation3 + $0x118] sm:$0xff] %v7030_v27 }
 0x6b9   :  { %v7260_v20 = vpop.f32.mrf.mxu2  ;;  %v7385_v61 = vpop.f32.mrf.mxu3 }
 0x6ba   :  { %7550 = vst [vmem:[#allocation3 + $0x3f8] sm:$0xff] %v7260_v20  ;;  %v7138_v5 = vpop.f32.mrf.mxu1  ;;  %v7033_v53 = vpop.f32.mrf.mxu0 }
 0x6bb   :  { %7600 = vst [vmem:[#allocation3 + $0x588] sm:$0xff] %v7385_v61 }
 0x6bc   :  { %7501 = vst [vmem:[#allocation3 + $0x270] sm:$0xff] %v7138_v5 }
 0x6bd   :  { %7459 = vst [vmem:[#allocation3 + $0x120] sm:$0xff] %v7033_v53 }
 0x6c1   :  { %v7263_v40 = vpop.f32.mrf.mxu2  ;;  %v7388_v31 = vpop.f32.mrf.mxu3 }
 0x6c2   :  { %7551 = vst [vmem:[#allocation3 + $0x400] sm:$0xff] %v7263_v40  ;;  %v7140_v51 = vpop.f32.mrf.mxu1  ;;  %v7035_v57 = vpop.f32.mrf.mxu0 }
 0x6c3   :  { %7601 = vst [vmem:[#allocation3 + $0x590] sm:$0xff] %v7388_v31 }
 0x6c4   :  { %7502 = vst [vmem:[#allocation3 + $0x278] sm:$0xff] %v7140_v51 }
 0x6c5   :  { %7460 = vst [vmem:[#allocation3 + $0x128] sm:$0xff] %v7035_v57 }
 0x6c9   :  { %v7265_v21 = vpop.f32.mrf.mxu2  ;;  %v7390_v0 = vpop.f32.mrf.mxu3 }
 0x6ca   :  { %7552 = vst [vmem:[#allocation3 + $0x408] sm:$0xff] %v7265_v21  ;;  %v7143_v52 = vpop.f32.mrf.mxu1  ;;  %v7038_v45 = vpop.f32.mrf.mxu0 }
 0x6cb   :  { %7602 = vst [vmem:[#allocation3 + $0x598] sm:$0xff] %v7390_v0 }
 0x6cc   :  { %7503 = vst [vmem:[#allocation3 + $0x280] sm:$0xff] %v7143_v52 }
 0x6cd   :  { %7461 = vst [vmem:[#allocation3 + $0x130] sm:$0xff] %v7038_v45 }
 0x6d1   :  { %v7268_v35 = vpop.f32.mrf.mxu2  ;;  %v7393_v26 = vpop.f32.mrf.mxu3 }
 0x6d2   :  { %7553 = vst [vmem:[#allocation3 + $0x410] sm:$0xff] %v7268_v35  ;;  %v7145_v39 = vpop.f32.mrf.mxu1  ;;  %v7040_v18 = vpop.f32.mrf.mxu0 }
 0x6d3   :  { %7603 = vst [vmem:[#allocation3 + $0x5a0] sm:$0xff] %v7393_v26 }
 0x6d4   :  { %7504 = vst [vmem:[#allocation3 + $0x288] sm:$0xff] %v7145_v39 }
 0x6d5   :  { %7462 = vst [vmem:[#allocation3 + $0x138] sm:$0xff] %v7040_v18 }
 0x6d9   :  { %v7270_v6 = vpop.f32.mrf.mxu2  ;;  %v7395_v63 = vpop.f32.mrf.mxu3 }
 0x6da   :  { %7554 = vst [vmem:[#allocation3 + $0x418] sm:$0xff] %v7270_v6  ;;  %v7148_v50 = vpop.f32.mrf.mxu1  ;;  %v7043_v36 = vpop.f32.mrf.mxu0 }
 0x6db   :  { %7604 = vst [vmem:[#allocation3 + $0x5a8] sm:$0xff] %v7395_v63 }
 0x6dc   :  { %7505 = vst [vmem:[#allocation3 + $0x290] sm:$0xff] %v7148_v50 }
 0x6dd   :  { %7463 = vst [vmem:[#allocation3 + $0x140] sm:$0xff] %v7043_v36 }
 0x6e1   :  { %v7273_v2 = vpop.f32.mrf.mxu2  ;;  %v7398_v59 = vpop.f32.mrf.mxu3 }
 0x6e2   :  { %7555 = vst [vmem:[#allocation3 + $0x420] sm:$0xff] %v7273_v2  ;;  %v7150_v55 = vpop.f32.mrf.mxu1  ;;  %v7045_v34 = vpop.f32.mrf.mxu0 }
 0x6e3   :  { %7605 = vst [vmem:[#allocation3 + $0x5b0] sm:$0xff] %v7398_v59 }
 0x6e4   :  { %7506 = vst [vmem:[#allocation3 + $0x298] sm:$0xff] %v7150_v55 }
 0x6e5   :  { %7464 = vst [vmem:[#allocation3 + $0x148] sm:$0xff] %v7045_v34 }
 0x6e9   :  { %v7275_v42 = vpop.f32.mrf.mxu2  ;;  %v7400_v17 = vpop.f32.mrf.mxu3 }
 0x6ea   :  { %7556 = vst [vmem:[#allocation3 + $0x428] sm:$0xff] %v7275_v42  ;;  %v7153_v4 = vpop.f32.mrf.mxu1 }
 0x6eb   :  { %7606 = vst [vmem:[#allocation3 + $0x5b8] sm:$0xff] %v7400_v17 }
 0x6ec   :  { %7507 = vst [vmem:[#allocation3 + $0x2a0] sm:$0xff] %v7153_v4 }
 0x6f1   :  { %v7278_v54 = vpop.f32.mrf.mxu2  ;;  %v7403_v9 = vpop.f32.mrf.mxu3 }
 0x6f2   :  { %7557 = vst [vmem:[#allocation3 + $0x430] sm:$0xff] %v7278_v54  ;;  %v7155_v62 = vpop.f32.mrf.mxu1 }
 0x6f3   :  { %7607 = vst [vmem:[#allocation3 + $0x5c0] sm:$0xff] %v7403_v9 }
 0x6f4   :  { %7508 = vst [vmem:[#allocation3 + $0x2a8] sm:$0xff] %v7155_v62 }
 0x6f9   :  { %v7280_v19 = vpop.f32.mrf.mxu2  ;;  %v7405_v38 = vpop.f32.mrf.mxu3 }
 0x6fa   :  { %7558 = vst [vmem:[#allocation3 + $0x438] sm:$0xff] %v7280_v19  ;;  %v7158_v33 = vpop.f32.mrf.mxu1 }
 0x6fb   :  { %7608 = vst [vmem:[#allocation3 + $0x5c8] sm:$0xff] %v7405_v38 }
 0x6fc   :  { %7509 = vst [vmem:[#allocation3 + $0x2b0] sm:$0xff] %v7158_v33 }
 0x701   :  { %v7283_v15 = vpop.f32.mrf.mxu2  ;;  %v7408_v30 = vpop.f32.mrf.mxu3 }
 0x702   :  { %7559 = vst [vmem:[#allocation3 + $0x440] sm:$0xff] %v7283_v15  ;;  %v7160_v22 = vpop.f32.mrf.mxu1 }
 0x703   :  { %7609 = vst [vmem:[#allocation3 + $0x5d0] sm:$0xff] %v7408_v30 }
 0x704   :  { %7510 = vst [vmem:[#allocation3 + $0x2b8] sm:$0xff] %v7160_v22 }
 0x709   :  { %v7285_v13 = vpop.f32.mrf.mxu2  ;;  %v7410_v25 = vpop.f32.mrf.mxu3 }
 0x70a   :  { %7560 = vst [vmem:[#allocation3 + $0x448] sm:$0xff] %v7285_v13  ;;  %v7163_v44 = vpop.f32.mrf.mxu1 }
 0x70b   :  { %7610 = vst [vmem:[#allocation3 + $0x5d8] sm:$0xff] %v7410_v25 }
 0x70c   :  { %7511 = vst [vmem:[#allocation3 + $0x2c0] sm:$0xff] %v7163_v44 }
 0x711   :  { %v7288_v28 = vpop.f32.mrf.mxu2  ;;  %v7413_v46 = vpop.f32.mrf.mxu3 }
 0x712   :  { %7561 = vst [vmem:[#allocation3 + $0x450] sm:$0xff] %v7288_v28  ;;  %v7165_v11 = vpop.f32.mrf.mxu1 }
 0x713   :  { %7611 = vst [vmem:[#allocation3 + $0x5e0] sm:$0xff] %v7413_v46 }
 0x714   :  { %7512 = vst [vmem:[#allocation3 + $0x2c8] sm:$0xff] %v7165_v11 }
 0x719   :  { %v7290_v12 = vpop.f32.mrf.mxu2  ;;  %v7415_v58 = vpop.f32.mrf.mxu3 }
 0x71a   :  { %7562 = vst [vmem:[#allocation3 + $0x458] sm:$0xff] %v7290_v12  ;;  %v7168_v8 = vpop.f32.mrf.mxu1 }
 0x71b   :  { %7612 = vst [vmem:[#allocation3 + $0x5e8] sm:$0xff] %v7415_v58 }
 0x71c   :  { %7513 = vst [vmem:[#allocation3 + $0x2d0] sm:$0xff] %v7168_v8 }
 0x721   :  { %v7293_v29 = vpop.f32.mrf.mxu2  ;;  %v7418_v43 = vpop.f32.mrf.mxu3 }
 0x722   :  { %7563 = vst [vmem:[#allocation3 + $0x460] sm:$0xff] %v7293_v29  ;;  %v7170_v32 = vpop.f32.mrf.mxu1 }
 0x723   :  { %7613 = vst [vmem:[#allocation3 + $0x5f0] sm:$0xff] %v7418_v43 }
 0x724   :  { %7514 = vst [vmem:[#allocation3 + $0x2d8] sm:$0xff] %v7170_v32 }
 0x729   :  { %v7295_v10 = vpop.f32.mrf.mxu2  ;;  %v7420_v41 = vpop.f32.mrf.mxu3 }
 0x72a   :  { %7564 = vst [vmem:[#allocation3 + $0x468] sm:$0xff] %v7295_v10 }
 0x72b   :  { %7614 = vst [vmem:[#allocation3 + $0x5f8] sm:$0xff] %v7420_v41 }
 0x72c   :  { %7627 = dma.vmem_to_hbm [thread:$0]  %s7620_s27, 24576, %s7622_s30, [#allocation4], %s10995_s7, %s10995_s7, %s10996_s8  }
 0x72d   :  { %10992 = dma.done.wait [#allocation4], 24576  }
 0x72e   :  { %10993 = vsyncadd [#allocation4], 4294942720 }
 0x72f   :  { %7632 = vsyncpa [#allocation4], 1 }

</bundles_post_ra>
